<compile_context>
chip_gen: v6e
topology: v6e:2x2x1
jax: 0.10.0
libtpu: 0.0.40
codegen_flags: <defaults>
</compile_context>

<pallas_src>
import functools

import numpy as np
import jax
import jax.numpy as jnp
from jax.experimental import pallas as pl
from jax.experimental.pallas import tpu as pltpu

# ----------------------------------------------------------------------------
# Network geometry (LeNet-5 on 3x32x32)
# ----------------------------------------------------------------------------
H0, W0, C0 = 32, 32, 3
K = 5
C1 = 6
H1, W1 = H0 - K + 1, W0 - K + 1            # 28, 28
H1P, W1P = H1 // 2, W1 // 2                # 14, 14
C2 = 16
H2, W2 = H1P - K + 1, W1P - K + 1          # 10, 10
H2P, W2P = H2 // 2, W2 // 2                # 5, 5
F1, F2, F3 = 120, 84, 10
LANES = 128                                # lane-padded width of every slab


def _round_up(v, m):
    return (v + m - 1) // m * m


# ----------------------------------------------------------------------------
# The fused Pallas kernel: one batch tile of B images per grid step.
#
# In-kernel activation layout: 2-D slabs with rows = (h, b) (h-major, batch
# minor, B a multiple of 8 so all row slices are sublane-aligned) and lanes =
# (w, c) padded to 128.  The input arrives pre-split by row parity so every
# conv LHS chunk is a contiguous ref read.
# ----------------------------------------------------------------------------
def _lenet5_bn_kernel(x_ref, w1_ref, s1_ref, cs1_ref,
                      w2_ref, s2_ref, cs2_ref,
                      wf1_ref, sf1_ref, wf2_ref, sf2_ref, wf3_ref, bf3_ref,
                      o_ref):
    b = x_ref.shape[2]
    dot = functools.partial(jnp.dot, preferred_element_type=jnp.float32)

    def pooled_conv(read_row, n_pool, w_ref, s_ref, cs_ref):
        """conv + folded-BN + relu + 2x2/2 max-pool, fully batched.

        For each pooling row-parity p, build the wide-K LHS whose row block j
        holds input rows 2*j + p + kh (kh = 0..4) and run ONE MXU matmul of
        shape (n_pool*b, 5*128) @ (5*128, N).  max over the two parities is
        the H-pool; the 0/1 column-selector matmuls are the W-pool.
        """
        acc = None
        for parity in range(2):
            chunks = []
            for kh in range(K):
                rows = [read_row(2 * j + parity + kh) for j in range(n_pool)]
                chunks.append(jnp.concatenate(rows, axis=0))     # (n_pool*b, 128)
            lhs = jnp.concatenate(chunks, axis=-1)               # (n_pool*b, 5*128)
            a = dot(lhs, w_ref[...])                             # f32 accum in MXU
            acc = a if acc is None else jnp.maximum(acc, a)
        y = jnp.maximum(acc + s_ref[...], 0.0).astype(jnp.bfloat16)
        pooled = jnp.maximum(dot(y, cs_ref[0]), dot(y, cs_ref[1]))
        return pooled.astype(jnp.bfloat16)                       # (n_pool*b, 128)

    # ---- conv1 + bn1 + relu + pool1 (fused) ----
    # input rows are read straight off the parity-split ref: row h -> [h%2, h//2]
    p1 = pooled_conv(lambda h: x_ref[h % 2, h // 2], H1P,
                     w1_ref, s1_ref, cs1_ref)                    # (14b, 128)

    # ---- conv2 + bn2 + relu + pool2 (fused) ----
    p2 = pooled_conv(lambda h: p1[h * b:(h + 1) * b, :], H2P,
                     w2_ref, s2_ref, cs2_ref)                    # (5b, 128)

    # ---- fc1 + bn3 + relu (PyTorch NCHW flatten folded into the weight slab) ----
    zf = jnp.concatenate([p2[h * b:(h + 1) * b, :] for h in range(H2P)],
                         axis=-1)                                # (b, 5*128)
    z = jnp.maximum(dot(zf, wf1_ref[...]) + sf1_ref[...],
                    0.0).astype(jnp.bfloat16)                    # (b, 120)

    # ---- fc2 + bn4 + relu ----
    z = jnp.maximum(dot(z, wf2_ref[...]) + sf2_ref[...],
                    0.0).astype(jnp.bfloat16)                    # (b, 84)

    # ---- fc3 + log_softmax (padding lanes carry a -1e30 bias so they vanish) ----
    logits = dot(z, wf3_ref[...]) + bf3_ref[...]                 # (b, 128) f32
    m = jnp.max(logits, axis=1, keepdims=True)
    e = logits - m
    lse = jnp.log(jnp.sum(jnp.exp(e), axis=1, keepdims=True))
    o_ref[...] = (e - lse).astype(o_ref.dtype)                   # lane-dense store


def lenet5_bn_forward(x_nchw, ops, *, block_b=32):
    """Eval-mode LeNet5_BN forward.  x is NCHW (N, 3, 32, 32) like the module."""
    n = x_nchw.shape[0]
    b = max(8, (min(block_b, _round_up(n, 8)) // 8) * 8)   # batch tile, mult of 8
    n_pad = _round_up(n, b)

    # NCHW -> (row-parity, H/2, N, W*C) bf16 slab, lanes zero-padded to 128.
    # TODO(synk): accept a pre-packed input layout to skip this XLA-side permute.
    x = jnp.transpose(x_nchw.astype(jnp.bfloat16), (2, 0, 3, 1))   # (H, N, W, C)
    x = x.reshape(H0, n, W0 * C0)
    x = jnp.pad(x, ((0, 0), (0, n_pad - n), (0, LANES - W0 * C0)))
    x = x.reshape(H0 // 2, 2, n_pad, LANES).transpose(1, 0, 2, 3)  # (2,16,Np,128)

    weights = (ops["w1"], ops["s1"], ops["cs1"],
               ops["w2"], ops["s2"], ops["cs2"],
               ops["wf1"], ops["sf1"], ops["wf2"], ops["sf2"],
               ops["wf3"], ops["bf3"])

    def resident(a):          # whole array, constant index_map -> stays in VMEM
        return pl.BlockSpec(a.shape, lambda i, nd=a.ndim: (0,) * nd)

    out = pl.pallas_call(
        _lenet5_bn_kernel,
        out_shape=jax.ShapeDtypeStruct((n_pad, LANES), jnp.float32),
        grid=(n_pad // b,),
        in_specs=[pl.BlockSpec((2, H0 // 2, b, LANES), lambda i: (0, 0, i, 0))]
                 + [resident(a) for a in weights],
        out_specs=pl.BlockSpec((b, LANES), lambda i: (i, 0)),
        compiler_params=pltpu.CompilerParams(
            dimension_semantics=("parallel",)),
    )(x, *weights)
    return out[:n, :F3]


# ----------------------------------------------------------------------------
# Host-side parameter preparation (BN folding, wide-K banded conv weights,
# 0/1 pool column selectors, NCHW-flatten folding for fc1)
# ----------------------------------------------------------------------------
def bn_scale_shift(gamma, beta, mean, var, eps=1e-5):
    scale = gamma / np.sqrt(var + eps)
    shift = beta - mean * scale
    return scale, shift


def _conv_slab(w, bias, scale, shift, w_out):
    """Conv weight (Cout,Cin,KH,KW) -> one wide-K slab (KH*128, w_out*Cout) with
    BN scale folded in, plus a (1, w_out*Cout) shift row.  The kh-th 128-row
    block is indexed by (w_in*Cin + c_in); unused rows stay zero."""
    cout, cin, kh_n, kw_n = w.shape
    wf = (w * scale[:, None, None, None]).astype(np.float32)
    slab = np.zeros((kh_n * LANES, w_out * cout), np.float32)
    for kh in range(kh_n):
        for wo in range(w_out):
            for kw in range(kw_n):
                wi = wo + kw
                slab[kh * LANES + wi * cin: kh * LANES + (wi + 1) * cin,
                     wo * cout:(wo + 1) * cout] = wf[:, :, kh, kw].T
    shift_row = np.tile((bias * scale + shift).astype(np.float32), w_out)[None, :]
    return slab, shift_row


def _pool_col_selectors(w_in, c):
    """Exact 0/1 selectors for the W half of a 2x2/2 max-pool on (·, w_in*c)
    slabs; output is lane-padded to 128 (padding columns stay zero)."""
    w_out = w_in // 2
    cs = np.zeros((2, w_in * c, LANES), np.float32)
    for s in range(2):
        for wp in range(w_out):
            for ci in range(c):
                cs[s, (2 * wp + s) * c + ci, wp * c + ci] = 1.0
    return cs


def _fc1_slab(w, bias, scale, shift, c, h, wd):
    """fc1 weight (out, C*H*W) in PyTorch NCHW-flatten order -> one wide-K slab
    (H*128, out) matching the kernel's per-h (w*C + c) lane layout, BN folded."""
    out_dim = w.shape[0]
    wf = (w * scale[:, None]).astype(np.float32)
    slab = np.zeros((h * LANES, out_dim), np.float32)
    for hh in range(h):
        for ww in range(wd):
            for cc in range(c):
                slab[hh * LANES + ww * c + cc, :] = wf[:, cc * h * wd + hh * wd + ww]
    shift_row = (bias * scale + shift).astype(np.float32)[None, :]
    return slab, shift_row


def prepare_operands(p):
    pn = {k: (tuple(np.asarray(t, np.float32) for t in v) if isinstance(v, tuple)
              else np.asarray(v, np.float32)) for k, v in p.items()}

    sc1, sh1 = bn_scale_shift(*pn["bn1"])
    sc2, sh2 = bn_scale_shift(*pn["bn2"])
    sc3, sh3 = bn_scale_shift(*pn["bn3"])
    sc4, sh4 = bn_scale_shift(*pn["bn4"])

    w1, s1 = _conv_slab(pn["conv1_w"], pn["conv1_b"], sc1, sh1, W1)
    cs1 = _pool_col_selectors(W1, C1)
    w2, s2 = _conv_slab(pn["conv2_w"], pn["conv2_b"], sc2, sh2, W2)
    cs2 = _pool_col_selectors(W2, C2)
    wf1, sf1 = _fc1_slab(pn["fc1_w"], pn["fc1_b"], sc3, sh3, C2, H2P, W2P)
    wf2 = (pn["fc2_w"].T * sc4[None, :]).astype(np.float32)
    sf2 = (pn["fc2_b"] * sc4 + sh4).astype(np.float32)[None, :]
    wf3 = np.zeros((F2, LANES), np.float32)
    wf3[:, :F3] = pn["fc3_w"].T
    bf3 = np.full((1, LANES), -1e30, np.float32)   # kills padding lanes in softmax
    bf3[0, :F3] = pn["fc3_b"]

    bf16 = lambda a: jnp.asarray(a, jnp.bfloat16)
    f32 = lambda a: jnp.asarray(a, jnp.float32)
    return dict(w1=bf16(w1), s1=f32(s1), cs1=bf16(cs1),
                w2=bf16(w2), s2=f32(s2), cs2=bf16(cs2),
                wf1=bf16(wf1), sf1=f32(sf1), wf2=bf16(wf2), sf2=f32(sf2),
                wf3=bf16(wf3), bf3=f32(bf3))


# ----------------------------------------------------------------------------
# Parameter init (PyTorch layouts) and pure-JAX reference
# ----------------------------------------------------------------------------
def init_params(key):
    ks = jax.random.split(key, 16)
    p = {}
    p["conv1_w"] = 0.1 * jax.random.normal(ks[0], (6, 3, 5, 5), jnp.float32)
    p["conv1_b"] = 0.1 * jax.random.normal(ks[1], (6,), jnp.float32)
    p["conv2_w"] = 0.1 * jax.random.normal(ks[2], (16, 6, 5, 5), jnp.float32)
    p["conv2_b"] = 0.1 * jax.random.normal(ks[3], (16,), jnp.float32)
    p["fc1_w"] = 0.05 * jax.random.normal(ks[4], (120, 400), jnp.float32)
    p["fc1_b"] = 0.05 * jax.random.normal(ks[5], (120,), jnp.float32)
    p["fc2_w"] = 0.05 * jax.random.normal(ks[6], (84, 120), jnp.float32)
    p["fc2_b"] = 0.05 * jax.random.normal(ks[7], (84,), jnp.float32)
    p["fc3_w"] = 0.05 * jax.random.normal(ks[8], (10, 84), jnp.float32)
    p["fc3_b"] = 0.05 * jax.random.normal(ks[9], (10,), jnp.float32)

    def bn(key, n):
        k1, k2, k3, k4 = jax.random.split(key, 4)
        gamma = 1.0 + 0.1 * jax.random.normal(k1, (n,), jnp.float32)
        beta = 0.1 * jax.random.normal(k2, (n,), jnp.float32)
        mean = 0.1 * jax.random.normal(k3, (n,), jnp.float32)
        var = 1.0 + 0.1 * jnp.abs(jax.random.normal(k4, (n,), jnp.float32))
        return gamma, beta, mean, var

    p["bn1"] = bn(ks[10], 6)
    p["bn2"] = bn(ks[11], 16)
    p["bn3"] = bn(ks[12], 120)
    p["bn4"] = bn(ks[13], 84)
    return p


def lenet5_bn_reference(x_nchw, p):
    def conv(x, w, b):
        y = jax.lax.conv_general_dilated(x, w, (1, 1), "VALID",
                                         dimension_numbers=("NCHW", "OIHW", "NCHW"))
        return y + b[None, :, None, None]

    def bn2d(x, prm, eps=1e-5):
        g, b, m, v = prm
        return (x - m[None, :, None, None]) / jnp.sqrt(v[None, :, None, None] + eps) \
            * g[None, :, None, None] + b[None, :, None, None]

    def bn1d(x, prm, eps=1e-5):
        g, b, m, v = prm
        return (x - m) / jnp.sqrt(v + eps) * g + b

    def pool(x):
        return jax.lax.reduce_window(x, -jnp.inf, jax.lax.max,
                                     (1, 1, 2, 2), (1, 1, 2, 2), "VALID")

    x = x_nchw.astype(jnp.float32)
    x = jnp.maximum(bn2d(conv(x, p["conv1_w"], p["conv1_b"]), p["bn1"]), 0.0)
    x = pool(x)
    x = jnp.maximum(bn2d(conv(x, p["conv2_w"], p["conv2_b"]), p["bn2"]), 0.0)
    x = pool(x)
    x = x.reshape(x.shape[0], -1)
    x = jnp.maximum(bn1d(x @ p["fc1_w"].T + p["fc1_b"], p["bn3"]), 0.0)
    x = jnp.maximum(bn1d(x @ p["fc2_w"].T + p["fc2_b"], p["bn4"]), 0.0)
    x = x @ p["fc3_w"].T + p["fc3_b"]
    return jax.nn.log_softmax(x, axis=1)


if __name__ == "__main__":
    key = jax.random.PRNGKey(0)
    kx, kp = jax.random.split(key)
    # LeNet-5 requires 32x32 spatial / 3 channels; batch 16 with B=8 -> grid of 2
    # steps so both v7x TensorCores get work.
    x = jax.random.normal(kx, (16, 3, 32, 32), jnp.float32)
    params = init_params(kp)
    ops = prepare_operands(params)

    fwd = jax.jit(functools.partial(lenet5_bn_forward, block_b=8))
    out = jax.block_until_ready(fwd(x, ops))
    assert out.shape == (16, 10)

    ref = jax.block_until_ready(lenet5_bn_reference(x, params))
    err = float(jnp.max(jnp.abs(out - ref)))
    assert err < 3e-3, f"max abs err {err}"
    print("KERNEL_OK")
</pallas_src>

<mosaic_0001>
module attributes {stable_mosaic.version = 11 : i64} {
  func.func @_lenet5_bn_kernel(%arg0: i32, %arg1: memref<2x16x8x128xbf16, #tpu.memory_space<vmem>>, %arg2: memref<640x168xbf16, #tpu.memory_space<vmem>>, %arg3: memref<1x168xf32, #tpu.memory_space<vmem>>, %arg4: memref<2x168x128xbf16, #tpu.memory_space<vmem>>, %arg5: memref<640x160xbf16, #tpu.memory_space<vmem>>, %arg6: memref<1x160xf32, #tpu.memory_space<vmem>>, %arg7: memref<2x160x128xbf16, #tpu.memory_space<vmem>>, %arg8: memref<640x120xbf16, #tpu.memory_space<vmem>>, %arg9: memref<1x120xf32, #tpu.memory_space<vmem>>, %arg10: memref<120x84xbf16, #tpu.memory_space<vmem>>, %arg11: memref<1x84xf32, #tpu.memory_space<vmem>>, %arg12: memref<84x128xbf16, #tpu.memory_space<vmem>>, %arg13: memref<1x128xf32, #tpu.memory_space<vmem>>, %arg14: memref<8x128xf32, #tpu.memory_space<vmem>>) attributes {dimension_semantics = [#tpu.dimension_semantics<parallel>], iteration_bounds = array<i64: 2>, scalar_prefetch = 0 : i64, scratch_operands = 0 : i64, tpu.core_type = #tpu.core_type<tc>, window_params = [{transform_indices = @transform_0, window_bounds = array<i64: 2, 16, 8, 128>}, {pipeline_mode = #tpu.pipeline_mode<synchronous>, transform_indices = @transform_1, window_bounds = array<i64: 640, 168>}, {pipeline_mode = #tpu.pipeline_mode<synchronous>, transform_indices = @transform_2, window_bounds = array<i64: 1, 168>}, {pipeline_mode = #tpu.pipeline_mode<synchronous>, transform_indices = @transform_3, window_bounds = array<i64: 2, 168, 128>}, {pipeline_mode = #tpu.pipeline_mode<synchronous>, transform_indices = @transform_4, window_bounds = array<i64: 640, 160>}, {pipeline_mode = #tpu.pipeline_mode<synchronous>, transform_indices = @transform_5, window_bounds = array<i64: 1, 160>}, {pipeline_mode = #tpu.pipeline_mode<synchronous>, transform_indices = @transform_6, window_bounds = array<i64: 2, 160, 128>}, {pipeline_mode = #tpu.pipeline_mode<synchronous>, transform_indices = @transform_7, window_bounds = array<i64: 640, 120>}, {pipeline_mode = #tpu.pipeline_mode<synchronous>, transform_indices = @transform_8, window_bounds = array<i64: 1, 120>}, {pipeline_mode = #tpu.pipeline_mode<synchronous>, transform_indices = @transform_9, window_bounds = array<i64: 120, 84>}, {pipeline_mode = #tpu.pipeline_mode<synchronous>, transform_indices = @transform_10, window_bounds = array<i64: 1, 84>}, {pipeline_mode = #tpu.pipeline_mode<synchronous>, transform_indices = @transform_11, window_bounds = array<i64: 84, 128>}, {pipeline_mode = #tpu.pipeline_mode<synchronous>, transform_indices = @transform_12, window_bounds = array<i64: 1, 128>}, {transform_indices = @transform_13, window_bounds = array<i64: 8, 128>}]} {
    %c0 = arith.constant 0 : index
    %c0_0 = arith.constant 0 : index
    %c0_1 = arith.constant 0 : index
    %c0_2 = arith.constant 0 : index
    %0 = vector.load %arg1[%c0, %c0_0, %c0_1, %c0_2] : memref<2x16x8x128xbf16, #tpu.memory_space<vmem>>, vector<1x1x8x128xbf16>
    %1 = vector.shape_cast %0 : vector<1x1x8x128xbf16> to vector<8x128xbf16>
    %c0_3 = arith.constant 0 : index
    %c1 = arith.constant 1 : index
    %c0_4 = arith.constant 0 : index
    %c0_5 = arith.constant 0 : index
    %2 = vector.load %arg1[%c0_3, %c1, %c0_4, %c0_5] : memref<2x16x8x128xbf16, #tpu.memory_space<vmem>>, vector<1x1x8x128xbf16>
    %3 = vector.shape_cast %2 : vector<1x1x8x128xbf16> to vector<8x128xbf16>
    %c0_6 = arith.constant 0 : index
    %c2 = arith.constant 2 : index
    %c0_7 = arith.constant 0 : index
    %c0_8 = arith.constant 0 : index
    %4 = vector.load %arg1[%c0_6, %c2, %c0_7, %c0_8] : memref<2x16x8x128xbf16, #tpu.memory_space<vmem>>, vector<1x1x8x128xbf16>
    %5 = vector.shape_cast %4 : vector<1x1x8x128xbf16> to vector<8x128xbf16>
    %c0_9 = arith.constant 0 : index
    %c3 = arith.constant 3 : index
    %c0_10 = arith.constant 0 : index
    %c0_11 = arith.constant 0 : index
    %6 = vector.load %arg1[%c0_9, %c3, %c0_10, %c0_11] : memref<2x16x8x128xbf16, #tpu.memory_space<vmem>>, vector<1x1x8x128xbf16>
    %7 = vector.shape_cast %6 : vector<1x1x8x128xbf16> to vector<8x128xbf16>
    %c0_12 = arith.constant 0 : index
    %c4 = arith.constant 4 : index
    %c0_13 = arith.constant 0 : index
    %c0_14 = arith.constant 0 : index
    %8 = vector.load %arg1[%c0_12, %c4, %c0_13, %c0_14] : memref<2x16x8x128xbf16, #tpu.memory_space<vmem>>, vector<1x1x8x128xbf16>
    %9 = vector.shape_cast %8 : vector<1x1x8x128xbf16> to vector<8x128xbf16>
    %c0_15 = arith.constant 0 : index
    %c5 = arith.constant 5 : index
    %c0_16 = arith.constant 0 : index
    %c0_17 = arith.constant 0 : index
    %10 = vector.load %arg1[%c0_15, %c5, %c0_16, %c0_17] : memref<2x16x8x128xbf16, #tpu.memory_space<vmem>>, vector<1x1x8x128xbf16>
    %11 = vector.shape_cast %10 : vector<1x1x8x128xbf16> to vector<8x128xbf16>
    %c0_18 = arith.constant 0 : index
    %c6 = arith.constant 6 : index
    %c0_19 = arith.constant 0 : index
    %c0_20 = arith.constant 0 : index
    %12 = vector.load %arg1[%c0_18, %c6, %c0_19, %c0_20] : memref<2x16x8x128xbf16, #tpu.memory_space<vmem>>, vector<1x1x8x128xbf16>
    %13 = vector.shape_cast %12 : vector<1x1x8x128xbf16> to vector<8x128xbf16>
    %c0_21 = arith.constant 0 : index
    %c7 = arith.constant 7 : index
    %c0_22 = arith.constant 0 : index
    %c0_23 = arith.constant 0 : index
    %14 = vector.load %arg1[%c0_21, %c7, %c0_22, %c0_23] : memref<2x16x8x128xbf16, #tpu.memory_space<vmem>>, vector<1x1x8x128xbf16>
    %15 = vector.shape_cast %14 : vector<1x1x8x128xbf16> to vector<8x128xbf16>
    %c0_24 = arith.constant 0 : index
    %c8 = arith.constant 8 : index
    %c0_25 = arith.constant 0 : index
    %c0_26 = arith.constant 0 : index
    %16 = vector.load %arg1[%c0_24, %c8, %c0_25, %c0_26] : memref<2x16x8x128xbf16, #tpu.memory_space<vmem>>, vector<1x1x8x128xbf16>
    %17 = vector.shape_cast %16 : vector<1x1x8x128xbf16> to vector<8x128xbf16>
    %c0_27 = arith.constant 0 : index
    %c9 = arith.constant 9 : index
    %c0_28 = arith.constant 0 : index
    %c0_29 = arith.constant 0 : index
    %18 = vector.load %arg1[%c0_27, %c9, %c0_28, %c0_29] : memref<2x16x8x128xbf16, #tpu.memory_space<vmem>>, vector<1x1x8x128xbf16>
    %19 = vector.shape_cast %18 : vector<1x1x8x128xbf16> to vector<8x128xbf16>
    %c0_30 = arith.constant 0 : index
    %c10 = arith.constant 10 : index
    %c0_31 = arith.constant 0 : index
    %c0_32 = arith.constant 0 : index
    %20 = vector.load %arg1[%c0_30, %c10, %c0_31, %c0_32] : memref<2x16x8x128xbf16, #tpu.memory_space<vmem>>, vector<1x1x8x128xbf16>
    %21 = vector.shape_cast %20 : vector<1x1x8x128xbf16> to vector<8x128xbf16>
    %c0_33 = arith.constant 0 : index
    %c11 = arith.constant 11 : index
    %c0_34 = arith.constant 0 : index
    %c0_35 = arith.constant 0 : index
    %22 = vector.load %arg1[%c0_33, %c11, %c0_34, %c0_35] : memref<2x16x8x128xbf16, #tpu.memory_space<vmem>>, vector<1x1x8x128xbf16>
    %23 = vector.shape_cast %22 : vector<1x1x8x128xbf16> to vector<8x128xbf16>
    %c0_36 = arith.constant 0 : index
    %c12 = arith.constant 12 : index
    %c0_37 = arith.constant 0 : index
    %c0_38 = arith.constant 0 : index
    %24 = vector.load %arg1[%c0_36, %c12, %c0_37, %c0_38] : memref<2x16x8x128xbf16, #tpu.memory_space<vmem>>, vector<1x1x8x128xbf16>
    %25 = vector.shape_cast %24 : vector<1x1x8x128xbf16> to vector<8x128xbf16>
    %c0_39 = arith.constant 0 : index
    %c13 = arith.constant 13 : index
    %c0_40 = arith.constant 0 : index
    %c0_41 = arith.constant 0 : index
    %26 = vector.load %arg1[%c0_39, %c13, %c0_40, %c0_41] : memref<2x16x8x128xbf16, #tpu.memory_space<vmem>>, vector<1x1x8x128xbf16>
    %27 = vector.shape_cast %26 : vector<1x1x8x128xbf16> to vector<8x128xbf16>
    %28 = tpu.concatenate %1, %3, %5, %7, %9, %11, %13, %15, %17, %19, %21, %23, %25, %27 in 0 : vector<8x128xbf16>, vector<8x128xbf16>, vector<8x128xbf16>, vector<8x128xbf16>, vector<8x128xbf16>, vector<8x128xbf16>, vector<8x128xbf16>, vector<8x128xbf16>, vector<8x128xbf16>, vector<8x128xbf16>, vector<8x128xbf16>, vector<8x128xbf16>, vector<8x128xbf16>, vector<8x128xbf16> -> vector<112x128xbf16>
    %c1_42 = arith.constant 1 : index
    %c0_43 = arith.constant 0 : index
    %c0_44 = arith.constant 0 : index
    %c0_45 = arith.constant 0 : index
    %29 = vector.load %arg1[%c1_42, %c0_43, %c0_44, %c0_45] : memref<2x16x8x128xbf16, #tpu.memory_space<vmem>>, vector<1x1x8x128xbf16>
    %30 = vector.shape_cast %29 : vector<1x1x8x128xbf16> to vector<8x128xbf16>
    %c1_46 = arith.constant 1 : index
    %c1_47 = arith.constant 1 : index
    %c0_48 = arith.constant 0 : index
    %c0_49 = arith.constant 0 : index
    %31 = vector.load %arg1[%c1_46, %c1_47, %c0_48, %c0_49] : memref<2x16x8x128xbf16, #tpu.memory_space<vmem>>, vector<1x1x8x128xbf16>
    %32 = vector.shape_cast %31 : vector<1x1x8x128xbf16> to vector<8x128xbf16>
    %c1_50 = arith.constant 1 : index
    %c2_51 = arith.constant 2 : index
    %c0_52 = arith.constant 0 : index
    %c0_53 = arith.constant 0 : index
    %33 = vector.load %arg1[%c1_50, %c2_51, %c0_52, %c0_53] : memref<2x16x8x128xbf16, #tpu.memory_space<vmem>>, vector<1x1x8x128xbf16>
    %34 = vector.shape_cast %33 : vector<1x1x8x128xbf16> to vector<8x128xbf16>
    %c1_54 = arith.constant 1 : index
    %c3_55 = arith.constant 3 : index
    %c0_56 = arith.constant 0 : index
    %c0_57 = arith.constant 0 : index
    %35 = vector.load %arg1[%c1_54, %c3_55, %c0_56, %c0_57] : memref<2x16x8x128xbf16, #tpu.memory_space<vmem>>, vector<1x1x8x128xbf16>
    %36 = vector.shape_cast %35 : vector<1x1x8x128xbf16> to vector<8x128xbf16>
    %c1_58 = arith.constant 1 : index
    %c4_59 = arith.constant 4 : index
    %c0_60 = arith.constant 0 : index
    %c0_61 = arith.constant 0 : index
    %37 = vector.load %arg1[%c1_58, %c4_59, %c0_60, %c0_61] : memref<2x16x8x128xbf16, #tpu.memory_space<vmem>>, vector<1x1x8x128xbf16>
    %38 = vector.shape_cast %37 : vector<1x1x8x128xbf16> to vector<8x128xbf16>
    %c1_62 = arith.constant 1 : index
    %c5_63 = arith.constant 5 : index
    %c0_64 = arith.constant 0 : index
    %c0_65 = arith.constant 0 : index
    %39 = vector.load %arg1[%c1_62, %c5_63, %c0_64, %c0_65] : memref<2x16x8x128xbf16, #tpu.memory_space<vmem>>, vector<1x1x8x128xbf16>
    %40 = vector.shape_cast %39 : vector<1x1x8x128xbf16> to vector<8x128xbf16>
    %c1_66 = arith.constant 1 : index
    %c6_67 = arith.constant 6 : index
    %c0_68 = arith.constant 0 : index
    %c0_69 = arith.constant 0 : index
    %41 = vector.load %arg1[%c1_66, %c6_67, %c0_68, %c0_69] : memref<2x16x8x128xbf16, #tpu.memory_space<vmem>>, vector<1x1x8x128xbf16>
    %42 = vector.shape_cast %41 : vector<1x1x8x128xbf16> to vector<8x128xbf16>
    %c1_70 = arith.constant 1 : index
    %c7_71 = arith.constant 7 : index
    %c0_72 = arith.constant 0 : index
    %c0_73 = arith.constant 0 : index
    %43 = vector.load %arg1[%c1_70, %c7_71, %c0_72, %c0_73] : memref<2x16x8x128xbf16, #tpu.memory_space<vmem>>, vector<1x1x8x128xbf16>
    %44 = vector.shape_cast %43 : vector<1x1x8x128xbf16> to vector<8x128xbf16>
    %c1_74 = arith.constant 1 : index
    %c8_75 = arith.constant 8 : index
    %c0_76 = arith.constant 0 : index
    %c0_77 = arith.constant 0 : index
    %45 = vector.load %arg1[%c1_74, %c8_75, %c0_76, %c0_77] : memref<2x16x8x128xbf16, #tpu.memory_space<vmem>>, vector<1x1x8x128xbf16>
    %46 = vector.shape_cast %45 : vector<1x1x8x128xbf16> to vector<8x128xbf16>
    %c1_78 = arith.constant 1 : index
    %c9_79 = arith.constant 9 : index
    %c0_80 = arith.constant 0 : index
    %c0_81 = arith.constant 0 : index
    %47 = vector.load %arg1[%c1_78, %c9_79, %c0_80, %c0_81] : memref<2x16x8x128xbf16, #tpu.memory_space<vmem>>, vector<1x1x8x128xbf16>
    %48 = vector.shape_cast %47 : vector<1x1x8x128xbf16> to vector<8x128xbf16>
    %c1_82 = arith.constant 1 : index
    %c10_83 = arith.constant 10 : index
    %c0_84 = arith.constant 0 : index
    %c0_85 = arith.constant 0 : index
    %49 = vector.load %arg1[%c1_82, %c10_83, %c0_84, %c0_85] : memref<2x16x8x128xbf16, #tpu.memory_space<vmem>>, vector<1x1x8x128xbf16>
    %50 = vector.shape_cast %49 : vector<1x1x8x128xbf16> to vector<8x128xbf16>
    %c1_86 = arith.constant 1 : index
    %c11_87 = arith.constant 11 : index
    %c0_88 = arith.constant 0 : index
    %c0_89 = arith.constant 0 : index
    %51 = vector.load %arg1[%c1_86, %c11_87, %c0_88, %c0_89] : memref<2x16x8x128xbf16, #tpu.memory_space<vmem>>, vector<1x1x8x128xbf16>
    %52 = vector.shape_cast %51 : vector<1x1x8x128xbf16> to vector<8x128xbf16>
    %c1_90 = arith.constant 1 : index
    %c12_91 = arith.constant 12 : index
    %c0_92 = arith.constant 0 : index
    %c0_93 = arith.constant 0 : index
    %53 = vector.load %arg1[%c1_90, %c12_91, %c0_92, %c0_93] : memref<2x16x8x128xbf16, #tpu.memory_space<vmem>>, vector<1x1x8x128xbf16>
    %54 = vector.shape_cast %53 : vector<1x1x8x128xbf16> to vector<8x128xbf16>
    %c1_94 = arith.constant 1 : index
    %c13_95 = arith.constant 13 : index
    %c0_96 = arith.constant 0 : index
    %c0_97 = arith.constant 0 : index
    %55 = vector.load %arg1[%c1_94, %c13_95, %c0_96, %c0_97] : memref<2x16x8x128xbf16, #tpu.memory_space<vmem>>, vector<1x1x8x128xbf16>
    %56 = vector.shape_cast %55 : vector<1x1x8x128xbf16> to vector<8x128xbf16>
    %57 = tpu.concatenate %30, %32, %34, %36, %38, %40, %42, %44, %46, %48, %50, %52, %54, %56 in 0 : vector<8x128xbf16>, vector<8x128xbf16>, vector<8x128xbf16>, vector<8x128xbf16>, vector<8x128xbf16>, vector<8x128xbf16>, vector<8x128xbf16>, vector<8x128xbf16>, vector<8x128xbf16>, vector<8x128xbf16>, vector<8x128xbf16>, vector<8x128xbf16>, vector<8x128xbf16>, vector<8x128xbf16> -> vector<112x128xbf16>
    %c0_98 = arith.constant 0 : index
    %c1_99 = arith.constant 1 : index
    %c0_100 = arith.constant 0 : index
    %c0_101 = arith.constant 0 : index
    %58 = vector.load %arg1[%c0_98, %c1_99, %c0_100, %c0_101] : memref<2x16x8x128xbf16, #tpu.memory_space<vmem>>, vector<1x1x8x128xbf16>
    %59 = vector.shape_cast %58 : vector<1x1x8x128xbf16> to vector<8x128xbf16>
    %c0_102 = arith.constant 0 : index
    %c2_103 = arith.constant 2 : index
    %c0_104 = arith.constant 0 : index
    %c0_105 = arith.constant 0 : index
    %60 = vector.load %arg1[%c0_102, %c2_103, %c0_104, %c0_105] : memref<2x16x8x128xbf16, #tpu.memory_space<vmem>>, vector<1x1x8x128xbf16>
    %61 = vector.shape_cast %60 : vector<1x1x8x128xbf16> to vector<8x128xbf16>
    %c0_106 = arith.constant 0 : index
    %c3_107 = arith.constant 3 : index
    %c0_108 = arith.constant 0 : index
    %c0_109 = arith.constant 0 : index
    %62 = vector.load %arg1[%c0_106, %c3_107, %c0_108, %c0_109] : memref<2x16x8x128xbf16, #tpu.memory_space<vmem>>, vector<1x1x8x128xbf16>
    %63 = vector.shape_cast %62 : vector<1x1x8x128xbf16> to vector<8x128xbf16>
    %c0_110 = arith.constant 0 : index
    %c4_111 = arith.constant 4 : index
    %c0_112 = arith.constant 0 : index
    %c0_113 = arith.constant 0 : index
    %64 = vector.load %arg1[%c0_110, %c4_111, %c0_112, %c0_113] : memref<2x16x8x128xbf16, #tpu.memory_space<vmem>>, vector<1x1x8x128xbf16>
    %65 = vector.shape_cast %64 : vector<1x1x8x128xbf16> to vector<8x128xbf16>
    %c0_114 = arith.constant 0 : index
    %c5_115 = arith.constant 5 : index
    %c0_116 = arith.constant 0 : index
    %c0_117 = arith.constant 0 : index
    %66 = vector.load %arg1[%c0_114, %c5_115, %c0_116, %c0_117] : memref<2x16x8x128xbf16, #tpu.memory_space<vmem>>, vector<1x1x8x128xbf16>
    %67 = vector.shape_cast %66 : vector<1x1x8x128xbf16> to vector<8x128xbf16>
    %c0_118 = arith.constant 0 : index
    %c6_119 = arith.constant 6 : index
    %c0_120 = arith.constant 0 : index
    %c0_121 = arith.constant 0 : index
    %68 = vector.load %arg1[%c0_118, %c6_119, %c0_120, %c0_121] : memref<2x16x8x128xbf16, #tpu.memory_space<vmem>>, vector<1x1x8x128xbf16>
    %69 = vector.shape_cast %68 : vector<1x1x8x128xbf16> to vector<8x128xbf16>
    %c0_122 = arith.constant 0 : index
    %c7_123 = arith.constant 7 : index
    %c0_124 = arith.constant 0 : index
    %c0_125 = arith.constant 0 : index
    %70 = vector.load %arg1[%c0_122, %c7_123, %c0_124, %c0_125] : memref<2x16x8x128xbf16, #tpu.memory_space<vmem>>, vector<1x1x8x128xbf16>
    %71 = vector.shape_cast %70 : vector<1x1x8x128xbf16> to vector<8x128xbf16>
    %c0_126 = arith.constant 0 : index
    %c8_127 = arith.constant 8 : index
    %c0_128 = arith.constant 0 : index
    %c0_129 = arith.constant 0 : index
    %72 = vector.load %arg1[%c0_126, %c8_127, %c0_128, %c0_129] : memref<2x16x8x128xbf16, #tpu.memory_space<vmem>>, vector<1x1x8x128xbf16>
    %73 = vector.shape_cast %72 : vector<1x1x8x128xbf16> to vector<8x128xbf16>
    %c0_130 = arith.constant 0 : index
    %c9_131 = arith.constant 9 : index
    %c0_132 = arith.constant 0 : index
    %c0_133 = arith.constant 0 : index
    %74 = vector.load %arg1[%c0_130, %c9_131, %c0_132, %c0_133] : memref<2x16x8x128xbf16, #tpu.memory_space<vmem>>, vector<1x1x8x128xbf16>
    %75 = vector.shape_cast %74 : vector<1x1x8x128xbf16> to vector<8x128xbf16>
    %c0_134 = arith.constant 0 : index
    %c10_135 = arith.constant 10 : index
    %c0_136 = arith.constant 0 : index
    %c0_137 = arith.constant 0 : index
    %76 = vector.load %arg1[%c0_134, %c10_135, %c0_136, %c0_137] : memref<2x16x8x128xbf16, #tpu.memory_space<vmem>>, vector<1x1x8x128xbf16>
    %77 = vector.shape_cast %76 : vector<1x1x8x128xbf16> to vector<8x128xbf16>
    %c0_138 = arith.constant 0 : index
    %c11_139 = arith.constant 11 : index
    %c0_140 = arith.constant 0 : index
    %c0_141 = arith.constant 0 : index
    %78 = vector.load %arg1[%c0_138, %c11_139, %c0_140, %c0_141] : memref<2x16x8x128xbf16, #tpu.memory_space<vmem>>, vector<1x1x8x128xbf16>
    %79 = vector.shape_cast %78 : vector<1x1x8x128xbf16> to vector<8x128xbf16>
    %c0_142 = arith.constant 0 : index
    %c12_143 = arith.constant 12 : index
    %c0_144 = arith.constant 0 : index
    %c0_145 = arith.constant 0 : index
    %80 = vector.load %arg1[%c0_142, %c12_143, %c0_144, %c0_145] : memref<2x16x8x128xbf16, #tpu.memory_space<vmem>>, vector<1x1x8x128xbf16>
    %81 = vector.shape_cast %80 : vector<1x1x8x128xbf16> to vector<8x128xbf16>
    %c0_146 = arith.constant 0 : index
    %c13_147 = arith.constant 13 : index
    %c0_148 = arith.constant 0 : index
    %c0_149 = arith.constant 0 : index
    %82 = vector.load %arg1[%c0_146, %c13_147, %c0_148, %c0_149] : memref<2x16x8x128xbf16, #tpu.memory_space<vmem>>, vector<1x1x8x128xbf16>
    %83 = vector.shape_cast %82 : vector<1x1x8x128xbf16> to vector<8x128xbf16>
    %c0_150 = arith.constant 0 : index
    %c14 = arith.constant 14 : index
    %c0_151 = arith.constant 0 : index
    %c0_152 = arith.constant 0 : index
    %84 = vector.load %arg1[%c0_150, %c14, %c0_151, %c0_152] : memref<2x16x8x128xbf16, #tpu.memory_space<vmem>>, vector<1x1x8x128xbf16>
    %85 = vector.shape_cast %84 : vector<1x1x8x128xbf16> to vector<8x128xbf16>
    %86 = tpu.concatenate %59, %61, %63, %65, %67, %69, %71, %73, %75, %77, %79, %81, %83, %85 in 0 : vector<8x128xbf16>, vector<8x128xbf16>, vector<8x128xbf16>, vector<8x128xbf16>, vector<8x128xbf16>, vector<8x128xbf16>, vector<8x128xbf16>, vector<8x128xbf16>, vector<8x128xbf16>, vector<8x128xbf16>, vector<8x128xbf16>, vector<8x128xbf16>, vector<8x128xbf16>, vector<8x128xbf16> -> vector<112x128xbf16>
    %c1_153 = arith.constant 1 : index
    %c1_154 = arith.constant 1 : index
    %c0_155 = arith.constant 0 : index
    %c0_156 = arith.constant 0 : index
    %87 = vector.load %arg1[%c1_153, %c1_154, %c0_155, %c0_156] : memref<2x16x8x128xbf16, #tpu.memory_space<vmem>>, vector<1x1x8x128xbf16>
    %88 = vector.shape_cast %87 : vector<1x1x8x128xbf16> to vector<8x128xbf16>
    %c1_157 = arith.constant 1 : index
    %c2_158 = arith.constant 2 : index
    %c0_159 = arith.constant 0 : index
    %c0_160 = arith.constant 0 : index
    %89 = vector.load %arg1[%c1_157, %c2_158, %c0_159, %c0_160] : memref<2x16x8x128xbf16, #tpu.memory_space<vmem>>, vector<1x1x8x128xbf16>
    %90 = vector.shape_cast %89 : vector<1x1x8x128xbf16> to vector<8x128xbf16>
    %c1_161 = arith.constant 1 : index
    %c3_162 = arith.constant 3 : index
    %c0_163 = arith.constant 0 : index
    %c0_164 = arith.constant 0 : index
    %91 = vector.load %arg1[%c1_161, %c3_162, %c0_163, %c0_164] : memref<2x16x8x128xbf16, #tpu.memory_space<vmem>>, vector<1x1x8x128xbf16>
    %92 = vector.shape_cast %91 : vector<1x1x8x128xbf16> to vector<8x128xbf16>
    %c1_165 = arith.constant 1 : index
    %c4_166 = arith.constant 4 : index
    %c0_167 = arith.constant 0 : index
    %c0_168 = arith.constant 0 : index
    %93 = vector.load %arg1[%c1_165, %c4_166, %c0_167, %c0_168] : memref<2x16x8x128xbf16, #tpu.memory_space<vmem>>, vector<1x1x8x128xbf16>
    %94 = vector.shape_cast %93 : vector<1x1x8x128xbf16> to vector<8x128xbf16>
    %c1_169 = arith.constant 1 : index
    %c5_170 = arith.constant 5 : index
    %c0_171 = arith.constant 0 : index
    %c0_172 = arith.constant 0 : index
    %95 = vector.load %arg1[%c1_169, %c5_170, %c0_171, %c0_172] : memref<2x16x8x128xbf16, #tpu.memory_space<vmem>>, vector<1x1x8x128xbf16>
    %96 = vector.shape_cast %95 : vector<1x1x8x128xbf16> to vector<8x128xbf16>
    %c1_173 = arith.constant 1 : index
    %c6_174 = arith.constant 6 : index
    %c0_175 = arith.constant 0 : index
    %c0_176 = arith.constant 0 : index
    %97 = vector.load %arg1[%c1_173, %c6_174, %c0_175, %c0_176] : memref<2x16x8x128xbf16, #tpu.memory_space<vmem>>, vector<1x1x8x128xbf16>
    %98 = vector.shape_cast %97 : vector<1x1x8x128xbf16> to vector<8x128xbf16>
    %c1_177 = arith.constant 1 : index
    %c7_178 = arith.constant 7 : index
    %c0_179 = arith.constant 0 : index
    %c0_180 = arith.constant 0 : index
    %99 = vector.load %arg1[%c1_177, %c7_178, %c0_179, %c0_180] : memref<2x16x8x128xbf16, #tpu.memory_space<vmem>>, vector<1x1x8x128xbf16>
    %100 = vector.shape_cast %99 : vector<1x1x8x128xbf16> to vector<8x128xbf16>
    %c1_181 = arith.constant 1 : index
    %c8_182 = arith.constant 8 : index
    %c0_183 = arith.constant 0 : index
    %c0_184 = arith.constant 0 : index
    %101 = vector.load %arg1[%c1_181, %c8_182, %c0_183, %c0_184] : memref<2x16x8x128xbf16, #tpu.memory_space<vmem>>, vector<1x1x8x128xbf16>
    %102 = vector.shape_cast %101 : vector<1x1x8x128xbf16> to vector<8x128xbf16>
    %c1_185 = arith.constant 1 : index
    %c9_186 = arith.constant 9 : index
    %c0_187 = arith.constant 0 : index
    %c0_188 = arith.constant 0 : index
    %103 = vector.load %arg1[%c1_185, %c9_186, %c0_187, %c0_188] : memref<2x16x8x128xbf16, #tpu.memory_space<vmem>>, vector<1x1x8x128xbf16>
    %104 = vector.shape_cast %103 : vector<1x1x8x128xbf16> to vector<8x128xbf16>
    %c1_189 = arith.constant 1 : index
    %c10_190 = arith.constant 10 : index
    %c0_191 = arith.constant 0 : index
    %c0_192 = arith.constant 0 : index
    %105 = vector.load %arg1[%c1_189, %c10_190, %c0_191, %c0_192] : memref<2x16x8x128xbf16, #tpu.memory_space<vmem>>, vector<1x1x8x128xbf16>
    %106 = vector.shape_cast %105 : vector<1x1x8x128xbf16> to vector<8x128xbf16>
    %c1_193 = arith.constant 1 : index
    %c11_194 = arith.constant 11 : index
    %c0_195 = arith.constant 0 : index
    %c0_196 = arith.constant 0 : index
    %107 = vector.load %arg1[%c1_193, %c11_194, %c0_195, %c0_196] : memref<2x16x8x128xbf16, #tpu.memory_space<vmem>>, vector<1x1x8x128xbf16>
    %108 = vector.shape_cast %107 : vector<1x1x8x128xbf16> to vector<8x128xbf16>
    %c1_197 = arith.constant 1 : index
    %c12_198 = arith.constant 12 : index
    %c0_199 = arith.constant 0 : index
    %c0_200 = arith.constant 0 : index
    %109 = vector.load %arg1[%c1_197, %c12_198, %c0_199, %c0_200] : memref<2x16x8x128xbf16, #tpu.memory_space<vmem>>, vector<1x1x8x128xbf16>
    %110 = vector.shape_cast %109 : vector<1x1x8x128xbf16> to vector<8x128xbf16>
    %c1_201 = arith.constant 1 : index
    %c13_202 = arith.constant 13 : index
    %c0_203 = arith.constant 0 : index
    %c0_204 = arith.constant 0 : index
    %111 = vector.load %arg1[%c1_201, %c13_202, %c0_203, %c0_204] : memref<2x16x8x128xbf16, #tpu.memory_space<vmem>>, vector<1x1x8x128xbf16>
    %112 = vector.shape_cast %111 : vector<1x1x8x128xbf16> to vector<8x128xbf16>
    %c1_205 = arith.constant 1 : index
    %c14_206 = arith.constant 14 : index
    %c0_207 = arith.constant 0 : index
    %c0_208 = arith.constant 0 : index
    %113 = vector.load %arg1[%c1_205, %c14_206, %c0_207, %c0_208] : memref<2x16x8x128xbf16, #tpu.memory_space<vmem>>, vector<1x1x8x128xbf16>
    %114 = vector.shape_cast %113 : vector<1x1x8x128xbf16> to vector<8x128xbf16>
    %115 = tpu.concatenate %88, %90, %92, %94, %96, %98, %100, %102, %104, %106, %108, %110, %112, %114 in 0 : vector<8x128xbf16>, vector<8x128xbf16>, vector<8x128xbf16>, vector<8x128xbf16>, vector<8x128xbf16>, vector<8x128xbf16>, vector<8x128xbf16>, vector<8x128xbf16>, vector<8x128xbf16>, vector<8x128xbf16>, vector<8x128xbf16>, vector<8x128xbf16>, vector<8x128xbf16>, vector<8x128xbf16> -> vector<112x128xbf16>
    %c0_209 = arith.constant 0 : index
    %c2_210 = arith.constant 2 : index
    %c0_211 = arith.constant 0 : index
    %c0_212 = arith.constant 0 : index
    %116 = vector.load %arg1[%c0_209, %c2_210, %c0_211, %c0_212] : memref<2x16x8x128xbf16, #tpu.memory_space<vmem>>, vector<1x1x8x128xbf16>
    %117 = vector.shape_cast %116 : vector<1x1x8x128xbf16> to vector<8x128xbf16>
    %c0_213 = arith.constant 0 : index
    %c3_214 = arith.constant 3 : index
    %c0_215 = arith.constant 0 : index
    %c0_216 = arith.constant 0 : index
    %118 = vector.load %arg1[%c0_213, %c3_214, %c0_215, %c0_216] : memref<2x16x8x128xbf16, #tpu.memory_space<vmem>>, vector<1x1x8x128xbf16>
    %119 = vector.shape_cast %118 : vector<1x1x8x128xbf16> to vector<8x128xbf16>
    %c0_217 = arith.constant 0 : index
    %c4_218 = arith.constant 4 : index
    %c0_219 = arith.constant 0 : index
    %c0_220 = arith.constant 0 : index
    %120 = vector.load %arg1[%c0_217, %c4_218, %c0_219, %c0_220] : memref<2x16x8x128xbf16, #tpu.memory_space<vmem>>, vector<1x1x8x128xbf16>
    %121 = vector.shape_cast %120 : vector<1x1x8x128xbf16> to vector<8x128xbf16>
    %c0_221 = arith.constant 0 : index
    %c5_222 = arith.constant 5 : index
    %c0_223 = arith.constant 0 : index
    %c0_224 = arith.constant 0 : index
    %122 = vector.load %arg1[%c0_221, %c5_222, %c0_223, %c0_224] : memref<2x16x8x128xbf16, #tpu.memory_space<vmem>>, vector<1x1x8x128xbf16>
    %123 = vector.shape_cast %122 : vector<1x1x8x128xbf16> to vector<8x128xbf16>
    %c0_225 = arith.constant 0 : index
    %c6_226 = arith.constant 6 : index
    %c0_227 = arith.constant 0 : index
    %c0_228 = arith.constant 0 : index
    %124 = vector.load %arg1[%c0_225, %c6_226, %c0_227, %c0_228] : memref<2x16x8x128xbf16, #tpu.memory_space<vmem>>, vector<1x1x8x128xbf16>
    %125 = vector.shape_cast %124 : vector<1x1x8x128xbf16> to vector<8x128xbf16>
    %c0_229 = arith.constant 0 : index
    %c7_230 = arith.constant 7 : index
    %c0_231 = arith.constant 0 : index
    %c0_232 = arith.constant 0 : index
    %126 = vector.load %arg1[%c0_229, %c7_230, %c0_231, %c0_232] : memref<2x16x8x128xbf16, #tpu.memory_space<vmem>>, vector<1x1x8x128xbf16>
    %127 = vector.shape_cast %126 : vector<1x1x8x128xbf16> to vector<8x128xbf16>
    %c0_233 = arith.constant 0 : index
    %c8_234 = arith.constant 8 : index
    %c0_235 = arith.constant 0 : index
    %c0_236 = arith.constant 0 : index
    %128 = vector.load %arg1[%c0_233, %c8_234, %c0_235, %c0_236] : memref<2x16x8x128xbf16, #tpu.memory_space<vmem>>, vector<1x1x8x128xbf16>
    %129 = vector.shape_cast %128 : vector<1x1x8x128xbf16> to vector<8x128xbf16>
    %c0_237 = arith.constant 0 : index
    %c9_238 = arith.constant 9 : index
    %c0_239 = arith.constant 0 : index
    %c0_240 = arith.constant 0 : index
    %130 = vector.load %arg1[%c0_237, %c9_238, %c0_239, %c0_240] : memref<2x16x8x128xbf16, #tpu.memory_space<vmem>>, vector<1x1x8x128xbf16>
    %131 = vector.shape_cast %130 : vector<1x1x8x128xbf16> to vector<8x128xbf16>
    %c0_241 = arith.constant 0 : index
    %c10_242 = arith.constant 10 : index
    %c0_243 = arith.constant 0 : index
    %c0_244 = arith.constant 0 : index
    %132 = vector.load %arg1[%c0_241, %c10_242, %c0_243, %c0_244] : memref<2x16x8x128xbf16, #tpu.memory_space<vmem>>, vector<1x1x8x128xbf16>
    %133 = vector.shape_cast %132 : vector<1x1x8x128xbf16> to vector<8x128xbf16>
    %c0_245 = arith.constant 0 : index
    %c11_246 = arith.constant 11 : index
    %c0_247 = arith.constant 0 : index
    %c0_248 = arith.constant 0 : index
    %134 = vector.load %arg1[%c0_245, %c11_246, %c0_247, %c0_248] : memref<2x16x8x128xbf16, #tpu.memory_space<vmem>>, vector<1x1x8x128xbf16>
    %135 = vector.shape_cast %134 : vector<1x1x8x128xbf16> to vector<8x128xbf16>
    %c0_249 = arith.constant 0 : index
    %c12_250 = arith.constant 12 : index
    %c0_251 = arith.constant 0 : index
    %c0_252 = arith.constant 0 : index
    %136 = vector.load %arg1[%c0_249, %c12_250, %c0_251, %c0_252] : memref<2x16x8x128xbf16, #tpu.memory_space<vmem>>, vector<1x1x8x128xbf16>
    %137 = vector.shape_cast %136 : vector<1x1x8x128xbf16> to vector<8x128xbf16>
    %c0_253 = arith.constant 0 : index
    %c13_254 = arith.constant 13 : index
    %c0_255 = arith.constant 0 : index
    %c0_256 = arith.constant 0 : index
    %138 = vector.load %arg1[%c0_253, %c13_254, %c0_255, %c0_256] : memref<2x16x8x128xbf16, #tpu.memory_space<vmem>>, vector<1x1x8x128xbf16>
    %139 = vector.shape_cast %138 : vector<1x1x8x128xbf16> to vector<8x128xbf16>
    %c0_257 = arith.constant 0 : index
    %c14_258 = arith.constant 14 : index
    %c0_259 = arith.constant 0 : index
    %c0_260 = arith.constant 0 : index
    %140 = vector.load %arg1[%c0_257, %c14_258, %c0_259, %c0_260] : memref<2x16x8x128xbf16, #tpu.memory_space<vmem>>, vector<1x1x8x128xbf16>
    %141 = vector.shape_cast %140 : vector<1x1x8x128xbf16> to vector<8x128xbf16>
    %c0_261 = arith.constant 0 : index
    %c15 = arith.constant 15 : index
    %c0_262 = arith.constant 0 : index
    %c0_263 = arith.constant 0 : index
    %142 = vector.load %arg1[%c0_261, %c15, %c0_262, %c0_263] : memref<2x16x8x128xbf16, #tpu.memory_space<vmem>>, vector<1x1x8x128xbf16>
    %143 = vector.shape_cast %142 : vector<1x1x8x128xbf16> to vector<8x128xbf16>
    %144 = tpu.concatenate %117, %119, %121, %123, %125, %127, %129, %131, %133, %135, %137, %139, %141, %143 in 0 : vector<8x128xbf16>, vector<8x128xbf16>, vector<8x128xbf16>, vector<8x128xbf16>, vector<8x128xbf16>, vector<8x128xbf16>, vector<8x128xbf16>, vector<8x128xbf16>, vector<8x128xbf16>, vector<8x128xbf16>, vector<8x128xbf16>, vector<8x128xbf16>, vector<8x128xbf16>, vector<8x128xbf16> -> vector<112x128xbf16>
    %145 = tpu.concatenate %28, %57, %86, %115, %144 in 1 : vector<112x128xbf16>, vector<112x128xbf16>, vector<112x128xbf16>, vector<112x128xbf16>, vector<112x128xbf16> -> vector<112x640xbf16>
    %c0_264 = arith.constant 0 : index
    %c0_265 = arith.constant 0 : index
    %146 = vector.load %arg2[%c0_264, %c0_265] : memref<640x168xbf16, #tpu.memory_space<vmem>>, vector<640x168xbf16>
    %cst = arith.constant dense<0.000000e+00> : vector<112x168xf32>
    %147 = tpu.matmul %145, %146, %cst {dimension_numbers = #tpu.dot_dimension_numbers<[1], [0], [0], [1], [0, 0, 1, 1], [], []>} : vector<112x640xbf16>, vector<640x168xbf16>, vector<112x168xf32> -> vector<112x168xf32>
    %c1_266 = arith.constant 1 : index
    %c0_267 = arith.constant 0 : index
    %c0_268 = arith.constant 0 : index
    %c0_269 = arith.constant 0 : index
    %148 = vector.load %arg1[%c1_266, %c0_267, %c0_268, %c0_269] : memref<2x16x8x128xbf16, #tpu.memory_space<vmem>>, vector<1x1x8x128xbf16>
    %149 = vector.shape_cast %148 : vector<1x1x8x128xbf16> to vector<8x128xbf16>
    %c1_270 = arith.constant 1 : index
    %c1_271 = arith.constant 1 : index
    %c0_272 = arith.constant 0 : index
    %c0_273 = arith.constant 0 : index
    %150 = vector.load %arg1[%c1_270, %c1_271, %c0_272, %c0_273] : memref<2x16x8x128xbf16, #tpu.memory_space<vmem>>, vector<1x1x8x128xbf16>
    %151 = vector.shape_cast %150 : vector<1x1x8x128xbf16> to vector<8x128xbf16>
    %c1_274 = arith.constant 1 : index
    %c2_275 = arith.constant 2 : index
    %c0_276 = arith.constant 0 : index
    %c0_277 = arith.constant 0 : index
    %152 = vector.load %arg1[%c1_274, %c2_275, %c0_276, %c0_277] : memref<2x16x8x128xbf16, #tpu.memory_space<vmem>>, vector<1x1x8x128xbf16>
    %153 = vector.shape_cast %152 : vector<1x1x8x128xbf16> to vector<8x128xbf16>
    %c1_278 = arith.constant 1 : index
    %c3_279 = arith.constant 3 : index
    %c0_280 = arith.constant 0 : index
    %c0_281 = arith.constant 0 : index
    %154 = vector.load %arg1[%c1_278, %c3_279, %c0_280, %c0_281] : memref<2x16x8x128xbf16, #tpu.memory_space<vmem>>, vector<1x1x8x128xbf16>
    %155 = vector.shape_cast %154 : vector<1x1x8x128xbf16> to vector<8x128xbf16>
    %c1_282 = arith.constant 1 : index
    %c4_283 = arith.constant 4 : index
    %c0_284 = arith.constant 0 : index
    %c0_285 = arith.constant 0 : index
    %156 = vector.load %arg1[%c1_282, %c4_283, %c0_284, %c0_285] : memref<2x16x8x128xbf16, #tpu.memory_space<vmem>>, vector<1x1x8x128xbf16>
    %157 = vector.shape_cast %156 : vector<1x1x8x128xbf16> to vector<8x128xbf16>
    %c1_286 = arith.constant 1 : index
    %c5_287 = arith.constant 5 : index
    %c0_288 = arith.constant 0 : index
    %c0_289 = arith.constant 0 : index
    %158 = vector.load %arg1[%c1_286, %c5_287, %c0_288, %c0_289] : memref<2x16x8x128xbf16, #tpu.memory_space<vmem>>, vector<1x1x8x128xbf16>
    %159 = vector.shape_cast %158 : vector<1x1x8x128xbf16> to vector<8x128xbf16>
    %c1_290 = arith.constant 1 : index
    %c6_291 = arith.constant 6 : index
    %c0_292 = arith.constant 0 : index
    %c0_293 = arith.constant 0 : index
    %160 = vector.load %arg1[%c1_290, %c6_291, %c0_292, %c0_293] : memref<2x16x8x128xbf16, #tpu.memory_space<vmem>>, vector<1x1x8x128xbf16>
    %161 = vector.shape_cast %160 : vector<1x1x8x128xbf16> to vector<8x128xbf16>
    %c1_294 = arith.constant 1 : index
    %c7_295 = arith.constant 7 : index
    %c0_296 = arith.constant 0 : index
    %c0_297 = arith.constant 0 : index
    %162 = vector.load %arg1[%c1_294, %c7_295, %c0_296, %c0_297] : memref<2x16x8x128xbf16, #tpu.memory_space<vmem>>, vector<1x1x8x128xbf16>
    %163 = vector.shape_cast %162 : vector<1x1x8x128xbf16> to vector<8x128xbf16>
    %c1_298 = arith.constant 1 : index
    %c8_299 = arith.constant 8 : index
    %c0_300 = arith.constant 0 : index
    %c0_301 = arith.constant 0 : index
    %164 = vector.load %arg1[%c1_298, %c8_299, %c0_300, %c0_301] : memref<2x16x8x128xbf16, #tpu.memory_space<vmem>>, vector<1x1x8x128xbf16>
    %165 = vector.shape_cast %164 : vector<1x1x8x128xbf16> to vector<8x128xbf16>
    %c1_302 = arith.constant 1 : index
    %c9_303 = arith.constant 9 : index
    %c0_304 = arith.constant 0 : index
    %c0_305 = arith.constant 0 : index
    %166 = vector.load %arg1[%c1_302, %c9_303, %c0_304, %c0_305] : memref<2x16x8x128xbf16, #tpu.memory_space<vmem>>, vector<1x1x8x128xbf16>
    %167 = vector.shape_cast %166 : vector<1x1x8x128xbf16> to vector<8x128xbf16>
    %c1_306 = arith.constant 1 : index
    %c10_307 = arith.constant 10 : index
    %c0_308 = arith.constant 0 : index
    %c0_309 = arith.constant 0 : index
    %168 = vector.load %arg1[%c1_306, %c10_307, %c0_308, %c0_309] : memref<2x16x8x128xbf16, #tpu.memory_space<vmem>>, vector<1x1x8x128xbf16>
    %169 = vector.shape_cast %168 : vector<1x1x8x128xbf16> to vector<8x128xbf16>
    %c1_310 = arith.constant 1 : index
    %c11_311 = arith.constant 11 : index
    %c0_312 = arith.constant 0 : index
    %c0_313 = arith.constant 0 : index
    %170 = vector.load %arg1[%c1_310, %c11_311, %c0_312, %c0_313] : memref<2x16x8x128xbf16, #tpu.memory_space<vmem>>, vector<1x1x8x128xbf16>
    %171 = vector.shape_cast %170 : vector<1x1x8x128xbf16> to vector<8x128xbf16>
    %c1_314 = arith.constant 1 : index
    %c12_315 = arith.constant 12 : index
    %c0_316 = arith.constant 0 : index
    %c0_317 = arith.constant 0 : index
    %172 = vector.load %arg1[%c1_314, %c12_315, %c0_316, %c0_317] : memref<2x16x8x128xbf16, #tpu.memory_space<vmem>>, vector<1x1x8x128xbf16>
    %173 = vector.shape_cast %172 : vector<1x1x8x128xbf16> to vector<8x128xbf16>
    %c1_318 = arith.constant 1 : index
    %c13_319 = arith.constant 13 : index
    %c0_320 = arith.constant 0 : index
    %c0_321 = arith.constant 0 : index
    %174 = vector.load %arg1[%c1_318, %c13_319, %c0_320, %c0_321] : memref<2x16x8x128xbf16, #tpu.memory_space<vmem>>, vector<1x1x8x128xbf16>
    %175 = vector.shape_cast %174 : vector<1x1x8x128xbf16> to vector<8x128xbf16>
    %176 = tpu.concatenate %149, %151, %153, %155, %157, %159, %161, %163, %165, %167, %169, %171, %173, %175 in 0 : vector<8x128xbf16>, vector<8x128xbf16>, vector<8x128xbf16>, vector<8x128xbf16>, vector<8x128xbf16>, vector<8x128xbf16>, vector<8x128xbf16>, vector<8x128xbf16>, vector<8x128xbf16>, vector<8x128xbf16>, vector<8x128xbf16>, vector<8x128xbf16>, vector<8x128xbf16>, vector<8x128xbf16> -> vector<112x128xbf16>
    %c0_322 = arith.constant 0 : index
    %c1_323 = arith.constant 1 : index
    %c0_324 = arith.constant 0 : index
    %c0_325 = arith.constant 0 : index
    %177 = vector.load %arg1[%c0_322, %c1_323, %c0_324, %c0_325] : memref<2x16x8x128xbf16, #tpu.memory_space<vmem>>, vector<1x1x8x128xbf16>
    %178 = vector.shape_cast %177 : vector<1x1x8x128xbf16> to vector<8x128xbf16>
    %c0_326 = arith.constant 0 : index
    %c2_327 = arith.constant 2 : index
    %c0_328 = arith.constant 0 : index
    %c0_329 = arith.constant 0 : index
    %179 = vector.load %arg1[%c0_326, %c2_327, %c0_328, %c0_329] : memref<2x16x8x128xbf16, #tpu.memory_space<vmem>>, vector<1x1x8x128xbf16>
    %180 = vector.shape_cast %179 : vector<1x1x8x128xbf16> to vector<8x128xbf16>
    %c0_330 = arith.constant 0 : index
    %c3_331 = arith.constant 3 : index
    %c0_332 = arith.constant 0 : index
    %c0_333 = arith.constant 0 : index
    %181 = vector.load %arg1[%c0_330, %c3_331, %c0_332, %c0_333] : memref<2x16x8x128xbf16, #tpu.memory_space<vmem>>, vector<1x1x8x128xbf16>
    %182 = vector.shape_cast %181 : vector<1x1x8x128xbf16> to vector<8x128xbf16>
    %c0_334 = arith.constant 0 : index
    %c4_335 = arith.constant 4 : index
    %c0_336 = arith.constant 0 : index
    %c0_337 = arith.constant 0 : index
    %183 = vector.load %arg1[%c0_334, %c4_335, %c0_336, %c0_337] : memref<2x16x8x128xbf16, #tpu.memory_space<vmem>>, vector<1x1x8x128xbf16>
    %184 = vector.shape_cast %183 : vector<1x1x8x128xbf16> to vector<8x128xbf16>
    %c0_338 = arith.constant 0 : index
    %c5_339 = arith.constant 5 : index
    %c0_340 = arith.constant 0 : index
    %c0_341 = arith.constant 0 : index
    %185 = vector.load %arg1[%c0_338, %c5_339, %c0_340, %c0_341] : memref<2x16x8x128xbf16, #tpu.memory_space<vmem>>, vector<1x1x8x128xbf16>
    %186 = vector.shape_cast %185 : vector<1x1x8x128xbf16> to vector<8x128xbf16>
    %c0_342 = arith.constant 0 : index
    %c6_343 = arith.constant 6 : index
    %c0_344 = arith.constant 0 : index
    %c0_345 = arith.constant 0 : index
    %187 = vector.load %arg1[%c0_342, %c6_343, %c0_344, %c0_345] : memref<2x16x8x128xbf16, #tpu.memory_space<vmem>>, vector<1x1x8x128xbf16>
    %188 = vector.shape_cast %187 : vector<1x1x8x128xbf16> to vector<8x128xbf16>
    %c0_346 = arith.constant 0 : index
    %c7_347 = arith.constant 7 : index
    %c0_348 = arith.constant 0 : index
    %c0_349 = arith.constant 0 : index
    %189 = vector.load %arg1[%c0_346, %c7_347, %c0_348, %c0_349] : memref<2x16x8x128xbf16, #tpu.memory_space<vmem>>, vector<1x1x8x128xbf16>
    %190 = vector.shape_cast %189 : vector<1x1x8x128xbf16> to vector<8x128xbf16>
    %c0_350 = arith.constant 0 : index
    %c8_351 = arith.constant 8 : index
    %c0_352 = arith.constant 0 : index
    %c0_353 = arith.constant 0 : index
    %191 = vector.load %arg1[%c0_350, %c8_351, %c0_352, %c0_353] : memref<2x16x8x128xbf16, #tpu.memory_space<vmem>>, vector<1x1x8x128xbf16>
    %192 = vector.shape_cast %191 : vector<1x1x8x128xbf16> to vector<8x128xbf16>
    %c0_354 = arith.constant 0 : index
    %c9_355 = arith.constant 9 : index
    %c0_356 = arith.constant 0 : index
    %c0_357 = arith.constant 0 : index
    %193 = vector.load %arg1[%c0_354, %c9_355, %c0_356, %c0_357] : memref<2x16x8x128xbf16, #tpu.memory_space<vmem>>, vector<1x1x8x128xbf16>
    %194 = vector.shape_cast %193 : vector<1x1x8x128xbf16> to vector<8x128xbf16>
    %c0_358 = arith.constant 0 : index
    %c10_359 = arith.constant 10 : index
    %c0_360 = arith.constant 0 : index
    %c0_361 = arith.constant 0 : index
    %195 = vector.load %arg1[%c0_358, %c10_359, %c0_360, %c0_361] : memref<2x16x8x128xbf16, #tpu.memory_space<vmem>>, vector<1x1x8x128xbf16>
    %196 = vector.shape_cast %195 : vector<1x1x8x128xbf16> to vector<8x128xbf16>
    %c0_362 = arith.constant 0 : index
    %c11_363 = arith.constant 11 : index
    %c0_364 = arith.constant 0 : index
    %c0_365 = arith.constant 0 : index
    %197 = vector.load %arg1[%c0_362, %c11_363, %c0_364, %c0_365] : memref<2x16x8x128xbf16, #tpu.memory_space<vmem>>, vector<1x1x8x128xbf16>
    %198 = vector.shape_cast %197 : vector<1x1x8x128xbf16> to vector<8x128xbf16>
    %c0_366 = arith.constant 0 : index
    %c12_367 = arith.constant 12 : index
    %c0_368 = arith.constant 0 : index
    %c0_369 = arith.constant 0 : index
    %199 = vector.load %arg1[%c0_366, %c12_367, %c0_368, %c0_369] : memref<2x16x8x128xbf16, #tpu.memory_space<vmem>>, vector<1x1x8x128xbf16>
    %200 = vector.shape_cast %199 : vector<1x1x8x128xbf16> to vector<8x128xbf16>
    %c0_370 = arith.constant 0 : index
    %c13_371 = arith.constant 13 : index
    %c0_372 = arith.constant 0 : index
    %c0_373 = arith.constant 0 : index
    %201 = vector.load %arg1[%c0_370, %c13_371, %c0_372, %c0_373] : memref<2x16x8x128xbf16, #tpu.memory_space<vmem>>, vector<1x1x8x128xbf16>
    %202 = vector.shape_cast %201 : vector<1x1x8x128xbf16> to vector<8x128xbf16>
    %c0_374 = arith.constant 0 : index
    %c14_375 = arith.constant 14 : index
    %c0_376 = arith.constant 0 : index
    %c0_377 = arith.constant 0 : index
    %203 = vector.load %arg1[%c0_374, %c14_375, %c0_376, %c0_377] : memref<2x16x8x128xbf16, #tpu.memory_space<vmem>>, vector<1x1x8x128xbf16>
    %204 = vector.shape_cast %203 : vector<1x1x8x128xbf16> to vector<8x128xbf16>
    %205 = tpu.concatenate %178, %180, %182, %184, %186, %188, %190, %192, %194, %196, %198, %200, %202, %204 in 0 : vector<8x128xbf16>, vector<8x128xbf16>, vector<8x128xbf16>, vector<8x128xbf16>, vector<8x128xbf16>, vector<8x128xbf16>, vector<8x128xbf16>, vector<8x128xbf16>, vector<8x128xbf16>, vector<8x128xbf16>, vector<8x128xbf16>, vector<8x128xbf16>, vector<8x128xbf16>, vector<8x128xbf16> -> vector<112x128xbf16>
    %c1_378 = arith.constant 1 : index
    %c1_379 = arith.constant 1 : index
    %c0_380 = arith.constant 0 : index
    %c0_381 = arith.constant 0 : index
    %206 = vector.load %arg1[%c1_378, %c1_379, %c0_380, %c0_381] : memref<2x16x8x128xbf16, #tpu.memory_space<vmem>>, vector<1x1x8x128xbf16>
    %207 = vector.shape_cast %206 : vector<1x1x8x128xbf16> to vector<8x128xbf16>
    %c1_382 = arith.constant 1 : index
    %c2_383 = arith.constant 2 : index
    %c0_384 = arith.constant 0 : index
    %c0_385 = arith.constant 0 : index
    %208 = vector.load %arg1[%c1_382, %c2_383, %c0_384, %c0_385] : memref<2x16x8x128xbf16, #tpu.memory_space<vmem>>, vector<1x1x8x128xbf16>
    %209 = vector.shape_cast %208 : vector<1x1x8x128xbf16> to vector<8x128xbf16>
    %c1_386 = arith.constant 1 : index
    %c3_387 = arith.constant 3 : index
    %c0_388 = arith.constant 0 : index
    %c0_389 = arith.constant 0 : index
    %210 = vector.load %arg1[%c1_386, %c3_387, %c0_388, %c0_389] : memref<2x16x8x128xbf16, #tpu.memory_space<vmem>>, vector<1x1x8x128xbf16>
    %211 = vector.shape_cast %210 : vector<1x1x8x128xbf16> to vector<8x128xbf16>
    %c1_390 = arith.constant 1 : index
    %c4_391 = arith.constant 4 : index
    %c0_392 = arith.constant 0 : index
    %c0_393 = arith.constant 0 : index
    %212 = vector.load %arg1[%c1_390, %c4_391, %c0_392, %c0_393] : memref<2x16x8x128xbf16, #tpu.memory_space<vmem>>, vector<1x1x8x128xbf16>
    %213 = vector.shape_cast %212 : vector<1x1x8x128xbf16> to vector<8x128xbf16>
    %c1_394 = arith.constant 1 : index
    %c5_395 = arith.constant 5 : index
    %c0_396 = arith.constant 0 : index
    %c0_397 = arith.constant 0 : index
    %214 = vector.load %arg1[%c1_394, %c5_395, %c0_396, %c0_397] : memref<2x16x8x128xbf16, #tpu.memory_space<vmem>>, vector<1x1x8x128xbf16>
    %215 = vector.shape_cast %214 : vector<1x1x8x128xbf16> to vector<8x128xbf16>
    %c1_398 = arith.constant 1 : index
    %c6_399 = arith.constant 6 : index
    %c0_400 = arith.constant 0 : index
    %c0_401 = arith.constant 0 : index
    %216 = vector.load %arg1[%c1_398, %c6_399, %c0_400, %c0_401] : memref<2x16x8x128xbf16, #tpu.memory_space<vmem>>, vector<1x1x8x128xbf16>
    %217 = vector.shape_cast %216 : vector<1x1x8x128xbf16> to vector<8x128xbf16>
    %c1_402 = arith.constant 1 : index
    %c7_403 = arith.constant 7 : index
    %c0_404 = arith.constant 0 : index
    %c0_405 = arith.constant 0 : index
    %218 = vector.load %arg1[%c1_402, %c7_403, %c0_404, %c0_405] : memref<2x16x8x128xbf16, #tpu.memory_space<vmem>>, vector<1x1x8x128xbf16>
    %219 = vector.shape_cast %218 : vector<1x1x8x128xbf16> to vector<8x128xbf16>
    %c1_406 = arith.constant 1 : index
    %c8_407 = arith.constant 8 : index
    %c0_408 = arith.constant 0 : index
    %c0_409 = arith.constant 0 : index
    %220 = vector.load %arg1[%c1_406, %c8_407, %c0_408, %c0_409] : memref<2x16x8x128xbf16, #tpu.memory_space<vmem>>, vector<1x1x8x128xbf16>
    %221 = vector.shape_cast %220 : vector<1x1x8x128xbf16> to vector<8x128xbf16>
    %c1_410 = arith.constant 1 : index
    %c9_411 = arith.constant 9 : index
    %c0_412 = arith.constant 0 : index
    %c0_413 = arith.constant 0 : index
    %222 = vector.load %arg1[%c1_410, %c9_411, %c0_412, %c0_413] : memref<2x16x8x128xbf16, #tpu.memory_space<vmem>>, vector<1x1x8x128xbf16>
    %223 = vector.shape_cast %222 : vector<1x1x8x128xbf16> to vector<8x128xbf16>
    %c1_414 = arith.constant 1 : index
    %c10_415 = arith.constant 10 : index
    %c0_416 = arith.constant 0 : index
    %c0_417 = arith.constant 0 : index
    %224 = vector.load %arg1[%c1_414, %c10_415, %c0_416, %c0_417] : memref<2x16x8x128xbf16, #tpu.memory_space<vmem>>, vector<1x1x8x128xbf16>
    %225 = vector.shape_cast %224 : vector<1x1x8x128xbf16> to vector<8x128xbf16>
    %c1_418 = arith.constant 1 : index
    %c11_419 = arith.constant 11 : index
    %c0_420 = arith.constant 0 : index
    %c0_421 = arith.constant 0 : index
    %226 = vector.load %arg1[%c1_418, %c11_419, %c0_420, %c0_421] : memref<2x16x8x128xbf16, #tpu.memory_space<vmem>>, vector<1x1x8x128xbf16>
    %227 = vector.shape_cast %226 : vector<1x1x8x128xbf16> to vector<8x128xbf16>
    %c1_422 = arith.constant 1 : index
    %c12_423 = arith.constant 12 : index
    %c0_424 = arith.constant 0 : index
    %c0_425 = arith.constant 0 : index
    %228 = vector.load %arg1[%c1_422, %c12_423, %c0_424, %c0_425] : memref<2x16x8x128xbf16, #tpu.memory_space<vmem>>, vector<1x1x8x128xbf16>
    %229 = vector.shape_cast %228 : vector<1x1x8x128xbf16> to vector<8x128xbf16>
    %c1_426 = arith.constant 1 : index
    %c13_427 = arith.constant 13 : index
    %c0_428 = arith.constant 0 : index
    %c0_429 = arith.constant 0 : index
    %230 = vector.load %arg1[%c1_426, %c13_427, %c0_428, %c0_429] : memref<2x16x8x128xbf16, #tpu.memory_space<vmem>>, vector<1x1x8x128xbf16>
    %231 = vector.shape_cast %230 : vector<1x1x8x128xbf16> to vector<8x128xbf16>
    %c1_430 = arith.constant 1 : index
    %c14_431 = arith.constant 14 : index
    %c0_432 = arith.constant 0 : index
    %c0_433 = arith.constant 0 : index
    %232 = vector.load %arg1[%c1_430, %c14_431, %c0_432, %c0_433] : memref<2x16x8x128xbf16, #tpu.memory_space<vmem>>, vector<1x1x8x128xbf16>
    %233 = vector.shape_cast %232 : vector<1x1x8x128xbf16> to vector<8x128xbf16>
    %234 = tpu.concatenate %207, %209, %211, %213, %215, %217, %219, %221, %223, %225, %227, %229, %231, %233 in 0 : vector<8x128xbf16>, vector<8x128xbf16>, vector<8x128xbf16>, vector<8x128xbf16>, vector<8x128xbf16>, vector<8x128xbf16>, vector<8x128xbf16>, vector<8x128xbf16>, vector<8x128xbf16>, vector<8x128xbf16>, vector<8x128xbf16>, vector<8x128xbf16>, vector<8x128xbf16>, vector<8x128xbf16> -> vector<112x128xbf16>
    %c0_434 = arith.constant 0 : index
    %c2_435 = arith.constant 2 : index
    %c0_436 = arith.constant 0 : index
    %c0_437 = arith.constant 0 : index
    %235 = vector.load %arg1[%c0_434, %c2_435, %c0_436, %c0_437] : memref<2x16x8x128xbf16, #tpu.memory_space<vmem>>, vector<1x1x8x128xbf16>
    %236 = vector.shape_cast %235 : vector<1x1x8x128xbf16> to vector<8x128xbf16>
    %c0_438 = arith.constant 0 : index
    %c3_439 = arith.constant 3 : index
    %c0_440 = arith.constant 0 : index
    %c0_441 = arith.constant 0 : index
    %237 = vector.load %arg1[%c0_438, %c3_439, %c0_440, %c0_441] : memref<2x16x8x128xbf16, #tpu.memory_space<vmem>>, vector<1x1x8x128xbf16>
    %238 = vector.shape_cast %237 : vector<1x1x8x128xbf16> to vector<8x128xbf16>
    %c0_442 = arith.constant 0 : index
    %c4_443 = arith.constant 4 : index
    %c0_444 = arith.constant 0 : index
    %c0_445 = arith.constant 0 : index
    %239 = vector.load %arg1[%c0_442, %c4_443, %c0_444, %c0_445] : memref<2x16x8x128xbf16, #tpu.memory_space<vmem>>, vector<1x1x8x128xbf16>
    %240 = vector.shape_cast %239 : vector<1x1x8x128xbf16> to vector<8x128xbf16>
    %c0_446 = arith.constant 0 : index
    %c5_447 = arith.constant 5 : index
    %c0_448 = arith.constant 0 : index
    %c0_449 = arith.constant 0 : index
    %241 = vector.load %arg1[%c0_446, %c5_447, %c0_448, %c0_449] : memref<2x16x8x128xbf16, #tpu.memory_space<vmem>>, vector<1x1x8x128xbf16>
    %242 = vector.shape_cast %241 : vector<1x1x8x128xbf16> to vector<8x128xbf16>
    %c0_450 = arith.constant 0 : index
    %c6_451 = arith.constant 6 : index
    %c0_452 = arith.constant 0 : index
    %c0_453 = arith.constant 0 : index
    %243 = vector.load %arg1[%c0_450, %c6_451, %c0_452, %c0_453] : memref<2x16x8x128xbf16, #tpu.memory_space<vmem>>, vector<1x1x8x128xbf16>
    %244 = vector.shape_cast %243 : vector<1x1x8x128xbf16> to vector<8x128xbf16>
    %c0_454 = arith.constant 0 : index
    %c7_455 = arith.constant 7 : index
    %c0_456 = arith.constant 0 : index
    %c0_457 = arith.constant 0 : index
    %245 = vector.load %arg1[%c0_454, %c7_455, %c0_456, %c0_457] : memref<2x16x8x128xbf16, #tpu.memory_space<vmem>>, vector<1x1x8x128xbf16>
    %246 = vector.shape_cast %245 : vector<1x1x8x128xbf16> to vector<8x128xbf16>
    %c0_458 = arith.constant 0 : index
    %c8_459 = arith.constant 8 : index
    %c0_460 = arith.constant 0 : index
    %c0_461 = arith.constant 0 : index
    %247 = vector.load %arg1[%c0_458, %c8_459, %c0_460, %c0_461] : memref<2x16x8x128xbf16, #tpu.memory_space<vmem>>, vector<1x1x8x128xbf16>
    %248 = vector.shape_cast %247 : vector<1x1x8x128xbf16> to vector<8x128xbf16>
    %c0_462 = arith.constant 0 : index
    %c9_463 = arith.constant 9 : index
    %c0_464 = arith.constant 0 : index
    %c0_465 = arith.constant 0 : index
    %249 = vector.load %arg1[%c0_462, %c9_463, %c0_464, %c0_465] : memref<2x16x8x128xbf16, #tpu.memory_space<vmem>>, vector<1x1x8x128xbf16>
    %250 = vector.shape_cast %249 : vector<1x1x8x128xbf16> to vector<8x128xbf16>
    %c0_466 = arith.constant 0 : index
    %c10_467 = arith.constant 10 : index
    %c0_468 = arith.constant 0 : index
    %c0_469 = arith.constant 0 : index
    %251 = vector.load %arg1[%c0_466, %c10_467, %c0_468, %c0_469] : memref<2x16x8x128xbf16, #tpu.memory_space<vmem>>, vector<1x1x8x128xbf16>
    %252 = vector.shape_cast %251 : vector<1x1x8x128xbf16> to vector<8x128xbf16>
    %c0_470 = arith.constant 0 : index
    %c11_471 = arith.constant 11 : index
    %c0_472 = arith.constant 0 : index
    %c0_473 = arith.constant 0 : index
    %253 = vector.load %arg1[%c0_470, %c11_471, %c0_472, %c0_473] : memref<2x16x8x128xbf16, #tpu.memory_space<vmem>>, vector<1x1x8x128xbf16>
    %254 = vector.shape_cast %253 : vector<1x1x8x128xbf16> to vector<8x128xbf16>
    %c0_474 = arith.constant 0 : index
    %c12_475 = arith.constant 12 : index
    %c0_476 = arith.constant 0 : index
    %c0_477 = arith.constant 0 : index
    %255 = vector.load %arg1[%c0_474, %c12_475, %c0_476, %c0_477] : memref<2x16x8x128xbf16, #tpu.memory_space<vmem>>, vector<1x1x8x128xbf16>
    %256 = vector.shape_cast %255 : vector<1x1x8x128xbf16> to vector<8x128xbf16>
    %c0_478 = arith.constant 0 : index
    %c13_479 = arith.constant 13 : index
    %c0_480 = arith.constant 0 : index
    %c0_481 = arith.constant 0 : index
    %257 = vector.load %arg1[%c0_478, %c13_479, %c0_480, %c0_481] : memref<2x16x8x128xbf16, #tpu.memory_space<vmem>>, vector<1x1x8x128xbf16>
    %258 = vector.shape_cast %257 : vector<1x1x8x128xbf16> to vector<8x128xbf16>
    %c0_482 = arith.constant 0 : index
    %c14_483 = arith.constant 14 : index
    %c0_484 = arith.constant 0 : index
    %c0_485 = arith.constant 0 : index
    %259 = vector.load %arg1[%c0_482, %c14_483, %c0_484, %c0_485] : memref<2x16x8x128xbf16, #tpu.memory_space<vmem>>, vector<1x1x8x128xbf16>
    %260 = vector.shape_cast %259 : vector<1x1x8x128xbf16> to vector<8x128xbf16>
    %c0_486 = arith.constant 0 : index
    %c15_487 = arith.constant 15 : index
    %c0_488 = arith.constant 0 : index
    %c0_489 = arith.constant 0 : index
    %261 = vector.load %arg1[%c0_486, %c15_487, %c0_488, %c0_489] : memref<2x16x8x128xbf16, #tpu.memory_space<vmem>>, vector<1x1x8x128xbf16>
    %262 = vector.shape_cast %261 : vector<1x1x8x128xbf16> to vector<8x128xbf16>
    %263 = tpu.concatenate %236, %238, %240, %242, %244, %246, %248, %250, %252, %254, %256, %258, %260, %262 in 0 : vector<8x128xbf16>, vector<8x128xbf16>, vector<8x128xbf16>, vector<8x128xbf16>, vector<8x128xbf16>, vector<8x128xbf16>, vector<8x128xbf16>, vector<8x128xbf16>, vector<8x128xbf16>, vector<8x128xbf16>, vector<8x128xbf16>, vector<8x128xbf16>, vector<8x128xbf16>, vector<8x128xbf16> -> vector<112x128xbf16>
    %c1_490 = arith.constant 1 : index
    %c2_491 = arith.constant 2 : index
    %c0_492 = arith.constant 0 : index
    %c0_493 = arith.constant 0 : index
    %264 = vector.load %arg1[%c1_490, %c2_491, %c0_492, %c0_493] : memref<2x16x8x128xbf16, #tpu.memory_space<vmem>>, vector<1x1x8x128xbf16>
    %265 = vector.shape_cast %264 : vector<1x1x8x128xbf16> to vector<8x128xbf16>
    %c1_494 = arith.constant 1 : index
    %c3_495 = arith.constant 3 : index
    %c0_496 = arith.constant 0 : index
    %c0_497 = arith.constant 0 : index
    %266 = vector.load %arg1[%c1_494, %c3_495, %c0_496, %c0_497] : memref<2x16x8x128xbf16, #tpu.memory_space<vmem>>, vector<1x1x8x128xbf16>
    %267 = vector.shape_cast %266 : vector<1x1x8x128xbf16> to vector<8x128xbf16>
    %c1_498 = arith.constant 1 : index
    %c4_499 = arith.constant 4 : index
    %c0_500 = arith.constant 0 : index
    %c0_501 = arith.constant 0 : index
    %268 = vector.load %arg1[%c1_498, %c4_499, %c0_500, %c0_501] : memref<2x16x8x128xbf16, #tpu.memory_space<vmem>>, vector<1x1x8x128xbf16>
    %269 = vector.shape_cast %268 : vector<1x1x8x128xbf16> to vector<8x128xbf16>
    %c1_502 = arith.constant 1 : index
    %c5_503 = arith.constant 5 : index
    %c0_504 = arith.constant 0 : index
    %c0_505 = arith.constant 0 : index
    %270 = vector.load %arg1[%c1_502, %c5_503, %c0_504, %c0_505] : memref<2x16x8x128xbf16, #tpu.memory_space<vmem>>, vector<1x1x8x128xbf16>
    %271 = vector.shape_cast %270 : vector<1x1x8x128xbf16> to vector<8x128xbf16>
    %c1_506 = arith.constant 1 : index
    %c6_507 = arith.constant 6 : index
    %c0_508 = arith.constant 0 : index
    %c0_509 = arith.constant 0 : index
    %272 = vector.load %arg1[%c1_506, %c6_507, %c0_508, %c0_509] : memref<2x16x8x128xbf16, #tpu.memory_space<vmem>>, vector<1x1x8x128xbf16>
    %273 = vector.shape_cast %272 : vector<1x1x8x128xbf16> to vector<8x128xbf16>
    %c1_510 = arith.constant 1 : index
    %c7_511 = arith.constant 7 : index
    %c0_512 = arith.constant 0 : index
    %c0_513 = arith.constant 0 : index
    %274 = vector.load %arg1[%c1_510, %c7_511, %c0_512, %c0_513] : memref<2x16x8x128xbf16, #tpu.memory_space<vmem>>, vector<1x1x8x128xbf16>
    %275 = vector.shape_cast %274 : vector<1x1x8x128xbf16> to vector<8x128xbf16>
    %c1_514 = arith.constant 1 : index
    %c8_515 = arith.constant 8 : index
    %c0_516 = arith.constant 0 : index
    %c0_517 = arith.constant 0 : index
    %276 = vector.load %arg1[%c1_514, %c8_515, %c0_516, %c0_517] : memref<2x16x8x128xbf16, #tpu.memory_space<vmem>>, vector<1x1x8x128xbf16>
    %277 = vector.shape_cast %276 : vector<1x1x8x128xbf16> to vector<8x128xbf16>
    %c1_518 = arith.constant 1 : index
    %c9_519 = arith.constant 9 : index
    %c0_520 = arith.constant 0 : index
    %c0_521 = arith.constant 0 : index
    %278 = vector.load %arg1[%c1_518, %c9_519, %c0_520, %c0_521] : memref<2x16x8x128xbf16, #tpu.memory_space<vmem>>, vector<1x1x8x128xbf16>
    %279 = vector.shape_cast %278 : vector<1x1x8x128xbf16> to vector<8x128xbf16>
    %c1_522 = arith.constant 1 : index
    %c10_523 = arith.constant 10 : index
    %c0_524 = arith.constant 0 : index
    %c0_525 = arith.constant 0 : index
    %280 = vector.load %arg1[%c1_522, %c10_523, %c0_524, %c0_525] : memref<2x16x8x128xbf16, #tpu.memory_space<vmem>>, vector<1x1x8x128xbf16>
    %281 = vector.shape_cast %280 : vector<1x1x8x128xbf16> to vector<8x128xbf16>
    %c1_526 = arith.constant 1 : index
    %c11_527 = arith.constant 11 : index
    %c0_528 = arith.constant 0 : index
    %c0_529 = arith.constant 0 : index
    %282 = vector.load %arg1[%c1_526, %c11_527, %c0_528, %c0_529] : memref<2x16x8x128xbf16, #tpu.memory_space<vmem>>, vector<1x1x8x128xbf16>
    %283 = vector.shape_cast %282 : vector<1x1x8x128xbf16> to vector<8x128xbf16>
    %c1_530 = arith.constant 1 : index
    %c12_531 = arith.constant 12 : index
    %c0_532 = arith.constant 0 : index
    %c0_533 = arith.constant 0 : index
    %284 = vector.load %arg1[%c1_530, %c12_531, %c0_532, %c0_533] : memref<2x16x8x128xbf16, #tpu.memory_space<vmem>>, vector<1x1x8x128xbf16>
    %285 = vector.shape_cast %284 : vector<1x1x8x128xbf16> to vector<8x128xbf16>
    %c1_534 = arith.constant 1 : index
    %c13_535 = arith.constant 13 : index
    %c0_536 = arith.constant 0 : index
    %c0_537 = arith.constant 0 : index
    %286 = vector.load %arg1[%c1_534, %c13_535, %c0_536, %c0_537] : memref<2x16x8x128xbf16, #tpu.memory_space<vmem>>, vector<1x1x8x128xbf16>
    %287 = vector.shape_cast %286 : vector<1x1x8x128xbf16> to vector<8x128xbf16>
    %c1_538 = arith.constant 1 : index
    %c14_539 = arith.constant 14 : index
    %c0_540 = arith.constant 0 : index
    %c0_541 = arith.constant 0 : index
    %288 = vector.load %arg1[%c1_538, %c14_539, %c0_540, %c0_541] : memref<2x16x8x128xbf16, #tpu.memory_space<vmem>>, vector<1x1x8x128xbf16>
    %289 = vector.shape_cast %288 : vector<1x1x8x128xbf16> to vector<8x128xbf16>
    %c1_542 = arith.constant 1 : index
    %c15_543 = arith.constant 15 : index
    %c0_544 = arith.constant 0 : index
    %c0_545 = arith.constant 0 : index
    %290 = vector.load %arg1[%c1_542, %c15_543, %c0_544, %c0_545] : memref<2x16x8x128xbf16, #tpu.memory_space<vmem>>, vector<1x1x8x128xbf16>
    %291 = vector.shape_cast %290 : vector<1x1x8x128xbf16> to vector<8x128xbf16>
    %292 = tpu.concatenate %265, %267, %269, %271, %273, %275, %277, %279, %281, %283, %285, %287, %289, %291 in 0 : vector<8x128xbf16>, vector<8x128xbf16>, vector<8x128xbf16>, vector<8x128xbf16>, vector<8x128xbf16>, vector<8x128xbf16>, vector<8x128xbf16>, vector<8x128xbf16>, vector<8x128xbf16>, vector<8x128xbf16>, vector<8x128xbf16>, vector<8x128xbf16>, vector<8x128xbf16>, vector<8x128xbf16> -> vector<112x128xbf16>
    %293 = tpu.concatenate %176, %205, %234, %263, %292 in 1 : vector<112x128xbf16>, vector<112x128xbf16>, vector<112x128xbf16>, vector<112x128xbf16>, vector<112x128xbf16> -> vector<112x640xbf16>
    %c0_546 = arith.constant 0 : index
    %c0_547 = arith.constant 0 : index
    %294 = vector.load %arg2[%c0_546, %c0_547] : memref<640x168xbf16, #tpu.memory_space<vmem>>, vector<640x168xbf16>
    %cst_548 = arith.constant dense<0.000000e+00> : vector<112x168xf32>
    %295 = tpu.matmul %293, %294, %cst_548 {dimension_numbers = #tpu.dot_dimension_numbers<[1], [0], [0], [1], [0, 0, 1, 1], [], []>} : vector<112x640xbf16>, vector<640x168xbf16>, vector<112x168xf32> -> vector<112x168xf32>
    %296 = arith.maximumf %147, %295 : vector<112x168xf32>
    %c0_549 = arith.constant 0 : index
    %c0_550 = arith.constant 0 : index
    %297 = vector.load %arg3[%c0_549, %c0_550] : memref<1x168xf32, #tpu.memory_space<vmem>>, vector<1x168xf32>
    %298 = vector.broadcast %297 : vector<1x168xf32> to vector<112x168xf32>
    %299 = arith.addf %296, %298 : vector<112x168xf32>
    %cst_551 = arith.constant 0.000000e+00 : f32
    %300 = vector.broadcast %cst_551 : f32 to vector<112x168xf32>
    %301 = arith.maximumf %299, %300 : vector<112x168xf32>
    %302 = arith.truncf %301 : vector<112x168xf32> to vector<112x168xbf16>
    %c0_552 = arith.constant 0 : index
    %c0_553 = arith.constant 0 : index
    %c0_554 = arith.constant 0 : index
    %303 = vector.load %arg4[%c0_552, %c0_553, %c0_554] : memref<2x168x128xbf16, #tpu.memory_space<vmem>>, vector<1x168x128xbf16>
    %304 = vector.shape_cast %303 : vector<1x168x128xbf16> to vector<168x128xbf16>
    %cst_555 = arith.constant dense<0.000000e+00> : vector<112x128xf32>
    %305 = tpu.matmul %302, %304, %cst_555 {dimension_numbers = #tpu.dot_dimension_numbers<[1], [0], [0], [1], [0, 0, 1, 1], [], []>} : vector<112x168xbf16>, vector<168x128xbf16>, vector<112x128xf32> -> vector<112x128xf32>
    %c1_556 = arith.constant 1 : index
    %c0_557 = arith.constant 0 : index
    %c0_558 = arith.constant 0 : index
    %306 = vector.load %arg4[%c1_556, %c0_557, %c0_558] : memref<2x168x128xbf16, #tpu.memory_space<vmem>>, vector<1x168x128xbf16>
    %307 = vector.shape_cast %306 : vector<1x168x128xbf16> to vector<168x128xbf16>
    %cst_559 = arith.constant dense<0.000000e+00> : vector<112x128xf32>
    %308 = tpu.matmul %302, %307, %cst_559 {dimension_numbers = #tpu.dot_dimension_numbers<[1], [0], [0], [1], [0, 0, 1, 1], [], []>} : vector<112x168xbf16>, vector<168x128xbf16>, vector<112x128xf32> -> vector<112x128xf32>
    %309 = arith.maximumf %305, %308 : vector<112x128xf32>
    %310 = arith.truncf %309 : vector<112x128xf32> to vector<112x128xbf16>
    %311 = vector.extract_strided_slice %310 {offsets = [0, 0], sizes = [8, 128], strides = [1, 1]} : vector<112x128xbf16> to vector<8x128xbf16>
    %312 = vector.extract_strided_slice %310 {offsets = [16, 0], sizes = [8, 128], strides = [1, 1]} : vector<112x128xbf16> to vector<8x128xbf16>
    %313 = vector.extract_strided_slice %310 {offsets = [32, 0], sizes = [8, 128], strides = [1, 1]} : vector<112x128xbf16> to vector<8x128xbf16>
    %314 = vector.extract_strided_slice %310 {offsets = [48, 0], sizes = [8, 128], strides = [1, 1]} : vector<112x128xbf16> to vector<8x128xbf16>
    %315 = vector.extract_strided_slice %310 {offsets = [64, 0], sizes = [8, 128], strides = [1, 1]} : vector<112x128xbf16> to vector<8x128xbf16>
    %316 = tpu.concatenate %311, %312, %313, %314, %315 in 0 : vector<8x128xbf16>, vector<8x128xbf16>, vector<8x128xbf16>, vector<8x128xbf16>, vector<8x128xbf16> -> vector<40x128xbf16>
    %317 = vector.extract_strided_slice %310 {offsets = [8, 0], sizes = [8, 128], strides = [1, 1]} : vector<112x128xbf16> to vector<8x128xbf16>
    %318 = vector.extract_strided_slice %310 {offsets = [24, 0], sizes = [8, 128], strides = [1, 1]} : vector<112x128xbf16> to vector<8x128xbf16>
    %319 = vector.extract_strided_slice %310 {offsets = [40, 0], sizes = [8, 128], strides = [1, 1]} : vector<112x128xbf16> to vector<8x128xbf16>
    %320 = vector.extract_strided_slice %310 {offsets = [56, 0], sizes = [8, 128], strides = [1, 1]} : vector<112x128xbf16> to vector<8x128xbf16>
    %321 = vector.extract_strided_slice %310 {offsets = [72, 0], sizes = [8, 128], strides = [1, 1]} : vector<112x128xbf16> to vector<8x128xbf16>
    %322 = tpu.concatenate %317, %318, %319, %320, %321 in 0 : vector<8x128xbf16>, vector<8x128xbf16>, vector<8x128xbf16>, vector<8x128xbf16>, vector<8x128xbf16> -> vector<40x128xbf16>
    %323 = vector.extract_strided_slice %310 {offsets = [16, 0], sizes = [8, 128], strides = [1, 1]} : vector<112x128xbf16> to vector<8x128xbf16>
    %324 = vector.extract_strided_slice %310 {offsets = [32, 0], sizes = [8, 128], strides = [1, 1]} : vector<112x128xbf16> to vector<8x128xbf16>
    %325 = vector.extract_strided_slice %310 {offsets = [48, 0], sizes = [8, 128], strides = [1, 1]} : vector<112x128xbf16> to vector<8x128xbf16>
    %326 = vector.extract_strided_slice %310 {offsets = [64, 0], sizes = [8, 128], strides = [1, 1]} : vector<112x128xbf16> to vector<8x128xbf16>
    %327 = vector.extract_strided_slice %310 {offsets = [80, 0], sizes = [8, 128], strides = [1, 1]} : vector<112x128xbf16> to vector<8x128xbf16>
    %328 = tpu.concatenate %323, %324, %325, %326, %327 in 0 : vector<8x128xbf16>, vector<8x128xbf16>, vector<8x128xbf16>, vector<8x128xbf16>, vector<8x128xbf16> -> vector<40x128xbf16>
    %329 = vector.extract_strided_slice %310 {offsets = [24, 0], sizes = [8, 128], strides = [1, 1]} : vector<112x128xbf16> to vector<8x128xbf16>
    %330 = vector.extract_strided_slice %310 {offsets = [40, 0], sizes = [8, 128], strides = [1, 1]} : vector<112x128xbf16> to vector<8x128xbf16>
    %331 = vector.extract_strided_slice %310 {offsets = [56, 0], sizes = [8, 128], strides = [1, 1]} : vector<112x128xbf16> to vector<8x128xbf16>
    %332 = vector.extract_strided_slice %310 {offsets = [72, 0], sizes = [8, 128], strides = [1, 1]} : vector<112x128xbf16> to vector<8x128xbf16>
    %333 = vector.extract_strided_slice %310 {offsets = [88, 0], sizes = [8, 128], strides = [1, 1]} : vector<112x128xbf16> to vector<8x128xbf16>
    %334 = tpu.concatenate %329, %330, %331, %332, %333 in 0 : vector<8x128xbf16>, vector<8x128xbf16>, vector<8x128xbf16>, vector<8x128xbf16>, vector<8x128xbf16> -> vector<40x128xbf16>
    %335 = vector.extract_strided_slice %310 {offsets = [32, 0], sizes = [8, 128], strides = [1, 1]} : vector<112x128xbf16> to vector<8x128xbf16>
    %336 = vector.extract_strided_slice %310 {offsets = [48, 0], sizes = [8, 128], strides = [1, 1]} : vector<112x128xbf16> to vector<8x128xbf16>
    %337 = vector.extract_strided_slice %310 {offsets = [64, 0], sizes = [8, 128], strides = [1, 1]} : vector<112x128xbf16> to vector<8x128xbf16>
    %338 = vector.extract_strided_slice %310 {offsets = [80, 0], sizes = [8, 128], strides = [1, 1]} : vector<112x128xbf16> to vector<8x128xbf16>
    %339 = vector.extract_strided_slice %310 {offsets = [96, 0], sizes = [8, 128], strides = [1, 1]} : vector<112x128xbf16> to vector<8x128xbf16>
    %340 = tpu.concatenate %335, %336, %337, %338, %339 in 0 : vector<8x128xbf16>, vector<8x128xbf16>, vector<8x128xbf16>, vector<8x128xbf16>, vector<8x128xbf16> -> vector<40x128xbf16>
    %341 = tpu.concatenate %316, %322, %328, %334, %340 in 1 : vector<40x128xbf16>, vector<40x128xbf16>, vector<40x128xbf16>, vector<40x128xbf16>, vector<40x128xbf16> -> vector<40x640xbf16>
    %c0_560 = arith.constant 0 : index
    %c0_561 = arith.constant 0 : index
    %342 = vector.load %arg5[%c0_560, %c0_561] : memref<640x160xbf16, #tpu.memory_space<vmem>>, vector<640x160xbf16>
    %cst_562 = arith.constant dense<0.000000e+00> : vector<40x160xf32>
    %343 = tpu.matmul %341, %342, %cst_562 {dimension_numbers = #tpu.dot_dimension_numbers<[1], [0], [0], [1], [0, 0, 1, 1], [], []>} : vector<40x640xbf16>, vector<640x160xbf16>, vector<40x160xf32> -> vector<40x160xf32>
    %344 = vector.extract_strided_slice %310 {offsets = [8, 0], sizes = [8, 128], strides = [1, 1]} : vector<112x128xbf16> to vector<8x128xbf16>
    %345 = vector.extract_strided_slice %310 {offsets = [24, 0], sizes = [8, 128], strides = [1, 1]} : vector<112x128xbf16> to vector<8x128xbf16>
    %346 = vector.extract_strided_slice %310 {offsets = [40, 0], sizes = [8, 128], strides = [1, 1]} : vector<112x128xbf16> to vector<8x128xbf16>
    %347 = vector.extract_strided_slice %310 {offsets = [56, 0], sizes = [8, 128], strides = [1, 1]} : vector<112x128xbf16> to vector<8x128xbf16>
    %348 = vector.extract_strided_slice %310 {offsets = [72, 0], sizes = [8, 128], strides = [1, 1]} : vector<112x128xbf16> to vector<8x128xbf16>
    %349 = tpu.concatenate %344, %345, %346, %347, %348 in 0 : vector<8x128xbf16>, vector<8x128xbf16>, vector<8x128xbf16>, vector<8x128xbf16>, vector<8x128xbf16> -> vector<40x128xbf16>
    %350 = vector.extract_strided_slice %310 {offsets = [16, 0], sizes = [8, 128], strides = [1, 1]} : vector<112x128xbf16> to vector<8x128xbf16>
    %351 = vector.extract_strided_slice %310 {offsets = [32, 0], sizes = [8, 128], strides = [1, 1]} : vector<112x128xbf16> to vector<8x128xbf16>
    %352 = vector.extract_strided_slice %310 {offsets = [48, 0], sizes = [8, 128], strides = [1, 1]} : vector<112x128xbf16> to vector<8x128xbf16>
    %353 = vector.extract_strided_slice %310 {offsets = [64, 0], sizes = [8, 128], strides = [1, 1]} : vector<112x128xbf16> to vector<8x128xbf16>
    %354 = vector.extract_strided_slice %310 {offsets = [80, 0], sizes = [8, 128], strides = [1, 1]} : vector<112x128xbf16> to vector<8x128xbf16>
    %355 = tpu.concatenate %350, %351, %352, %353, %354 in 0 : vector<8x128xbf16>, vector<8x128xbf16>, vector<8x128xbf16>, vector<8x128xbf16>, vector<8x128xbf16> -> vector<40x128xbf16>
    %356 = vector.extract_strided_slice %310 {offsets = [24, 0], sizes = [8, 128], strides = [1, 1]} : vector<112x128xbf16> to vector<8x128xbf16>
    %357 = vector.extract_strided_slice %310 {offsets = [40, 0], sizes = [8, 128], strides = [1, 1]} : vector<112x128xbf16> to vector<8x128xbf16>
    %358 = vector.extract_strided_slice %310 {offsets = [56, 0], sizes = [8, 128], strides = [1, 1]} : vector<112x128xbf16> to vector<8x128xbf16>
    %359 = vector.extract_strided_slice %310 {offsets = [72, 0], sizes = [8, 128], strides = [1, 1]} : vector<112x128xbf16> to vector<8x128xbf16>
    %360 = vector.extract_strided_slice %310 {offsets = [88, 0], sizes = [8, 128], strides = [1, 1]} : vector<112x128xbf16> to vector<8x128xbf16>
    %361 = tpu.concatenate %356, %357, %358, %359, %360 in 0 : vector<8x128xbf16>, vector<8x128xbf16>, vector<8x128xbf16>, vector<8x128xbf16>, vector<8x128xbf16> -> vector<40x128xbf16>
    %362 = vector.extract_strided_slice %310 {offsets = [32, 0], sizes = [8, 128], strides = [1, 1]} : vector<112x128xbf16> to vector<8x128xbf16>
    %363 = vector.extract_strided_slice %310 {offsets = [48, 0], sizes = [8, 128], strides = [1, 1]} : vector<112x128xbf16> to vector<8x128xbf16>
    %364 = vector.extract_strided_slice %310 {offsets = [64, 0], sizes = [8, 128], strides = [1, 1]} : vector<112x128xbf16> to vector<8x128xbf16>
    %365 = vector.extract_strided_slice %310 {offsets = [80, 0], sizes = [8, 128], strides = [1, 1]} : vector<112x128xbf16> to vector<8x128xbf16>
    %366 = vector.extract_strided_slice %310 {offsets = [96, 0], sizes = [8, 128], strides = [1, 1]} : vector<112x128xbf16> to vector<8x128xbf16>
    %367 = tpu.concatenate %362, %363, %364, %365, %366 in 0 : vector<8x128xbf16>, vector<8x128xbf16>, vector<8x128xbf16>, vector<8x128xbf16>, vector<8x128xbf16> -> vector<40x128xbf16>
    %368 = vector.extract_strided_slice %310 {offsets = [40, 0], sizes = [8, 128], strides = [1, 1]} : vector<112x128xbf16> to vector<8x128xbf16>
    %369 = vector.extract_strided_slice %310 {offsets = [56, 0], sizes = [8, 128], strides = [1, 1]} : vector<112x128xbf16> to vector<8x128xbf16>
    %370 = vector.extract_strided_slice %310 {offsets = [72, 0], sizes = [8, 128], strides = [1, 1]} : vector<112x128xbf16> to vector<8x128xbf16>
    %371 = vector.extract_strided_slice %310 {offsets = [88, 0], sizes = [8, 128], strides = [1, 1]} : vector<112x128xbf16> to vector<8x128xbf16>
    %372 = vector.extract_strided_slice %310 {offsets = [104, 0], sizes = [8, 128], strides = [1, 1]} : vector<112x128xbf16> to vector<8x128xbf16>
    %373 = tpu.concatenate %368, %369, %370, %371, %372 in 0 : vector<8x128xbf16>, vector<8x128xbf16>, vector<8x128xbf16>, vector<8x128xbf16>, vector<8x128xbf16> -> vector<40x128xbf16>
    %374 = tpu.concatenate %349, %355, %361, %367, %373 in 1 : vector<40x128xbf16>, vector<40x128xbf16>, vector<40x128xbf16>, vector<40x128xbf16>, vector<40x128xbf16> -> vector<40x640xbf16>
    %c0_563 = arith.constant 0 : index
    %c0_564 = arith.constant 0 : index
    %375 = vector.load %arg5[%c0_563, %c0_564] : memref<640x160xbf16, #tpu.memory_space<vmem>>, vector<640x160xbf16>
    %cst_565 = arith.constant dense<0.000000e+00> : vector<40x160xf32>
    %376 = tpu.matmul %374, %375, %cst_565 {dimension_numbers = #tpu.dot_dimension_numbers<[1], [0], [0], [1], [0, 0, 1, 1], [], []>} : vector<40x640xbf16>, vector<640x160xbf16>, vector<40x160xf32> -> vector<40x160xf32>
    %377 = arith.maximumf %343, %376 : vector<40x160xf32>
    %c0_566 = arith.constant 0 : index
    %c0_567 = arith.constant 0 : index
    %378 = vector.load %arg6[%c0_566, %c0_567] : memref<1x160xf32, #tpu.memory_space<vmem>>, vector<1x160xf32>
    %379 = vector.broadcast %378 : vector<1x160xf32> to vector<40x160xf32>
    %380 = arith.addf %377, %379 : vector<40x160xf32>
    %cst_568 = arith.constant 0.000000e+00 : f32
    %381 = vector.broadcast %cst_568 : f32 to vector<40x160xf32>
    %382 = arith.maximumf %380, %381 : vector<40x160xf32>
    %383 = arith.truncf %382 : vector<40x160xf32> to vector<40x160xbf16>
    %c0_569 = arith.constant 0 : index
    %c0_570 = arith.constant 0 : index
    %c0_571 = arith.constant 0 : index
    %384 = vector.load %arg7[%c0_569, %c0_570, %c0_571] : memref<2x160x128xbf16, #tpu.memory_space<vmem>>, vector<1x160x128xbf16>
    %385 = vector.shape_cast %384 : vector<1x160x128xbf16> to vector<160x128xbf16>
    %cst_572 = arith.constant dense<0.000000e+00> : vector<40x128xf32>
    %386 = tpu.matmul %383, %385, %cst_572 {dimension_numbers = #tpu.dot_dimension_numbers<[1], [0], [0], [1], [0, 0, 1, 1], [], []>} : vector<40x160xbf16>, vector<160x128xbf16>, vector<40x128xf32> -> vector<40x128xf32>
    %c1_573 = arith.constant 1 : index
    %c0_574 = arith.constant 0 : index
    %c0_575 = arith.constant 0 : index
    %387 = vector.load %arg7[%c1_573, %c0_574, %c0_575] : memref<2x160x128xbf16, #tpu.memory_space<vmem>>, vector<1x160x128xbf16>
    %388 = vector.shape_cast %387 : vector<1x160x128xbf16> to vector<160x128xbf16>
    %cst_576 = arith.constant dense<0.000000e+00> : vector<40x128xf32>
    %389 = tpu.matmul %383, %388, %cst_576 {dimension_numbers = #tpu.dot_dimension_numbers<[1], [0], [0], [1], [0, 0, 1, 1], [], []>} : vector<40x160xbf16>, vector<160x128xbf16>, vector<40x128xf32> -> vector<40x128xf32>
    %390 = arith.maximumf %386, %389 : vector<40x128xf32>
    %391 = arith.truncf %390 : vector<40x128xf32> to vector<40x128xbf16>
    %392 = vector.extract_strided_slice %391 {offsets = [0, 0], sizes = [8, 128], strides = [1, 1]} : vector<40x128xbf16> to vector<8x128xbf16>
    %393 = vector.extract_strided_slice %391 {offsets = [8, 0], sizes = [8, 128], strides = [1, 1]} : vector<40x128xbf16> to vector<8x128xbf16>
    %394 = vector.extract_strided_slice %391 {offsets = [16, 0], sizes = [8, 128], strides = [1, 1]} : vector<40x128xbf16> to vector<8x128xbf16>
    %395 = vector.extract_strided_slice %391 {offsets = [24, 0], sizes = [8, 128], strides = [1, 1]} : vector<40x128xbf16> to vector<8x128xbf16>
    %396 = vector.extract_strided_slice %391 {offsets = [32, 0], sizes = [8, 128], strides = [1, 1]} : vector<40x128xbf16> to vector<8x128xbf16>
    %397 = tpu.concatenate %392, %393, %394, %395, %396 in 1 : vector<8x128xbf16>, vector<8x128xbf16>, vector<8x128xbf16>, vector<8x128xbf16>, vector<8x128xbf16> -> vector<8x640xbf16>
    %c0_577 = arith.constant 0 : index
    %c0_578 = arith.constant 0 : index
    %398 = vector.load %arg8[%c0_577, %c0_578] : memref<640x120xbf16, #tpu.memory_space<vmem>>, vector<640x120xbf16>
    %cst_579 = arith.constant dense<0.000000e+00> : vector<8x120xf32>
    %399 = tpu.matmul %397, %398, %cst_579 {dimension_numbers = #tpu.dot_dimension_numbers<[1], [0], [0], [1], [0, 0, 1, 1], [], []>} : vector<8x640xbf16>, vector<640x120xbf16>, vector<8x120xf32> -> vector<8x120xf32>
    %c0_580 = arith.constant 0 : index
    %c0_581 = arith.constant 0 : index
    %400 = vector.load %arg9[%c0_580, %c0_581] : memref<1x120xf32, #tpu.memory_space<vmem>>, vector<1x120xf32>
    %401 = vector.broadcast %400 : vector<1x120xf32> to vector<8x120xf32>
    %402 = arith.addf %399, %401 : vector<8x120xf32>
    %cst_582 = arith.constant 0.000000e+00 : f32
    %403 = vector.broadcast %cst_582 : f32 to vector<8x120xf32>
    %404 = arith.maximumf %402, %403 : vector<8x120xf32>
    %405 = arith.truncf %404 : vector<8x120xf32> to vector<8x120xbf16>
    %c0_583 = arith.constant 0 : index
    %c0_584 = arith.constant 0 : index
    %406 = vector.load %arg10[%c0_583, %c0_584] : memref<120x84xbf16, #tpu.memory_space<vmem>>, vector<120x84xbf16>
    %cst_585 = arith.constant dense<0.000000e+00> : vector<8x84xf32>
    %407 = tpu.matmul %405, %406, %cst_585 {dimension_numbers = #tpu.dot_dimension_numbers<[1], [0], [0], [1], [0, 0, 1, 1], [], []>} : vector<8x120xbf16>, vector<120x84xbf16>, vector<8x84xf32> -> vector<8x84xf32>
    %c0_586 = arith.constant 0 : index
    %c0_587 = arith.constant 0 : index
    %408 = vector.load %arg11[%c0_586, %c0_587] : memref<1x84xf32, #tpu.memory_space<vmem>>, vector<1x84xf32>
    %409 = vector.broadcast %408 : vector<1x84xf32> to vector<8x84xf32>
    %410 = arith.addf %407, %409 : vector<8x84xf32>
    %cst_588 = arith.constant 0.000000e+00 : f32
    %411 = vector.broadcast %cst_588 : f32 to vector<8x84xf32>
    %412 = arith.maximumf %410, %411 : vector<8x84xf32>
    %413 = arith.truncf %412 : vector<8x84xf32> to vector<8x84xbf16>
    %c0_589 = arith.constant 0 : index
    %c0_590 = arith.constant 0 : index
    %414 = vector.load %arg12[%c0_589, %c0_590] : memref<84x128xbf16, #tpu.memory_space<vmem>>, vector<84x128xbf16>
    %cst_591 = arith.constant dense<0.000000e+00> : vector<8x128xf32>
    %415 = tpu.matmul %413, %414, %cst_591 {dimension_numbers = #tpu.dot_dimension_numbers<[1], [0], [0], [1], [0, 0, 1, 1], [], []>} : vector<8x84xbf16>, vector<84x128xbf16>, vector<8x128xf32> -> vector<8x128xf32>
    %c0_592 = arith.constant 0 : index
    %c0_593 = arith.constant 0 : index
    %416 = vector.load %arg13[%c0_592, %c0_593] : memref<1x128xf32, #tpu.memory_space<vmem>>, vector<1x128xf32>
    %417 = vector.broadcast %416 : vector<1x128xf32> to vector<8x128xf32>
    %418 = arith.addf %415, %417 : vector<8x128xf32>
    %cst_594 = arith.constant dense<0xFF800000> : vector<8xf32>
    %419 = vector.multi_reduction <maximumf>, %418, %cst_594 [1] : vector<8x128xf32> to vector<8xf32>
    %420 = vector.shape_cast %419 : vector<8xf32> to vector<8x1xf32>
    %421 = vector.broadcast %420 : vector<8x1xf32> to vector<8x128xf32>
    %422 = arith.subf %418, %421 : vector<8x128xf32>
    %423 = math.exp %422 : vector<8x128xf32>
    %cst_595 = arith.constant dense<0.000000e+00> : vector<8xf32>
    %424 = vector.multi_reduction <add>, %423, %cst_595 [1] : vector<8x128xf32> to vector<8xf32>
    %425 = vector.shape_cast %424 : vector<8xf32> to vector<8x1xf32>
    %426 = math.log %425 : vector<8x1xf32>
    %427 = vector.broadcast %426 : vector<8x1xf32> to vector<8x128xf32>
    %428 = arith.subf %422, %427 : vector<8x128xf32>
    %c0_596 = arith.constant 0 : index
    %c0_597 = arith.constant 0 : index
    %429 = vector.load %arg14[%c0_596, %c0_597] : memref<8x128xf32, #tpu.memory_space<vmem>>, vector<8x128xf32>
    tpu.vector_store %arg14[%c0_596, %c0_597], %428 {strides = array<i32>} : memref<8x128xf32, #tpu.memory_space<vmem>>, vector<8x128xf32>,
    return
  }
  func.func @transform_0(%arg0: i32) -> (i32, i32, i32, i32) {
    %c0_i32 = arith.constant 0 : i32
    %c0_i32_0 = arith.constant 0 : i32
    %c0_i32_1 = arith.constant 0 : i32
    %c0_i32_2 = arith.constant 0 : i32
    return %c0_i32, %c0_i32_0, %arg0, %c0_i32_1 : i32, i32, i32, i32
  }
  func.func @transform_1(%arg0: i32) -> (i32, i32) {
    %c0_i32 = arith.constant 0 : i32
    %c0_i32_0 = arith.constant 0 : i32
    %c0_i32_1 = arith.constant 0 : i32
    return %c0_i32, %c0_i32_0 : i32, i32
  }
  func.func @transform_2(%arg0: i32) -> (i32, i32) {
    %c0_i32 = arith.constant 0 : i32
    %c0_i32_0 = arith.constant 0 : i32
    %c0_i32_1 = arith.constant 0 : i32
    return %c0_i32, %c0_i32_0 : i32, i32
  }
  func.func @transform_3(%arg0: i32) -> (i32, i32, i32) {
    %c0_i32 = arith.constant 0 : i32
    %c0_i32_0 = arith.constant 0 : i32
    %c0_i32_1 = arith.constant 0 : i32
    %c0_i32_2 = arith.constant 0 : i32
    return %c0_i32, %c0_i32_0, %c0_i32_1 : i32, i32, i32
  }
  func.func @transform_4(%arg0: i32) -> (i32, i32) {
    %c0_i32 = arith.constant 0 : i32
    %c0_i32_0 = arith.constant 0 : i32
    %c0_i32_1 = arith.constant 0 : i32
    return %c0_i32, %c0_i32_0 : i32, i32
  }
  func.func @transform_5(%arg0: i32) -> (i32, i32) {
    %c0_i32 = arith.constant 0 : i32
    %c0_i32_0 = arith.constant 0 : i32
    %c0_i32_1 = arith.constant 0 : i32
    return %c0_i32, %c0_i32_0 : i32, i32
  }
  func.func @transform_6(%arg0: i32) -> (i32, i32, i32) {
    %c0_i32 = arith.constant 0 : i32
    %c0_i32_0 = arith.constant 0 : i32
    %c0_i32_1 = arith.constant 0 : i32
    %c0_i32_2 = arith.constant 0 : i32
    return %c0_i32, %c0_i32_0, %c0_i32_1 : i32, i32, i32
  }
  func.func @transform_7(%arg0: i32) -> (i32, i32) {
    %c0_i32 = arith.constant 0 : i32
    %c0_i32_0 = arith.constant 0 : i32
    %c0_i32_1 = arith.constant 0 : i32
    return %c0_i32, %c0_i32_0 : i32, i32
  }
  func.func @transform_8(%arg0: i32) -> (i32, i32) {
    %c0_i32 = arith.constant 0 : i32
    %c0_i32_0 = arith.constant 0 : i32
    %c0_i32_1 = arith.constant 0 : i32
    return %c0_i32, %c0_i32_0 : i32, i32
  }
  func.func @transform_9(%arg0: i32) -> (i32, i32) {
    %c0_i32 = arith.constant 0 : i32
    %c0_i32_0 = arith.constant 0 : i32
    %c0_i32_1 = arith.constant 0 : i32
    return %c0_i32, %c0_i32_0 : i32, i32
  }
  func.func @transform_10(%arg0: i32) -> (i32, i32) {
    %c0_i32 = arith.constant 0 : i32
    %c0_i32_0 = arith.constant 0 : i32
    %c0_i32_1 = arith.constant 0 : i32
    return %c0_i32, %c0_i32_0 : i32, i32
  }
  func.func @transform_11(%arg0: i32) -> (i32, i32) {
    %c0_i32 = arith.constant 0 : i32
    %c0_i32_0 = arith.constant 0 : i32
    %c0_i32_1 = arith.constant 0 : i32
    return %c0_i32, %c0_i32_0 : i32, i32
  }
  func.func @transform_12(%arg0: i32) -> (i32, i32) {
    %c0_i32 = arith.constant 0 : i32
    %c0_i32_0 = arith.constant 0 : i32
    %c0_i32_1 = arith.constant 0 : i32
    return %c0_i32, %c0_i32_0 : i32, i32
  }
  func.func @transform_13(%arg0: i32) -> (i32, i32) {
    %c0_i32 = arith.constant 0 : i32
    %c0_i32_0 = arith.constant 0 : i32
    return %arg0, %c0_i32 : i32, i32
  }
}

</mosaic_0001>

<bundles_post_ra>
// kernel: lenet5_bn_forward.1
= control target key start
LH: loop header
LB: loop body
LE: loop exit
PB: predicated region body
PF: predicated region fallthrough
CT: control target
= control target key end

     0   :  { %s7875_s0 = inlined_call_operand.vmem [shape: bf16[2,16,16,128], index: 0, kind: input, shape index: {}]   ;;  %s7876_s1 = inlined_call_operand.vmem [shape: bf16[640,168], index: 1, kind: input, shape index: {}]   ;;  %s7877_s2 = inlined_call_operand.vmem [shape: f32[1,168], index: 2, kind: input, shape index: {}]   ;;  %s7878_s3 = inlined_call_operand.vmem [shape: bf16[2,168,128], index: 3, kind: input, shape index: {}]   ;;  %s7879_s4 = inlined_call_operand.vmem [shape: bf16[640,160], index: 4, kind: input, shape index: {}]   ;;  %s7880_s5 = inlined_call_operand.vmem [shape: f32[1,160], index: 5, kind: input, shape index: {}]   ;;  %s7881_s6 = inlined_call_operand.vmem [shape: bf16[2,160,128], index: 6, kind: input, shape index: {}]   ;;  %s7882_s7 = inlined_call_operand.vmem [shape: bf16[640,120], index: 7, kind: input, shape index: {}]   ;;  %s7883_s8 = inlined_call_operand.vmem [shape: f32[1,120], index: 8, kind: input, shape index: {}]   ;;  %s7884_s9 = inlined_call_operand.vmem [shape: bf16[120,84], index: 9, kind: input, shape index: {}]   ;;  %s7885_s10 = inlined_call_operand.vmem [shape: f32[1,84], index: 10, kind: input, shape index: {}]   ;;  %s7886_s11 = inlined_call_operand.vmem [shape: bf16[84,128], index: 11, kind: input, shape index: {}]   ;;  %s7887_s12 = inlined_call_operand.vmem [shape: f32[1,128], index: 12, kind: input, shape index: {}]   ;;  %s7888_s13 = inlined_call_operand.hbm [shape: f32[16,128], index: 13, kind: output, shape index: {}]  }
   0x1   :  { %7926 = sst [smem:[#allocation46_spill]] %s7875_s0 }
   0x2   :  { %7927 = sst [smem:[#allocation47_spill]] %s7876_s1 }
   0x3   :  { %7928 = sst [smem:[#allocation48_spill]] %s7877_s2 }
   0x4   :  { %7929 = sst [smem:[#allocation49_spill]] %s7878_s3 }
   0x5   :  { %18 = vsyncpa [#allocation4], 0 }
   0x6   :  { %20 = vsyncpa [#allocation4 + $0x1], 0  ;;  %s5579_s25 = smov 0   ;;  %s5581_s26 = smov 0  }
   0x7   :  { %s5583_s27 = smov 0   ;;  %s5585_s28 = smov 0  }
   0x8 LB: > { %s7889_s29 = sadd.s32 4294967295, %s5503_s28   ;;  %s4479_s30 = sadd.s32 4294967294, %s5503_s28   ;;  %s5503_s28 = sphi %s5585_s28, %s8083_s28   ;;  %s5499_s27 = sphi %s5583_s27, %s8082_s27   ;;  %s5495_s26 = sphi %s5581_s26, %s8081_s26   ;;  %s5491_s25 = sphi %s5579_s25, %s8080_s25  }
   0x9   : > { %s5602_s14 = sadd.s32 1, %s5503_s28   ;;  %s33_s15 = sadd.s32 1, %s5499_s27 }
   0xa   : > { %s30_s16 = ssub.s32 %s5503_s28, %s5602_s14  ;;  %p40_p0 = scmp.ne.s32.totalorder %s5499_s27, %s5495_s26 }
   0xb   : > { %p31_p1 = scmp.eq.s32.totalorder %s30_s16, 0  ;;  %p41_p2 = scmp.eq.s32.totalorder %s5503_s28, 0 }
   0xc   : > { %p322_p3 = scmp.eq.s32.totalorder %s7889_s29, 1  ;;  %p327_p4 = scmp.ne.s32.totalorder %s5495_s26, %s5491_s25 }
   0xd   : > { %s5615_s17 = scalar_select %p31_p1, %s5499_s27, %s33_s15  }
   0xe   : > { %p42_p5 = por %p41_p2, %p40_p0  ;;  %p5617_p6 = por %p322_p3, %p40_p0 }
   0xf   : > { %p328_p7 = scmp.eq.s32.totalorder %s4479_s30, 1  ;;  %p7925_p9 = scmp.ge.s32.totalorder %s5503_s28, 2 }
  0x11   : > { %p5621_p8 = por %p328_p7, %p327_p4  ;;  %380 = sbr.rel (%p7925_p9) target bundleno = 53 (0x35), region = 64 }
  0x16   : > { %383 = sbr.rel (!%p42_p5) target bundleno = 53 (0x35), region = 68  ;;  %s385_s20 = sand.u32 (%p42_p5), 1, %s5499_s27  }
  0x17   : > { %s4483_s21 = sshll.u32 (%p42_p5), %s5503_s28, 2  ;;  %s4482_s22 = sshll.u32 (%p42_p5), %s385_s20, 7 }
  0x18   : > { %s7932_s0 = sld [smem:[#allocation46_spill]] (%p42_p5)  ;;  %s5637_s30 = scalar_lea.vmem (%p42_p5), [#allocation2], %s4482_s22 }
  0x1e   : > { %s5633_s15 = scalar_lea.vmem %s7932_s0, %s4483_s21 }
  0x1f   : > { %v406_v0 = vld [vmem:[%s5633_s15] sm:$0xf]  ;;  %v408_v1 = vld [vmem:[%s5633_s15 + $0x8] sm:$0xf]  ;;  %v410_v2 = vld [vmem:[%s5633_s15 + $0x10] sm:$0xf] }
  0x20   : > { %407 = vst [vmem:[%s5637_s30] sm:$0xf] %v406_v0  ;;  %409 = vst [vmem:[%s5637_s30 + $0x4] sm:$0xf] %v408_v1  ;;  %v412_v3 = vld [vmem:[%s5633_s15 + $0x18] sm:$0xf] }
  0x21   : > { %v414_v4 = vld [vmem:[%s5633_s15 + $0x20] sm:$0xf]  ;;  %411 = vst [vmem:[%s5637_s30 + $0x8] sm:$0xf] %v410_v2  ;;  %413 = vst [vmem:[%s5637_s30 + $0xc] sm:$0xf] %v412_v3 }
  0x22   : > { %415 = vst [vmem:[%s5637_s30 + $0x10] sm:$0xf] %v414_v4  ;;  %v416_v5 = vld [vmem:[%s5633_s15 + $0x28] sm:$0xf]  ;;  %v418_v6 = vld [vmem:[%s5633_s15 + $0x30] sm:$0xf] }
  0x23   : > { %v420_v7 = vld [vmem:[%s5633_s15 + $0x38] sm:$0xf]  ;;  %417 = vst [vmem:[%s5637_s30 + $0x14] sm:$0xf] %v416_v5  ;;  %419 = vst [vmem:[%s5637_s30 + $0x18] sm:$0xf] %v418_v6 }
  0x24   : > { %421 = vst [vmem:[%s5637_s30 + $0x1c] sm:$0xf] %v420_v7  ;;  %v422_v8 = vld [vmem:[%s5633_s15 + $0x40] sm:$0xf]  ;;  %v424_v9 = vld [vmem:[%s5633_s15 + $0x48] sm:$0xf] }
  0x25   : > { %v426_v10 = vld [vmem:[%s5633_s15 + $0x50] sm:$0xf]  ;;  %423 = vst [vmem:[%s5637_s30 + $0x20] sm:$0xf] %v422_v8  ;;  %425 = vst [vmem:[%s5637_s30 + $0x24] sm:$0xf] %v424_v9 }
  0x26   : > { %427 = vst [vmem:[%s5637_s30 + $0x28] sm:$0xf] %v426_v10  ;;  %v428_v11 = vld [vmem:[%s5633_s15 + $0x58] sm:$0xf]  ;;  %v430_v12 = vld [vmem:[%s5633_s15 + $0x60] sm:$0xf] }
  0x27   : > { %v432_v13 = vld [vmem:[%s5633_s15 + $0x68] sm:$0xf]  ;;  %429 = vst [vmem:[%s5637_s30 + $0x2c] sm:$0xf] %v428_v11  ;;  %431 = vst [vmem:[%s5637_s30 + $0x30] sm:$0xf] %v430_v12 }
  0x28   : > { %433 = vst [vmem:[%s5637_s30 + $0x34] sm:$0xf] %v432_v13  ;;  %v434_v14 = vld [vmem:[%s5633_s15 + $0x70] sm:$0xf]  ;;  %v436_v15 = vld [vmem:[%s5633_s15 + $0x78] sm:$0xf] }
  0x29   : > { %v438_v16 = vld [vmem:[%s5633_s15 + $0x80] sm:$0xf]  ;;  %435 = vst [vmem:[%s5637_s30 + $0x38] sm:$0xf] %v434_v14  ;;  %437 = vst [vmem:[%s5637_s30 + $0x3c] sm:$0xf] %v436_v15 }
  0x2a   : > { %439 = vst [vmem:[%s5637_s30 + $0x40] sm:$0xf] %v438_v16  ;;  %v440_v17 = vld [vmem:[%s5633_s15 + $0x88] sm:$0xf]  ;;  %v442_v18 = vld [vmem:[%s5633_s15 + $0x90] sm:$0xf] }
  0x2b   : > { %v444_v19 = vld [vmem:[%s5633_s15 + $0x98] sm:$0xf]  ;;  %441 = vst [vmem:[%s5637_s30 + $0x44] sm:$0xf] %v440_v17  ;;  %443 = vst [vmem:[%s5637_s30 + $0x48] sm:$0xf] %v442_v18 }
  0x2c   : > { %445 = vst [vmem:[%s5637_s30 + $0x4c] sm:$0xf] %v444_v19  ;;  %v446_v20 = vld [vmem:[%s5633_s15 + $0xa0] sm:$0xf]  ;;  %v448_v21 = vld [vmem:[%s5633_s15 + $0xa8] sm:$0xf] }
  0x2d   : > { %v450_v22 = vld [vmem:[%s5633_s15 + $0xb0] sm:$0xf]  ;;  %447 = vst [vmem:[%s5637_s30 + $0x50] sm:$0xf] %v446_v20  ;;  %449 = vst [vmem:[%s5637_s30 + $0x54] sm:$0xf] %v448_v21 }
  0x2e   : > { %451 = vst [vmem:[%s5637_s30 + $0x58] sm:$0xf] %v450_v22  ;;  %v452_v23 = vld [vmem:[%s5633_s15 + $0xb8] sm:$0xf]  ;;  %v454_v24 = vld [vmem:[%s5633_s15 + $0xc0] sm:$0xf] }
  0x2f   : > { %v456_v25 = vld [vmem:[%s5633_s15 + $0xc8] sm:$0xf]  ;;  %453 = vst [vmem:[%s5637_s30 + $0x5c] sm:$0xf] %v452_v23  ;;  %455 = vst [vmem:[%s5637_s30 + $0x60] sm:$0xf] %v454_v24 }
  0x30   : > { %457 = vst [vmem:[%s5637_s30 + $0x64] sm:$0xf] %v456_v25  ;;  %v458_v26 = vld [vmem:[%s5633_s15 + $0xd0] sm:$0xf]  ;;  %v460_v27 = vld [vmem:[%s5633_s15 + $0xd8] sm:$0xf] }
  0x31   : > { %v462_v28 = vld [vmem:[%s5633_s15 + $0xe0] sm:$0xf]  ;;  %459 = vst [vmem:[%s5637_s30 + $0x68] sm:$0xf] %v458_v26  ;;  %461 = vst [vmem:[%s5637_s30 + $0x6c] sm:$0xf] %v460_v27 }
  0x32   : > { %463 = vst [vmem:[%s5637_s30 + $0x70] sm:$0xf] %v462_v28  ;;  %v464_v29 = vld [vmem:[%s5633_s15 + $0xe8] sm:$0xf]  ;;  %v466_v30 = vld [vmem:[%s5633_s15 + $0xf0] sm:$0xf] }
  0x33   : > { %v468_v31 = vld [vmem:[%s5633_s15 + $0xf8] sm:$0xf]  ;;  %465 = vst [vmem:[%s5637_s30 + $0x74] sm:$0xf] %v464_v29  ;;  %467 = vst [vmem:[%s5637_s30 + $0x78] sm:$0xf] %v466_v30 }
  0x34   : > { %469 = vst [vmem:[%s5637_s30 + $0x7c] sm:$0xf] %v468_v31 }
  0x35 PF: > { %p4484_p10 = scmp.ge.s32.totalorder %s5503_s28, 1  ;;  %p556_p11 = scmp.lt.s32.totalorder %s5503_s28, 3 }
  0x37   : > { %p557_p12 = pnand %p4484_p10, %p556_p11 }
  0x39   : > { %560 = sbr.rel (%p557_p12) target bundleno = 2147 (0x863), region = 109 }
  0x3e   : > { %s7933_s1 = sld [smem:[#allocation47_spill]]  ;;  %s5876_s29 = sand.u32 1, %s5495_s26   ;;  %vm655_vm0 = vcmask 1043456   ;;  %vm2173_vm1 = vcmask 326656   ;;  %vm3508_vm2 = vcmask 261120   ;;  %vm5507_vm3 = vmmov 0  }
  0x3f   : > { %s4485_s30 = sshll.u32 %s5876_s29, 7  ;;  %s7940_s3 = sld [smem:[#allocation49_spill]]  ;;  %vm4345_vm4 = vcmask 1041408   ;;  %vm4241_vm5 = vcmask 982016   ;;  %vm4341_vm6 = vcmask 687104  }
  0x40   : > { %s5915_s16 = scalar_lea.vmem [#allocation2], %s4485_s30  ;;  %s7983_s2 = sld [smem:[#allocation48_spill]] }
  0x41   : > { %v4507_v14 = vld [vmem:[%s5915_s16 + $0x40] sm:$0xf]  ;;  %v4508_v15 = vld [vmem:[%s5915_s16 + $0x44] sm:$0xf]  ;;  %v5920_v16 = vld [vmem:[%s5915_s16 + $0x48] sm:$0xf] }
  0x42   : > { %v4521_v19 = vcombine.low %v4508_v15, %v4508_v15  ;;  %v4537_v20 = vcombine.low %v5920_v16, %v5920_v16  ;;  %s4486_s30 = sshll.u32 %s5876_s29, 3  ;;  %s8078_s23 = sadd.s32 4294967295, %s5503_s28  }
  0x43   : > { %s4871_s24 = sshll.u32 %s8078_s23, 7  ;;  %s605_s15 = scalar_lea.vmem [#allocation3], %s4486_s30 }
  0x44   : > { %v5706_v32 = vld [vmem:[%s7933_s1 + $0x74] ss:$8 sps:$4 sm:$0xff]   ;;  %v5717_v34 = vld [vmem:[%s7933_s1 + $0x70] ss:$8 sps:$4 sm:$0xff]   ;;  %v5726_v36 = vld [vmem:[%s7933_s1 + $0x64] ss:$8 sps:$4 sm:$0xff]   ;;  %v5943_v23 = vsel %vm655_vm0, %v4507_v14, %v4521_v19  ;;  %v5946_v24 = vsel %vm655_vm0, %v4508_v15, %v4537_v20  ;;  %s4412_s0 = scalar_lea.hbm %s7888_s13, %s4871_s24 }
  0x45   : > { %v5711_v33 = vld [vmem:[%s7933_s1 + $0x174] ss:$8 sps:$4 sm:$0xff]   ;;  %1352 = vmatprep.subr.bf16.mxu0 %v5706_v32  ;;  %v5046_v35 = vld [vmem:[%s7933_s1 + $0x170] ss:$8 sps:$4 sm:$0xff]   ;;  %v5049_v37 = vld [vmem:[%s7933_s1 + $0x164] ss:$8 sps:$4 sm:$0xff]   ;;  %1384 = vmatprep.mubr.bf16.mxu0 %v5943_v23 }
  0x46   : > { %1455 = vmatprep.subr.bf16.mxu1 %v5711_v33  ;;  %1353 = vmatpush1.bf16.msra.mxu0 %v5717_v34  ;;  %v5735_v38 = vld [vmem:[%s7933_s1 + $0x60] ss:$8 sps:$4 sm:$0xff]   ;;  %v5744_v40 = vld [vmem:[%s7933_s1 + $0x54] ss:$8 sps:$4 sm:$0xff]   ;;  %v5752_v42 = vld [vmem:[%s7933_s1 + $0x50] ss:$8 sps:$4 sm:$0xff]  }
  0x47   : > { %1456 = vmatpush1.bf16.msra.mxu1 %v5046_v35  ;;  %1354 = vmatprep.subr.bf16.mxu0 %v5726_v36  ;;  %v5052_v39 = vld [vmem:[%s7933_s1 + $0x160] ss:$8 sps:$4 sm:$0xff]   ;;  %v5055_v41 = vld [vmem:[%s7933_s1 + $0x154] ss:$8 sps:$4 sm:$0xff]   ;;  %v5058_v43 = vld [vmem:[%s7933_s1 + $0x150] ss:$8 sps:$4 sm:$0xff]  }
  0x48   : > { %1457 = vmatprep.subr.bf16.mxu1 %v5049_v37  ;;  %v5761_v44 = vld [vmem:[%s7933_s1 + $0x44] ss:$8 sps:$4 sm:$0xff]   ;;  %v5770_v46 = vld [vmem:[%s7933_s1 + $0x40] ss:$8 sps:$4 sm:$0xff]   ;;  %v5779_v48 = vld [vmem:[%s7933_s1 + $0x34] ss:$8 sps:$4 sm:$0xff]   ;;  %1487 = vmatprep.mubr.bf16.mxu1 %v5946_v24 }
  0x49   : > { %v5061_v45 = vld [vmem:[%s7933_s1 + $0x144] ss:$8 sps:$4 sm:$0xff]   ;;  %v5064_v47 = vld [vmem:[%s7933_s1 + $0x140] ss:$8 sps:$4 sm:$0xff]   ;;  %v5067_v49 = vld [vmem:[%s7933_s1 + $0x134] ss:$8 sps:$4 sm:$0xff]  }
  0x4a   : > { %1355 = vmatpush1.bf16.msra.mxu0 %v5735_v38  ;;  %v5788_v50 = vld [vmem:[%s7933_s1 + $0x30] ss:$8 sps:$4 sm:$0xff]   ;;  %v5797_v52 = vld [vmem:[%s7933_s1 + $0x24] ss:$8 sps:$4 sm:$0xff]   ;;  %v5806_v54 = vld [vmem:[%s7933_s1 + $0x20] ss:$8 sps:$4 sm:$0xff]  }
  0x4b   : > { %1458 = vmatpush1.bf16.msra.mxu1 %v5052_v39  ;;  %1356 = vmatprep.subr.bf16.mxu0 %v5744_v40  ;;  %v5070_v51 = vld [vmem:[%s7933_s1 + $0x130] ss:$8 sps:$4 sm:$0xff]   ;;  %v5073_v53 = vld [vmem:[%s7933_s1 + $0x124] ss:$8 sps:$4 sm:$0xff]   ;;  %v5076_v55 = vld [vmem:[%s7933_s1 + $0x120] ss:$8 sps:$4 sm:$0xff]  }
  0x4c   : > { %1459 = vmatprep.subr.bf16.mxu1 %v5055_v41  ;;  %v5815_v56 = vld [vmem:[%s7933_s1 + $0x14] ss:$8 sps:$4 sm:$0xff]   ;;  %v5824_v58 = vld [vmem:[%s7933_s1 + $0x10] ss:$8 sps:$4 sm:$0xff]   ;;  %v5833_v60 = vld [vmem:[%s7933_s1 + $0x4] ss:$8 sps:$4 sm:$0xff]  }
  0x4d   : > { %v5079_v57 = vld [vmem:[%s7933_s1 + $0x114] ss:$8 sps:$4 sm:$0xff]   ;;  %v5082_v59 = vld [vmem:[%s7933_s1 + $0x110] ss:$8 sps:$4 sm:$0xff]   ;;  %v5085_v61 = vld [vmem:[%s7933_s1 + $0x104] ss:$8 sps:$4 sm:$0xff]  }
  0x4e   : > { %1357 = vmatpush1.bf16.msra.mxu0 %v5752_v42  ;;  %v5842_v62 = vld [vmem:[%s7933_s1] ss:$8 sps:$4 sm:$0xff]   ;;  %v5851_v0 = vld [vmem:[%s7933_s1 + $0xf4] ss:$8 sps:$4 sm:$0xff]   ;;  %v5860_v2 = vld [vmem:[%s7933_s1 + $0xf0] ss:$8 sps:$4 sm:$0xff]  }
  0x4f   : > { %1460 = vmatpush1.bf16.msra.mxu1 %v5058_v43  ;;  %1358 = vmatprep.subr.bf16.mxu0 %v5761_v44  ;;  %v5088_v63 = vld [vmem:[%s7933_s1 + $0x100] ss:$8 sps:$4 sm:$0xff]   ;;  %v5091_v1 = vld [vmem:[%s7933_s1 + $0x1f4] ss:$8 sps:$4 sm:$0xff]   ;;  %v5094_v3 = vld [vmem:[%s7933_s1 + $0x1f0] ss:$8 sps:$4 sm:$0xff]  }
  0x50   : > { %1461 = vmatprep.subr.bf16.mxu1 %v5061_v45  ;;  %v5869_v4 = vld [vmem:[%s7933_s1 + $0xe4] ss:$8 sps:$4 sm:$0xff]   ;;  %v5881_v6 = vld [vmem:[%s7933_s1 + $0xe0] ss:$8 sps:$4 sm:$0xff]   ;;  %v5890_v8 = vld [vmem:[%s7933_s1 + $0xd4] ss:$8 sps:$4 sm:$0xff]  }
  0x51   : > { %v5097_v5 = vld [vmem:[%s7933_s1 + $0x1e4] ss:$8 sps:$4 sm:$0xff]   ;;  %v5100_v7 = vld [vmem:[%s7933_s1 + $0x1e0] ss:$8 sps:$4 sm:$0xff]   ;;  %v5103_v9 = vld [vmem:[%s7933_s1 + $0x1d4] ss:$8 sps:$4 sm:$0xff]  }
  0x52   : > { %1359 = vmatpush1.bf16.msra.mxu0 %v5770_v46  ;;  %v5900_v10 = vld [vmem:[%s7933_s1 + $0xd0] ss:$8 sps:$4 sm:$0xff]   ;;  %v5909_v12 = vld [vmem:[%s7933_s1 + $0xc4] ss:$8 sps:$4 sm:$0xff]   ;;  %v5926_v17 = vld [vmem:[%s7933_s1 + $0xc0] ss:$8 sps:$4 sm:$0xff]  }
  0x53   : > { %1462 = vmatpush1.bf16.msra.mxu1 %v5064_v47  ;;  %1360 = vmatprep.subr.bf16.mxu0 %v5779_v48  ;;  %v5106_v11 = vld [vmem:[%s7933_s1 + $0x1d0] ss:$8 sps:$4 sm:$0xff]   ;;  %v5109_v13 = vld [vmem:[%s7933_s1 + $0x1c4] ss:$8 sps:$4 sm:$0xff]   ;;  %v5112_v18 = vld [vmem:[%s7933_s1 + $0x1c0] ss:$8 sps:$4 sm:$0xff]  }
  0x54   : > { %1463 = vmatprep.subr.bf16.mxu1 %v5067_v49  ;;  %v5937_v21 = vld [vmem:[%s7933_s1 + $0xb4] ss:$8 sps:$4 sm:$0xff]   ;;  %v5954_v25 = vld [vmem:[%s7933_s1 + $0xb0] ss:$8 sps:$4 sm:$0xff]   ;;  %v5963_v27 = vld [vmem:[%s7933_s1 + $0xa4] ss:$8 sps:$4 sm:$0xff]  }
  0x55   : > { %v5115_v22 = vld [vmem:[%s7933_s1 + $0x1b4] ss:$8 sps:$4 sm:$0xff]   ;;  %v5118_v26 = vld [vmem:[%s7933_s1 + $0x1b0] ss:$8 sps:$4 sm:$0xff]   ;;  %v5121_v28 = vld [vmem:[%s7933_s1 + $0x1a4] ss:$8 sps:$4 sm:$0xff]  }
  0x56   : > { %1361 = vmatpush1.bf16.msra.mxu0 %v5788_v50  ;;  %v5972_v29 = vld [vmem:[%s7933_s1 + $0xa0] ss:$8 sps:$4 sm:$0xff]   ;;  %v5981_v31 = vld [vmem:[%s7933_s1 + $0x94] ss:$8 sps:$4 sm:$0xff]   ;;  %v5989_v37 = vld [vmem:[%s7933_s1 + $0x90] ss:$8 sps:$4 sm:$0xff]  }
  0x57   : > { %1464 = vmatpush1.bf16.msra.mxu1 %v5070_v51  ;;  %1362 = vmatprep.subr.bf16.mxu0 %v5797_v52  ;;  %v5124_v30 = vld [vmem:[%s7933_s1 + $0x1a0] ss:$8 sps:$4 sm:$0xff]   ;;  %v5127_v35 = vld [vmem:[%s7933_s1 + $0x194] ss:$8 sps:$4 sm:$0xff]   ;;  %v5130_v39 = vld [vmem:[%s7933_s1 + $0x190] ss:$8 sps:$4 sm:$0xff]  }
  0x58   : > { %1465 = vmatprep.subr.bf16.mxu1 %v5073_v53  ;;  %v5998_v41 = vld [vmem:[%s7933_s1 + $0x84] ss:$8 sps:$4 sm:$0xff]   ;;  %v4488_v47 = vld [vmem:[%s5915_s16 + $0x8] sm:$0xf]  ;;  %v4512_v15 = vld [vmem:[%s5915_s16 + $0x54] sm:$0xf] }
  0x59   : > { %v5133_v43 = vld [vmem:[%s7933_s1 + $0x184] ss:$8 sps:$4 sm:$0xff]   ;;  %v6011_v51 = vld [vmem:[%s7933_s1 + $0x80] ss:$8 sps:$4 sm:$0xff]   ;;  %s4414_s20 = sshll.u32 %s605_s15, 4  ;;  %s4415_s20 = int_to_ptr.vmem [resolvable:$true] %s4414_s20 }
  0x5a   : > { %1363 = vmatpush1.bf16.msra.mxu0 %v5806_v54  ;;  %v4487_v45 = vld [vmem:[%s5915_s16 + $0x4] sm:$0xf]  ;;  %v4510_v49 = vld [vmem:[%s5915_s16 + $0x4c] sm:$0xf]  ;;  %v5136_v53 = vld [vmem:[%s7933_s1 + $0x180] ss:$8 sps:$4 sm:$0xff]  }
  0x5b   : > { %1466 = vmatpush1.bf16.msra.mxu1 %v5076_v55  ;;  %1364 = vmatprep.subr.bf16.mxu0 %v5815_v56  ;;  %v4500_v55 = vcombine.low %v4487_v45, %v4487_v45  ;;  %v6039_v14 = vld [vmem:[%s7933_s1 + $0x264] ss:$8 sps:$4 sm:$0xff]   ;;  %v6052_v20 = vld [vmem:[%s7933_s1 + $0x260] ss:$8 sps:$4 sm:$0xff]   ;;  %s5443_s22 = scalar_lea.vmem %s4415_s20, 128 }
  0x5c   : > { %1467 = vmatprep.subr.bf16.mxu1 %v5079_v57  ;;  %v4529_v57 = vcombine.low %v4488_v47, %v4488_v47  ;;  %p5444_p13 = scmp.ne.s32.totalorder %s4415_s20, %s5443_s22 }
  0x5e   : > { %1365 = vmatpush1.bf16.msra.mxu0 %v5824_v58  ;;  %p5445_p0 = pnand %p5444_p13, %p5617_p6 }
  0x5f   : > { %1468 = vmatpush1.bf16.msra.mxu1 %v5082_v59  ;;  %1366 = vmatprep.subr.bf16.mxu0 %v5833_v60  ;;  %v4511_v59 = vld [vmem:[%s5915_s16 + $0x50] sm:$0xf] }
  0x60   : > { %1469 = vmatprep.subr.bf16.mxu1 %v5085_v61  ;;  %v607_v61 = vld [vmem:[%s5915_s16] sm:$0xf]  ;;  %p5446_p1 = pneg %p5445_p0 }
  0x62   : > { %1367 = vmatpush1.bf16.msra.mxu0 %v5842_v62 }
  0x63   : > { %1470 = vmatpush1.bf16.msra.mxu1 %v5088_v63  ;;  %1368 = vmatprep.subr.bf16.mxu0 %v5851_v0  ;;  %v6022_v63 = vld [vmem:[%s7933_s1 + $0x274] ss:$8 sps:$4 sm:$0xff]  }
  0x64   : > { %1471 = vmatprep.subr.bf16.mxu1 %v5091_v1  ;;  %v6027_v1 = vld [vmem:[%s7933_s1 + $0x270] ss:$8 sps:$4 sm:$0xff]  }
  0x66   : > { %1369 = vmatpush2.bf16.msra.mxu0 %v5860_v2 }
  0x67   : > { %1472 = vmatpush2.bf16.msra.mxu1 %v5094_v3  ;;  %1370 = vmatprep.subr.bf16.mxu0 %v5869_v4  ;;  %v4522_v3 = vcombine.low %v4510_v49, %v4510_v49 }
  0x68   : > { %1473 = vmatprep.subr.bf16.mxu1 %v5097_v5  ;;  %v4538_v5 = vcombine.low %v4511_v59, %v4511_v59 }
  0x69   : > { %v6047_v19 = vsel %vm655_vm0, %v5920_v16, %v4522_v3  ;;  %v4494_v3 = vld [vmem:[%s5915_s16 + $0x20] sm:$0xf] }
  0x6a   : > { %1371 = vmatpush2.bf16.msra.mxu0 %v5881_v6 }
  0x6b   : > { %1474 = vmatpush2.bf16.msra.mxu1 %v5100_v7  ;;  %1372 = vmatprep.subr.bf16.mxu0 %v5890_v8  ;;  %v4489_v7 = vld [vmem:[%s5915_s16 + $0xc] sm:$0xf] }
  0x6c   : > { %1475 = vmatprep.subr.bf16.mxu1 %v5103_v9  ;;  %v4490_v9 = vld [vmem:[%s5915_s16 + $0x10] sm:$0xf]  ;;  %v4501_v16 = vcombine.low %v4489_v7, %v4489_v7 }
  0x6e   : > { %1373 = vmatpush2.bf16.msra.mxu0 %v5900_v10 }
  0x6f   : > { %1476 = vmatpush2.bf16.msra.mxu1 %v5106_v11  ;;  %1374 = vmatprep.subr.bf16.mxu0 %v5909_v12  ;;  %v658_v11 = vsel %vm655_vm0, %v607_v61, %v4500_v55 }
  0x70   : > { %1477 = vmatprep.subr.bf16.mxu1 %v5109_v13  ;;  %v6034_v13 = vsel %vm655_vm0, %v4487_v45, %v4529_v57  ;;  %v4514_v45 = vld [vmem:[%s5915_s16 + $0x5c] sm:$0xf]  ;;  %v6106_v57 = vld [vmem:[%s7933_s1 + $0x240] ss:$8 sps:$4 sm:$0xff]  }
  0x72   : > { %1375 = vmatpush2.bf16.msra.mxu0 %v5926_v17 }
  0x73   : > { %1478 = vmatpush2.bf16.msra.mxu1 %v5112_v18  ;;  %1376 = vmatprep.subr.bf16.mxu0 %v5937_v21  ;;  %v4513_v18 = vld [vmem:[%s5915_s16 + $0x58] sm:$0xf] }
  0x74   : > { %1479 = vmatprep.subr.bf16.mxu1 %v5115_v22  ;;  %v6056_v22 = vsel %vm655_vm0, %v4510_v49, %v4538_v5  ;;  %v4515_v49 = vld [vmem:[%s5915_s16 + $0x60] sm:$0xf] }
  0x75   : > { %v4540_v61 = vcombine.low %v4515_v49, %v4515_v49 }
  0x76   : > { %1377 = vmatpush2.bf16.msra.mxu0 %v5954_v25 }
  0x77   : > { %1480 = vmatpush2.bf16.msra.mxu1 %v5118_v26  ;;  %1378 = vmatprep.subr.bf16.mxu0 %v5963_v27  ;;  %v4530_v26 = vcombine.low %v4490_v9, %v4490_v9 }
  0x78   : > { %1481 = vmatprep.subr.bf16.mxu1 %v5121_v28  ;;  %v4523_v28 = vcombine.low %v4512_v15, %v4512_v15 }
  0x7a   : > { %1379 = vmatpush2.bf16.msra.mxu0 %v5972_v29 }
  0x7b   : > { %1482 = vmatpush2.bf16.msra.mxu1 %v5124_v30  ;;  %1380 = vmatprep.subr.bf16.mxu0 %v5981_v31  ;;  %v4539_v30 = vcombine.low %v4513_v18, %v4513_v18 }
  0x7c   : > { %1483 = vmatprep.subr.bf16.mxu1 %v5127_v35  ;;  %v4491_v35 = vld [vmem:[%s5915_s16 + $0x14] sm:$0xf] }
  0x7e   : > { %1381 = vmatpush2.bf16.msra.mxu0 %v5989_v37 }
  0x7f   : > { %1484 = vmatpush2.bf16.msra.mxu1 %v5130_v39  ;;  %1382 = vmatprep.subr.bf16.mxu0 %v5998_v41  ;;  %v4492_v39 = vld [vmem:[%s5915_s16 + $0x18] sm:$0xf] }
  0x80   : > { %1485 = vmatprep.subr.bf16.mxu1 %v5133_v43  ;;  %v6076_v43 = vsel %vm655_vm0, %v4489_v7, %v4530_v26  ;;  %v4531_v55 = vcombine.low %v4492_v39, %v4492_v39  ;;  %v4532_v26 = vcombine.low %v4494_v3, %v4494_v3 }
  0x82   : > { %1383 = vmatpush2.bf16.msra.mxu0 %v6011_v51  ;;  %v6119_v7 = vsel %vm655_vm0, %v4491_v35, %v4531_v55  ;;  %v4518_v55 = vld [vmem:[%s5915_s16 + $0x6c] sm:$0xf] }
  0x83   : > { %1486 = vmatpush2.bf16.msra.mxu1 %v5136_v53  ;;  %1558 = vmatprep.subr.bf16.mxu0 %v6022_v63  ;;  %v6097_v53 = vsel %vm655_vm0, %v4512_v15, %v4539_v30 }
  0x84   : > { %1670 = vmatprep.subr.bf16.mxu1 %v5706_v32  ;;  %v6061_v32 = vld [vmem:[%s7933_s1 + $0x254] ss:$8 sps:$4 sm:$0xff]   ;;  %7934 = vst [vmem:[#allocation6_spill] sm:$0xff] %v6097_v53 }
  0x85   : > { %1385 = vmatmul.mubr.bf16.vlgmr.msra.gmra.mxu0 %v658_v11  ;;  %v4516_v11 = vld [vmem:[%s5915_s16 + $0x64] sm:$0xf] }
  0x86   : > { %1488 = vmatmul.mubr.bf16.vlgmr.msra.gmra.mxu1 %v6034_v13  ;;  %1559 = vmatpush1.bf16.msra.mxu0 %v6027_v1 }
  0x87   : > { %1671 = vmatpush1.bf16.msra.mxu1 %v5717_v34  ;;  %1394 = vmatprep.mubr.bf16.mxu0 %v6047_v19  ;;  %v6073_v34 = vsel %vm655_vm0, %v4488_v47, %v4501_v16  ;;  %v6093_v47 = vld [vmem:[%s7933_s1 + $0x244] ss:$8 sps:$4 sm:$0xff]   ;;  %v6139_v16 = vsel %vm655_vm0, %v4514_v45, %v4540_v61 }
  0x88   : > { %1672 = vmatprep.subr.bf16.mxu1 %v5726_v36  ;;  %1497 = vmatprep.mubr.bf16.mxu1 %v6056_v22  ;;  %v6082_v36 = vld [vmem:[%s7933_s1 + $0x250] ss:$8 sps:$4 sm:$0xff]   ;;  %7935 = vst [vmem:[#allocation7_spill] sm:$0xff] %v6139_v16 }
  0x89   : > { %1560 = vmatprep.subr.bf16.mxu0 %v6039_v14 }
  0x8a   : > { %1561 = vmatpush1.bf16.msra.mxu0 %v6052_v20 }
  0x8b   : > { %1673 = vmatpush1.bf16.msra.mxu1 %v5735_v38  ;;  %1562 = vmatprep.subr.bf16.mxu0 %v6061_v32  ;;  %v6088_v38 = vsel %vm655_vm0, %v4511_v59, %v4523_v28  ;;  %v4524_v59 = vcombine.low %v4514_v45, %v4514_v45  ;;  %v4525_v28 = vcombine.low %v4516_v11, %v4516_v11  ;;  %v4496_v45 = vld [vmem:[%s5915_s16 + $0x28] sm:$0xf] }
  0x8c   : > { %1674 = vmatprep.subr.bf16.mxu1 %v5744_v40  ;;  %v4502_v40 = vcombine.low %v4491_v35, %v4491_v35  ;;  %v4495_v35 = vld [vmem:[%s5915_s16 + $0x24] sm:$0xf] }
  0x8d   : > { %1395 = vmatmul.mubr.bf16.gmra.mxu0 %v6073_v34  ;;  %v6129_v15 = vsel %vm655_vm0, %v4513_v18, %v4524_v59  ;;  %v6172_v59 = vsel %vm655_vm0, %v4515_v49, %v4525_v28  ;;  %v4533_v49 = vcombine.low %v4496_v45, %v4496_v45 }
  0x8e   : > { %1498 = vmatmul.mubr.bf16.gmra.mxu1 %v6076_v43  ;;  %1404 = vmatprep.mubr.bf16.mxu0 %v6088_v38  ;;  %v6116_v5 = vsel %vm655_vm0, %v4490_v9, %v4502_v40  ;;  %v4517_v9 = vld [vmem:[%s5915_s16 + $0x68] sm:$0xf] }
  0x8f   : > { %1675 = vmatpush1.bf16.msra.mxu1 %v5752_v42  ;;  %1507 = vmatprep.mubr.bf16.mxu1 %v6097_v53  ;;  %v4493_v42 = vld [vmem:[%s5915_s16 + $0x1c] sm:$0xf]  ;;  %v4541_v30 = vcombine.low %v4517_v9, %v4517_v9  ;;  %v4536_v53 = vld [vmem:[%s5915_s16 + $0x78] sm:$0xf] }
  0x90   : > { %1676 = vmatprep.subr.bf16.mxu1 %v5761_v44  ;;  %1563 = vmatpush1.bf16.msra.mxu0 %v6082_v36  ;;  %v6124_v44 = vld [vmem:[%s7933_s1 + $0x234] ss:$8 sps:$4 sm:$0xff]   ;;  %v4503_v18 = vcombine.low %v4493_v42, %v4493_v42  ;;  %v6161_v40 = vsel %vm655_vm0, %v4493_v42, %v4532_v26  ;;  %v6190_v42 = vld [vmem:[%s7933_s1 + $0x210] ss:$8 sps:$4 sm:$0xff]  }
  0x91   : > { %1564 = vmatprep.subr.bf16.mxu0 %v6093_v47  ;;  %v6181_v61 = vsel %vm655_vm0, %v4516_v11, %v4541_v30  ;;  %v4526_v11 = vcombine.low %v4518_v55, %v4518_v55  ;;  %v4498_v26 = vld [vmem:[%s5915_s16 + $0x30] sm:$0xf]  ;;  %v6203_v30 = vsel %vm655_vm0, %v4495_v35, %v4533_v49  ;;  %v6234_v49 = vld [vmem:[%s5915_s16 + $0x38] sm:$0xf] }
  0x92   : > { %7936 = vst [vmem:[#allocation8_spill] sm:$0xff] %v6181_v61 }
  0x93   : > { %1677 = vmatpush1.bf16.msra.mxu1 %v5770_v46  ;;  %v6134_v46 = vld [vmem:[%s7933_s1 + $0x230] ss:$8 sps:$4 sm:$0xff]  }
  0x94   : > { %1678 = vmatprep.subr.bf16.mxu1 %v5779_v48  ;;  %1565 = vmatpush1.bf16.msra.mxu0 %v6106_v57  ;;  %v6144_v48 = vld [vmem:[%s7933_s1 + $0x224] ss:$8 sps:$4 sm:$0xff]  }
  0x95   : > { %1405 = vmatmul.mubr.bf16.gmra.mxu0 %v6116_v5  ;;  %1566 = vmatprep.subr.bf16.mxu0 %v6124_v44 }
  0x96   : > { %1508 = vmatmul.mubr.bf16.gmra.mxu1 %v6119_v7  ;;  %1414 = vmatprep.mubr.bf16.mxu0 %v6129_v15 }
  0x97   : > { %1679 = vmatpush1.bf16.msra.mxu1 %v5788_v50  ;;  %1517 = vmatprep.mubr.bf16.mxu1 %v6139_v16  ;;  %v6158_v50 = vsel %vm655_vm0, %v4492_v39, %v4503_v18  ;;  %v6178_v39 = vld [vmem:[%s7933_s1 + $0x214] ss:$8 sps:$4 sm:$0xff]  }
  0x98   : > { %1680 = vmatprep.subr.bf16.mxu1 %v5797_v52  ;;  %1567 = vmatpush1.bf16.msra.mxu0 %v6134_v46  ;;  %v6166_v52 = vld [vmem:[%s7933_s1 + $0x220] ss:$8 sps:$4 sm:$0xff]   ;;  %v4520_v16 = vld [vmem:[%s5915_s16 + $0x74] sm:$0xf] }
  0x99   : > { %1568 = vmatprep.subr.bf16.mxu0 %v6144_v48 }
  0x9b   : > { %1681 = vmatpush1.bf16.msra.mxu1 %v5806_v54  ;;  %v4519_v54 = vld [vmem:[%s5915_s16 + $0x70] sm:$0xf] }
  0x9c   : > { %1682 = vmatprep.subr.bf16.mxu1 %v5815_v56  ;;  %v4504_v56 = vcombine.low %v4495_v35, %v4495_v35  ;;  %1569 = vmatpush1.bf16.msra.mxu0 %v6166_v52  ;;  %v4542_v18 = vcombine.low %v4519_v54, %v4519_v54  ;;  %v4527_v35 = vcombine.low %v4520_v16, %v4520_v16 }
  0x9d   : > { %1415 = vmatmul.mubr.bf16.gmra.mxu0 %v6158_v50  ;;  %1570 = vmatprep.subr.bf16.mxu0 %v6178_v39 }
  0x9e   : > { %1518 = vmatmul.mubr.bf16.gmra.mxu1 %v6161_v40  ;;  %1424 = vmatprep.mubr.bf16.mxu0 %v6172_v59  ;;  %v6200_v28 = vsel %vm655_vm0, %v4494_v3, %v4504_v56  ;;  %v6222_v3 = vsel %vm655_vm0, %v4518_v55, %v4542_v18  ;;  %v4543_v55 = vcombine.low %v4536_v53, %v4536_v53  ;;  %v4499_v56 = vld [vmem:[%s5915_s16 + $0x34] sm:$0xf] }
  0x9f   : > { %1683 = vmatpush1.bf16.msra.mxu1 %v5824_v58  ;;  %1527 = vmatprep.mubr.bf16.mxu1 %v6181_v61  ;;  %v4497_v58 = vld [vmem:[%s5915_s16 + $0x2c] sm:$0xf]  ;;  %v6213_v61 = vsel %vm655_vm0, %v4517_v9, %v4526_v11  ;;  %7937 = vst [vmem:[#allocation9_spill] sm:$0xff] %v6222_v3  ;;  %v4534_v9 = vcombine.low %v4498_v26, %v4498_v26 }
  0xa0   : > { %1684 = vmatprep.subr.bf16.mxu1 %v5833_v60  ;;  %v6209_v60 = vld [vmem:[%s7933_s1 + $0x204] ss:$8 sps:$4 sm:$0xff]   ;;  %1571 = vmatpush1.bf16.msra.mxu0 %v6190_v42  ;;  %v6250_v18 = vsel %vm655_vm0, %v4520_v16, %v4543_v55 }
  0xa1   : > { %1572 = vmatprep.subr.bf16.mxu0 %v6209_v60  ;;  %v6242_v11 = vsel %vm655_vm0, %v4497_v58, %v4534_v9  ;;  %v5203_v9 = vld [vmem:[%s7940_s3 + $0x8] sm:$0xff]   ;;  %v5205_v55 = vld [vmem:[%s7940_s3] sm:$0xff]  }
  0xa3   : > { %1685 = vmatpush1.bf16.msra.mxu1 %v5842_v62  ;;  %v6219_v62 = vld [vmem:[%s7933_s1 + $0x200] ss:$8 sps:$4 sm:$0xff]  }
  0xa4   : > { %1686 = vmatprep.subr.bf16.mxu1 %v5851_v0  ;;  %v4505_v0 = vcombine.low %v4497_v58, %v4497_v58  ;;  %1573 = vmatpush1.bf16.msra.mxu0 %v6219_v62  ;;  %v5441_v58 = vld [vmem:[%s7933_s1 + $0x180] ss:$8 sps:$4 sm:$0xff]  }
  0xa5   : > { %1425 = vmatmul.mubr.bf16.gmra.mxu0 %v6200_v28  ;;  %1773 = vmatprep.subr.bf16.mxu0 %v5711_v33  ;;  %v4535_v33 = vcombine.low %v6234_v49, %v6234_v49 }
  0xa6   : > { %1528 = vmatmul.mubr.bf16.gmra.mxu1 %v6203_v30  ;;  %1434 = vmatprep.mubr.bf16.mxu0 %v6213_v61 }
  0xa7   : > { %1687 = vmatpush2.bf16.msra.mxu1 %v5860_v2  ;;  %1537 = vmatprep.mubr.bf16.mxu1 %v6222_v3  ;;  %v6239_v2 = vsel %vm655_vm0, %v4496_v45, %v4505_v0  ;;  %v5190_v3 = vld [vmem:[%s5915_s16 + $0x7c] ss:$0 sps:$4 sm:$0xff]   ;;  %v5202_v0 = vld [vmem:[%s7940_s3 + $0x64] sm:$0xff]  }
  0xa8   : > { %1688 = vmatprep.subr.bf16.mxu1 %v5869_v4  ;;  %v6247_v4 = vsel %vm655_vm0, %v4519_v54, %v4527_v35  ;;  %v5434_v45 = vld [vmem:[%s7933_s1 + $0x1b4] ss:$8 sps:$4 sm:$0xff]   ;;  %v5437_v54 = vld [vmem:[%s7933_s1 + $0x1a0] ss:$8 sps:$4 sm:$0xff]  }
  0xa9   : > { %v5204_v35 = vld [vmem:[%s7940_s3 + $0x5c] sm:$0xff]  }
  0xab   : > { %1689 = vmatpush2.bf16.msra.mxu1 %v5881_v6  ;;  %v4506_v6 = vcombine.low %v4499_v56, %v4499_v56 }
  0xac   : > { %1690 = vmatprep.subr.bf16.mxu1 %v5890_v8  ;;  %v6260_v8 = vsel %vm655_vm0, %v4536_v53, %v5190_v3  ;;  %v7894_v53 = vmov 0   ;;  %v5201_v3 = vld [vmem:[%s7940_s3 + $0x10] sm:$0xff]  }
  0xad   : > { %1435 = vmatmul.mubr.bf16.gmra.mxu0 %v6239_v2  ;;  %v6266_v16 = vsel %vm655_vm0, %v4498_v26, %v4506_v6  ;;  %v7938_v26 = vld [vmem:[#allocation6_spill] sm:$0xff] }
  0xae   : > { %1538 = vmatmul.mubr.bf16.gmra.mxu1 %v6242_v11  ;;  %1444 = vmatprep.mubr.bf16.mxu0 %v6247_v4 }
  0xaf   : > { %1691 = vmatpush2.bf16.msra.mxu1 %v5900_v10  ;;  %1547 = vmatprep.mubr.bf16.mxu1 %v6250_v18  ;;  %v6269_v10 = vsel %vm655_vm0, %v4499_v56, %v4535_v33  ;;  %v5206_v56 = vld [vmem:[%s7940_s3 + $0x54] sm:$0xff]  }
  0xb0   : > { %1692 = vmatprep.subr.bf16.mxu1 %v5909_v12  ;;  %v5411_v12 = vld [vmem:[%s7933_s1 + $0x170] ss:$8 sps:$4 sm:$0xff]  }
  0xb3   : > { %1693 = vmatpush2.bf16.msra.mxu1 %v5926_v17  ;;  %v5412_v17 = vld [vmem:[%s7933_s1 + $0x164] ss:$8 sps:$4 sm:$0xff]  }
  0xb4   : > { %1694 = vmatprep.subr.bf16.mxu1 %v5937_v21  ;;  %v5413_v21 = vld [vmem:[%s7933_s1 + $0x160] ss:$8 sps:$4 sm:$0xff]  }
  0xb5   : > { %1445 = vmatmul.mubr.bf16.gmra.mxu0 %v6266_v16 }
  0xb6   : > { %1548 = vmatmul.mubr.bf16.gmra.mxu1 %v6269_v10  ;;  %1590 = vmatprep.mubr.bf16.mxu0 %v7894_v53 }
  0xb7   : > { %1695 = vmatpush2.bf16.msra.mxu1 %v5954_v25  ;;  %1702 = vmatprep.mubr.bf16.mxu1 %v6034_v13  ;;  %v5414_v25 = vld [vmem:[%s7933_s1 + $0x154] ss:$8 sps:$4 sm:$0xff]   ;;  %v5424_v13 = vld [vmem:[%s7933_s1 + $0x104] ss:$8 sps:$4 sm:$0xff]  }
  0xb8   : > { %1696 = vmatprep.subr.bf16.mxu1 %v5963_v27  ;;  %v5415_v27 = vld [vmem:[%s7933_s1 + $0x150] ss:$8 sps:$4 sm:$0xff]  }
  0xbb   : > { %1697 = vmatpush2.bf16.msra.mxu1 %v5972_v29  ;;  %v5416_v29 = vld [vmem:[%s7933_s1 + $0x144] ss:$8 sps:$4 sm:$0xff]  }
  0xbc   : > { %1698 = vmatprep.subr.bf16.mxu1 %v5981_v31  ;;  %v5418_v31 = vld [vmem:[%s7933_s1 + $0x134] ss:$8 sps:$4 sm:$0xff]  }
  0xbd   : > { %1591 = vmatmul.mubr.bf16.vlgmr.msra.gmra.mxu0 %v6073_v34 }
  0xbe   : > { %1774 = vmatpush1.bf16.msra.mxu0 %v5411_v12  ;;  %1600 = vmatprep.mubr.bf16.mxu0 %v7894_v53 }
  0xbf   : > { %1699 = vmatpush2.bf16.msra.mxu1 %v5989_v37  ;;  %1775 = vmatprep.subr.bf16.mxu0 %v5412_v17  ;;  %v5419_v37 = vld [vmem:[%s7933_s1 + $0x130] ss:$8 sps:$4 sm:$0xff]  }
  0xc0   : > { %1700 = vmatprep.subr.bf16.mxu1 %v5998_v41  ;;  %v5420_v41 = vld [vmem:[%s7933_s1 + $0x124] ss:$8 sps:$4 sm:$0xff]  }
  0xc2   : > { %1776 = vmatpush1.bf16.msra.mxu0 %v5413_v21  ;;  %v5209_v21 = vld [vmem:[%s7940_s3 + $0x48] sm:$0xff]  }
  0xc3   : > { %1701 = vmatpush2.bf16.msra.mxu1 %v6011_v51  ;;  %1777 = vmatprep.subr.bf16.mxu0 %v5414_v25  ;;  %v5421_v51 = vld [vmem:[%s7933_s1 + $0x120] ss:$8 sps:$4 sm:$0xff]  }
  0xc4   : > { %1876 = vmatprep.subr.bf16.mxu1 %v6022_v63  ;;  %v5422_v63 = vld [vmem:[%s7933_s1 + $0x114] ss:$8 sps:$4 sm:$0xff]  }
  0xc5   : > { %1601 = vmatmul.mubr.bf16.gmra.mxu0 %v6116_v5  ;;  %v5210_v25 = vld [vmem:[%s7940_s3 + $0x9c] sm:$0xff]  }
  0xc6   : > { %1703 = vmatmul.mubr.bf16.vlgmr.msra.gmra.mxu1 %v5943_v23  ;;  %1778 = vmatpush1.bf16.msra.mxu0 %v5415_v27  ;;  %v5417_v23 = vld [vmem:[%s7933_s1 + $0x140] ss:$8 sps:$4 sm:$0xff]  }
  0xc7   : > { %1877 = vmatpush1.bf16.msra.mxu1 %v6027_v1  ;;  %1779 = vmatprep.subr.bf16.mxu0 %v5416_v29  ;;  %v5423_v1 = vld [vmem:[%s7933_s1 + $0x110] ss:$8 sps:$4 sm:$0xff]  }
  0xc8   : > { %1610 = vmatprep.mubr.bf16.mxu0 %v7894_v53  ;;  %1712 = vmatprep.mubr.bf16.mxu1 %v6076_v43  ;;  %v5428_v43 = vld [vmem:[%s7933_s1 + $0x1e4] ss:$8 sps:$4 sm:$0xff]  }
  0xc9   : > { %1878 = vmatprep.subr.bf16.mxu1 %v6039_v14  ;;  %v5425_v14 = vld [vmem:[%s7933_s1 + $0x100] ss:$8 sps:$4 sm:$0xff]  }
  0xca   : > { %1780 = vmatpush1.bf16.msra.mxu0 %v5417_v23 }
  0xcb   : > { %1879 = vmatpush1.bf16.msra.mxu1 %v6052_v20  ;;  %1781 = vmatprep.subr.bf16.mxu0 %v5418_v31  ;;  %v5426_v20 = vld [vmem:[%s7933_s1 + $0x1f4] ss:$8 sps:$4 sm:$0xff]  }
  0xcc   : > { %1880 = vmatprep.subr.bf16.mxu1 %v6061_v32  ;;  %v5427_v32 = vld [vmem:[%s7933_s1 + $0x1f0] ss:$8 sps:$4 sm:$0xff]  }
  0xcd   : > { %1611 = vmatmul.mubr.bf16.gmra.mxu0 %v6158_v50 }
  0xce   : > { %1713 = vmatmul.mubr.bf16.gmra.mxu1 %v6047_v19  ;;  %1782 = vmatpush1.bf16.msra.mxu0 %v5419_v37 }
  0xcf   : > { %1620 = vmatprep.mubr.bf16.mxu0 %v7894_v53  ;;  %1783 = vmatprep.subr.bf16.mxu0 %v5420_v41  ;;  %v5211_v41 = vld [vmem:[%s7940_s3 + $0x40] sm:$0xff]  }
  0xd0   : > { %1722 = vmatprep.mubr.bf16.mxu1 %v6119_v7  ;;  %1881 = vmatpush1.bf16.msra.mxu1 %v6082_v36  ;;  %v5429_v36 = vld [vmem:[%s7933_s1 + $0x1e0] ss:$8 sps:$4 sm:$0xff]   ;;  %v5189_v7 = vld [vmem:[%s5915_s16 + $0x3c] ss:$0 sps:$4 sm:$0xff]  }
  0xd1   : > { %1882 = vmatprep.subr.bf16.mxu1 %v6093_v47  ;;  %v5430_v47 = vld [vmem:[%s7933_s1 + $0x1d4] ss:$8 sps:$4 sm:$0xff]  }
  0xd2   : > { %1784 = vmatpush1.bf16.msra.mxu0 %v5421_v51  ;;  %v5212_v51 = vld [vmem:[%s7940_s3 + $0x94] sm:$0xff]  }
  0xd3   : > { %1785 = vmatprep.subr.bf16.mxu0 %v5422_v63 }
  0xd4   : > { %1883 = vmatpush1.bf16.msra.mxu1 %v6106_v57  ;;  %v5431_v57 = vld [vmem:[%s7933_s1 + $0x1d0] ss:$8 sps:$4 sm:$0xff]  }
  0xd5   : > { %1621 = vmatmul.mubr.bf16.gmra.mxu0 %v6200_v28  ;;  %1884 = vmatprep.subr.bf16.mxu1 %v6124_v44  ;;  %v5432_v44 = vld [vmem:[%s7933_s1 + $0x1c4] ss:$8 sps:$4 sm:$0xff]  }
  0xd6   : > { %1723 = vmatmul.mubr.bf16.gmra.mxu1 %v6088_v38  ;;  %1786 = vmatpush1.bf16.msra.mxu0 %v5423_v1 }
  0xd7   : > { %1630 = vmatprep.mubr.bf16.mxu0 %v7894_v53  ;;  %1787 = vmatprep.subr.bf16.mxu0 %v5424_v13 }
  0xd8   : > { %1732 = vmatprep.mubr.bf16.mxu1 %v6161_v40  ;;  %1885 = vmatpush1.bf16.msra.mxu1 %v6134_v46  ;;  %v5433_v46 = vld [vmem:[%s7933_s1 + $0x1c0] ss:$8 sps:$4 sm:$0xff]   ;;  %v5435_v40 = vld [vmem:[%s7933_s1 + $0x1b0] ss:$8 sps:$4 sm:$0xff]  }
  0xd9   : > { %1886 = vmatprep.subr.bf16.mxu1 %v6144_v48  ;;  %v870_v48 = vsel %vm655_vm0, %v6234_v49, %v5189_v7  ;;  %v5207_v49 = vld [vmem:[%s7940_s3 + $0x50] ss:$0 sps:$4 sm:$0xff]  }
  0xda   : > { %1788 = vmatpush1.bf16.msra.mxu0 %v5425_v14 }
  0xdb   : > { %1789 = vmatprep.subr.bf16.mxu0 %v5426_v20 }
  0xdc   : > { %1887 = vmatpush1.bf16.msra.mxu1 %v6166_v52  ;;  %v5436_v52 = vld [vmem:[%s7933_s1 + $0x1a4] ss:$8 sps:$4 sm:$0xff]  }
  0xdd   : > { %1631 = vmatmul.mubr.bf16.gmra.mxu0 %v6239_v2  ;;  %1888 = vmatprep.subr.bf16.mxu1 %v6178_v39  ;;  %v5438_v39 = vld [vmem:[%s7933_s1 + $0x194] ss:$8 sps:$4 sm:$0xff]  }
  0xde   : > { %1733 = vmatmul.mubr.bf16.gmra.mxu1 %v6129_v15  ;;  %1790 = vmatpush2.bf16.msra.mxu0 %v5427_v32 }
  0xdf   : > { %1640 = vmatprep.mubr.bf16.mxu0 %v7894_v53  ;;  %1791 = vmatprep.subr.bf16.mxu0 %v5428_v43 }
  0xe0   : > { %1742 = vmatprep.mubr.bf16.mxu1 %v6203_v30  ;;  %1889 = vmatpush1.bf16.msra.mxu1 %v6190_v42  ;;  %v5439_v42 = vld [vmem:[%s7933_s1 + $0x190] ss:$8 sps:$4 sm:$0xff]  }
  0xe1   : > { %1890 = vmatprep.subr.bf16.mxu1 %v6209_v60  ;;  %v5198_v30 = vld [vmem:[%s7940_s3 + $0x74] sm:$0xff]  }
  0xe2   : > { %1792 = vmatpush2.bf16.msra.mxu0 %v5429_v36  ;;  %v5199_v60 = vld [vmem:[%s7940_s3 + $0x18] sm:$0xff]  }
  0xe3   : > { %1793 = vmatprep.subr.bf16.mxu0 %v5430_v47 }
  0xe4   : > { %1891 = vmatpush1.bf16.msra.mxu1 %v6219_v62  ;;  %v5200_v62 = vld [vmem:[%s7940_s3 + $0x6c] sm:$0xff]  }
  0xe5   : > { %1641 = vmatmul.mubr.bf16.gmra.mxu0 %v6266_v16  ;;  %2375 = vmatprep.subr.bf16.mxu1 %v7894_v53 }
  0xe6   : > { %1743 = vmatmul.mubr.bf16.gmra.mxu1 %v6172_v59  ;;  %1794 = vmatpush2.bf16.msra.mxu0 %v5431_v57 }
  0xe7   : > { %1650 = vmatprep.mubr.bf16.mxu0 %v7894_v53  ;;  %1795 = vmatprep.subr.bf16.mxu0 %v5432_v44 }
  0xe8   : > { %1752 = vmatprep.mubr.bf16.mxu1 %v6242_v11 }
  0xea   : > { %1796 = vmatpush2.bf16.msra.mxu0 %v5433_v46 }
  0xeb   : > { %1797 = vmatprep.subr.bf16.mxu0 %v5434_v45 }
  0xed   : > { %1651 = vmatmul.mubr.bf16.gmra.mxu0 %v870_v48 }
  0xee   : > { %1753 = vmatmul.mubr.bf16.gmra.mxu1 %v6213_v61  ;;  %1798 = vmatpush2.bf16.msra.mxu0 %v5435_v40 }
  0xef   : > { %1762 = vmatprep.mubr.bf16.mxu1 %v6269_v10  ;;  %1799 = vmatprep.subr.bf16.mxu0 %v5436_v52 }
  0xf0   : > { %1805 = vmatprep.mubr.bf16.mxu0 %v6073_v34  ;;  %v5440_v34 = vld [vmem:[%s7933_s1 + $0x184] ss:$8 sps:$4 sm:$0xff]   ;;  %s4401_s1 = scalar_lea.sflag [#allocation4], %s5876_s29 }
  0xf2   : > { %1800 = vmatpush2.bf16.msra.mxu0 %v5437_v54 }
  0xf3   : > { %1801 = vmatprep.subr.bf16.mxu0 %v5438_v39 }
  0xf6   : > { %1763 = vmatmul.mubr.bf16.gmra.mxu1 %v6247_v4  ;;  %1802 = vmatpush2.bf16.msra.mxu0 %v5439_v42 }
  0xf7   : > { %1908 = vmatprep.mubr.bf16.mxu1 %v7894_v53  ;;  %1803 = vmatprep.subr.bf16.mxu0 %v5440_v34 }
  0xfa   : > { %1804 = vmatpush2.bf16.msra.mxu0 %v5441_v58 }
  0xfb   : > { %2198 = vmatprep.subr.bf16.mxu0 %v7894_v53 }
  0xfd   : > { %1806 = vmatmul.mubr.bf16.vlgmr.msra.gmra.mxu0 %v5946_v24  ;;  %v7939_v24 = vld [vmem:[#allocation7_spill] sm:$0xff] }
  0xfe   : > { %1909 = vmatmul.mubr.bf16.vlgmr.msra.gmra.mxu1 %v6047_v19  ;;  %1815 = vmatprep.mubr.bf16.mxu0 %v6116_v5  ;;  %v5191_v19 = vld [vmem:[%s7940_s3 + $0x38] sm:$0xff]   ;;  %v5193_v5 = vld [vmem:[%s7940_s3 + $0x30] sm:$0xff]  }
  0xff   : > { %1918 = vmatprep.mubr.bf16.mxu1 %v7894_v53  ;;  %2199 = vmatpush1.bf16.msra.mxu0 %v5191_v19 }
 0x100   : > { %2200 = vmatprep.subr.bf16.mxu0 %v7894_v53 }
 0x103   : > { %2201 = vmatpush1.bf16.msra.mxu0 %v5193_v5 }
 0x104   : > { %2202 = vmatprep.subr.bf16.mxu0 %v7894_v53 }
 0x105   : > { %1816 = vmatmul.mubr.bf16.gmra.mxu0 %v6056_v22  ;;  %v5192_v22 = vld [vmem:[%s7940_s3 + $0x8c] sm:$0xff]  }
 0x106   : > { %1919 = vmatmul.mubr.bf16.gmra.mxu1 %v6088_v38  ;;  %1825 = vmatprep.mubr.bf16.mxu0 %v6158_v50  ;;  %v7941_v38 = vld [vmem:[#allocation8_spill] sm:$0xff]  ;;  %v5195_v50 = vld [vmem:[%s7940_s3 + $0x28] sm:$0xff]  }
 0x107   : > { %1928 = vmatprep.mubr.bf16.mxu1 %v7894_v53  ;;  %2376 = vmatpush1.bf16.msra.mxu1 %v5192_v22 }
 0x108   : > { %2377 = vmatprep.subr.bf16.mxu1 %v7894_v53  ;;  %2203 = vmatpush1.bf16.msra.mxu0 %v5195_v50 }
 0x109   : > { %2204 = vmatprep.subr.bf16.mxu0 %v7894_v53 }
 0x10d   : > { %1826 = vmatmul.mubr.bf16.gmra.mxu0 %v7938_v26 }
 0x10e   : > { %1929 = vmatmul.mubr.bf16.gmra.mxu1 %v6129_v15  ;;  %1835 = vmatprep.mubr.bf16.mxu0 %v6200_v28  ;;  %v5194_v15 = vld [vmem:[%s7940_s3 + $0x84] sm:$0xff]  }
 0x10f   : > { %1938 = vmatprep.mubr.bf16.mxu1 %v7894_v53  ;;  %2378 = vmatpush1.bf16.msra.mxu1 %v5194_v15  ;;  %v5197_v28 = vld [vmem:[%s7940_s3 + $0x20] sm:$0xff]  }
 0x110   : > { %2379 = vmatprep.subr.bf16.mxu1 %v7894_v53  ;;  %2205 = vmatpush1.bf16.msra.mxu0 %v5197_v28 }
 0x111   : > { %2206 = vmatprep.subr.bf16.mxu0 %v7894_v53 }
 0x114   : > { %2207 = vmatpush1.bf16.msra.mxu0 %v5199_v60 }
 0x115   : > { %1836 = vmatmul.mubr.bf16.gmra.mxu0 %v7939_v24  ;;  %2208 = vmatprep.subr.bf16.mxu0 %v7894_v53 }
 0x116   : > { %1939 = vmatmul.mubr.bf16.gmra.mxu1 %v6172_v59  ;;  %1845 = vmatprep.mubr.bf16.mxu0 %v6239_v2  ;;  %v5196_v59 = vld [vmem:[%s7940_s3 + $0x7c] sm:$0xff]   ;;  %v5208_v2 = vld [vmem:[%s7940_s3 + $0xa4] ss:$0 sps:$4 sm:$0xff]  }
 0x117   : > { %1948 = vmatprep.mubr.bf16.mxu1 %v7894_v53  ;;  %2380 = vmatpush1.bf16.msra.mxu1 %v5196_v59  ;;  %v2373_v6 = vsel %vm655_vm0, %v5208_v2, 0 }
 0x118   : > { %2381 = vmatprep.subr.bf16.mxu1 %v7894_v53  ;;  %2209 = vmatpush1.bf16.msra.mxu0 %v5201_v3 }
 0x119   : > { %2210 = vmatprep.subr.bf16.mxu0 %v7894_v53 }
 0x11b   : > { %2382 = vmatpush1.bf16.msra.mxu1 %v5198_v30 }
 0x11c   : > { %2383 = vmatprep.subr.bf16.mxu1 %v7894_v53  ;;  %2211 = vmatpush1.bf16.msra.mxu0 %v5203_v9 }
 0x11d   : > { %1846 = vmatmul.mubr.bf16.gmra.mxu0 %v7941_v38  ;;  %2212 = vmatprep.subr.bf16.mxu0 %v7894_v53 }
 0x11e   : > { %1949 = vmatmul.mubr.bf16.gmra.mxu1 %v6213_v61  ;;  %1855 = vmatprep.mubr.bf16.mxu0 %v6266_v16  ;;  %v7942_v61 = vld [vmem:[#allocation9_spill] sm:$0xff] }
 0x11f   : > { %1958 = vmatprep.mubr.bf16.mxu1 %v7894_v53  ;;  %2384 = vmatpush1.bf16.msra.mxu1 %v5200_v62 }
 0x120   : > { %2385 = vmatprep.subr.bf16.mxu1 %v7894_v53  ;;  %2213 = vmatpush1.bf16.msra.mxu0 %v5205_v55 }
 0x121   : > { %2224 = vmatprep.subr.bf16.mxu0 %v7894_v53 }
 0x123   : > { %2386 = vmatpush1.bf16.msra.mxu1 %v5202_v0 }
 0x124   : > { %2387 = vmatprep.subr.bf16.mxu1 %v7894_v53 }
 0x125   : > { %1856 = vmatmul.mubr.bf16.gmra.mxu0 %v7942_v61 }
 0x126   : > { %1959 = vmatmul.mubr.bf16.gmra.mxu1 %v6247_v4  ;;  %1865 = vmatprep.mubr.bf16.mxu0 %v870_v48 }
 0x127   : > { %1968 = vmatprep.mubr.bf16.mxu1 %v7894_v53  ;;  %2388 = vmatpush1.bf16.msra.mxu1 %v5204_v35 }
 0x128   : > { %2389 = vmatprep.subr.bf16.mxu1 %v7894_v53 }
 0x12b   : > { %2390 = vmatpush1.bf16.msra.mxu1 %v5206_v56 }
 0x12c   : > { %2401 = vmatprep.subr.bf16.mxu1 %v7894_v53 }
 0x12d   : > { %1866 = vmatmul.mubr.bf16.gmra.mxu0 %v6250_v18  ;;  %v2196_v18 = vsel %vm655_vm0, %v5207_v49, 0 }
 0x12e   : > { %1969 = vmatmul.mubr.bf16.gmra.mxu1 %v6260_v8  ;;  %2225 = vmatpush2.bf16.msra.mxu0 %v2196_v18 }
 0x12f   : > { %2402 = vmatpush2.bf16.msra.mxu1 %v2373_v6  ;;  %2226 = vmatprep.subr.bf16.mxu0 %v7894_v53 }
 0x130   : > { %2403 = vmatprep.subr.bf16.mxu1 %v7894_v53 }
 0x132   : > { %2227 = vmatpush2.bf16.msra.mxu0 %v5209_v21 }
 0x133   : > { %2404 = vmatpush2.bf16.msra.mxu1 %v5210_v25  ;;  %2228 = vmatprep.subr.bf16.mxu0 %v7894_v53 }
 0x134   : > { %2405 = vmatprep.subr.bf16.mxu1 %v7894_v53 }
 0x136   : > { %2229 = vmatpush2.bf16.msra.mxu0 %v5211_v41 }
 0x137   : > { %2406 = vmatpush2.bf16.msra.mxu1 %v5212_v51 }
 0x145   : > { %v1386_v11 = vpop.f32.mrf.mxu0 }
 0x146   : > { %v1489_v4 = vpop.f32.mrf.mxu1 }
 0x147   : > { %v6521_v33 = vadd.f32 %v1489_v4, %v1386_v11  ;;  %v1388_v8 = vpop.f32.mrf.mxu0 }
 0x148   : > { %v1491_v16 = vpop.f32.mrf.mxu1 }
 0x149   : > { %v6525_v10 = vadd.f32 %v1491_v16, %v1388_v8  ;;  %v1390_v12 = vpop.f32.mrf.mxu0 }
 0x14a   : > { %v1493_v17 = vpop.f32.mrf.mxu1 }
 0x14b   : > { %v6533_v27 = vadd.f32 %v1493_v17, %v1390_v12  ;;  %v6535_v29 = vpop.f32.mrf.mxu0 }
 0x14c   : > { %v6537_v23 = vpop.f32.mrf.mxu1 }
 0x14d   : > { %v1396_v31 = vpop.f32.mrf.mxu0 }
 0x14e   : > { %v1499_v37 = vpop.f32.mrf.mxu1 }
 0x14f   : > { %v6547_v63 = vadd.f32 %v1499_v37, %v1396_v31  ;;  %v1398_v1 = vpop.f32.mrf.mxu0 }
 0x150   : > { %v1501_v13 = vpop.f32.mrf.mxu1 }
 0x151   : > { %v6549_v14 = vadd.f32 %v1501_v13, %v1398_v1  ;;  %v1400_v20 = vpop.f32.mrf.mxu0 }
 0x152   : > { %v1503_v32 = vpop.f32.mrf.mxu1 }
 0x153   : > { %v6551_v43 = vadd.f32 %v1503_v32, %v1400_v20  ;;  %v6553_v36 = vpop.f32.mrf.mxu0 }
 0x154   : > { %v6555_v47 = vpop.f32.mrf.mxu1 }
 0x155   : > { %v1406_v57 = vpop.f32.mrf.mxu0 }
 0x156   : > { %v1509_v7 = vpop.f32.mrf.mxu1 }
 0x157   : > { %v6557_v44 = vadd.f32 %v1509_v7, %v1406_v57  ;;  %v1408_v46 = vpop.f32.mrf.mxu0 }
 0x158   : > { %v1511_v48 = vpop.f32.mrf.mxu1 }
 0x159   : > { %v6559_v45 = vadd.f32 %v1511_v48, %v1408_v46  ;;  %v1410_v40 = vpop.f32.mrf.mxu0 }
 0x15a   : > { %v1513_v52 = vpop.f32.mrf.mxu1 }
 0x15b   : > { %v6561_v54 = vadd.f32 %v1513_v52, %v1410_v40  ;;  %v6563_v39 = vpop.f32.mrf.mxu0  ;;  %v6615_v52 = vld [vmem:[%s7879_s4 + $0x74] ss:$8 sps:$4 sm:$0xff]  }
 0x15c   : > { %v6565_v42 = vpop.f32.mrf.mxu1  ;;  %7955 = vst [vmem:[#allocation18_spill] sm:$0xff] %v6615_v52  ;;  %3008 = vmatprep.subr.bf16.mxu0 %v6615_v52 }
 0x15d   : > { %v1416_v34 = vpop.f32.mrf.mxu0 }
 0x15e   : > { %v1519_v58 = vpop.f32.mrf.mxu1 }
 0x15f   : > { %v6567_v26 = vadd.f32 %v1519_v58, %v1416_v34  ;;  %v1418_v24 = vpop.f32.mrf.mxu0 }
 0x160   : > { %v1521_v19 = vpop.f32.mrf.mxu1 }
 0x161   : > { %v6569_v22 = vadd.f32 %v1521_v19, %v1418_v24  ;;  %v1420_v38 = vpop.f32.mrf.mxu0 }
 0x162   : > { %v1523_v5 = vpop.f32.mrf.mxu1 }
 0x163   : > { %v6571_v15 = vadd.f32 %v1523_v5, %v1420_v38  ;;  %v6573_v50 = vpop.f32.mrf.mxu0 }
 0x164   : > { %v6575_v59 = vpop.f32.mrf.mxu1 }
 0x165   : > { %7943 = vst [vmem:[#allocation6_spill] sm:$0xff] %v6575_v59  ;;  %v1426_v61 = vpop.f32.mrf.mxu0 }
 0x166   : > { %v1529_v28 = vpop.f32.mrf.mxu1 }
 0x167   : > { %v6577_v30 = vadd.f32 %v1529_v28, %v1426_v61  ;;  %v1428_v60 = vpop.f32.mrf.mxu0 }
 0x168   : > { %v1531_v62 = vpop.f32.mrf.mxu1 }
 0x169   : > { %v6579_v3 = vadd.f32 %v1531_v62, %v1428_v60  ;;  %v1430_v0 = vpop.f32.mrf.mxu0 }
 0x16a   : > { %v1533_v9 = vpop.f32.mrf.mxu1 }
 0x16b   : > { %7944 = vst [vmem:[#allocation7_spill] sm:$0xff] %v6579_v3  ;;  %v6581_v35 = vadd.f32 %v1533_v9, %v1430_v0  ;;  %v6583_v55 = vpop.f32.mrf.mxu0 }
 0x16c   : > { %7946 = vst [vmem:[#allocation9_spill] sm:$0xff] %v6583_v55  ;;  %v6585_v56 = vpop.f32.mrf.mxu1 }
 0x16d   : > { %7945 = vst [vmem:[#allocation8_spill] sm:$0xff] %v6581_v35  ;;  %7947 = vst [vmem:[#allocation10_spill] sm:$0xff] %v6585_v56  ;;  %v1436_v49 = vpop.f32.mrf.mxu0 }
 0x16e   : > { %v1539_v2 = vpop.f32.mrf.mxu1 }
 0x16f   : > { %v6587_v11 = vadd.f32 %v1539_v2, %v1436_v49  ;;  %v1438_v4 = vpop.f32.mrf.mxu0 }
 0x170   : > { %v1541_v18 = vpop.f32.mrf.mxu1 }
 0x171   : > { %v6589_v6 = vadd.f32 %v1541_v18, %v1438_v4  ;;  %v1440_v8 = vpop.f32.mrf.mxu0 }
 0x172   : > { %v1543_v16 = vpop.f32.mrf.mxu1 }
 0x173   : > { %7948 = vst [vmem:[#allocation11_spill] sm:$0xff] %v6589_v6  ;;  %v6591_v12 = vadd.f32 %v1543_v16, %v1440_v8  ;;  %v6593_v17 = vpop.f32.mrf.mxu0 }
 0x174   : > { %7950 = vst [vmem:[#allocation13_spill] sm:$0xff] %v6593_v17  ;;  %v6595_v21 = vpop.f32.mrf.mxu1 }
 0x175   : > { %7949 = vst [vmem:[#allocation12_spill] sm:$0xff] %v6591_v12  ;;  %7951 = vst [vmem:[#allocation14_spill] sm:$0xff] %v6595_v21  ;;  %v1446_v25 = vpop.f32.mrf.mxu0 }
 0x176   : > { %v1549_v31 = vpop.f32.mrf.mxu1 }
 0x177   : > { %v6597_v37 = vadd.f32 %v1549_v31, %v1446_v25  ;;  %v1448_v41 = vpop.f32.mrf.mxu0 }
 0x178   : > { %v1551_v51 = vpop.f32.mrf.mxu1 }
 0x179   : > { %v6599_v1 = vadd.f32 %v1551_v51, %v1448_v41  ;;  %v1450_v13 = vpop.f32.mrf.mxu0 }
 0x17a   : > { %v1553_v20 = vpop.f32.mrf.mxu1 }
 0x17b   : > { %7952 = vst [vmem:[#allocation15_spill] sm:$0xff] %v6599_v1  ;;  %v6601_v32 = vadd.f32 %v1553_v20, %v1450_v13  ;;  %v6603_v57 = vpop.f32.mrf.mxu0 }
 0x17c   : > { %7954 = vst [vmem:[#allocation17_spill] sm:$0xff] %v6603_v57  ;;  %v6617_v34 = vpop.f32.mrf.mxu1 }
 0x17d   : > { %7953 = vst [vmem:[#allocation16_spill] sm:$0xff] %v6601_v32  ;;  %v1592_v7 = vpop.f32.mrf.mxu0  ;;  %7956 = vst [vmem:[#allocation19_spill] sm:$0xff] %v6617_v34 }
 0x17e   : > { %v6606_v46 = vadd.f32 %v1592_v7, %v6521_v33  ;;  %v5224_v33 = vld [vmem:[%s7879_s4 + $0x174] ss:$8 sps:$4 sm:$0xff]  }
 0x17f   : > { %v6608_v48 = vpop.f32.mrf.mxu0  ;;  %3069 = vmatprep.subr.bf16.mxu1 %v5224_v33 }
 0x181   : > { %v6610_v40 = vpop.f32.mrf.mxu0 }
 0x183   : > { %v6619_v58 = vpop.f32.mrf.mxu0 }
 0x185   : > { %v1602_v24 = vpop.f32.mrf.mxu0 }
 0x186   : > { %v6625_v19 = vpop.f32.mrf.mxu1  ;;  %v6628_v38 = vadd.f32 %v1602_v24, %v6547_v63 }
 0x187   : > { %v6630_v5 = vpop.f32.mrf.mxu0 }
 0x188   : > { %v6632_v61 = vpop.f32.mrf.mxu1 }
 0x189   : > { %v6634_v28 = vpop.f32.mrf.mxu0 }
 0x18a   : > { %v6636_v60 = vpop.f32.mrf.mxu1 }
 0x18b   : > { %v6638_v62 = vpop.f32.mrf.mxu0 }
 0x18c   : > { %v6640_v0 = vpop.f32.mrf.mxu1 }
 0x18d   : > { %v1612_v9 = vpop.f32.mrf.mxu0 }
 0x18e   : > { %v6642_v49 = vpop.f32.mrf.mxu1  ;;  %v6645_v2 = vadd.f32 %v1612_v9, %v6557_v44 }
 0x18f   : > { %v6647_v63 = vpop.f32.mrf.mxu0 }
 0x190   : > { %v6649_v4 = vpop.f32.mrf.mxu1 }
 0x191   : > { %v6651_v18 = vpop.f32.mrf.mxu0 }
 0x192   : > { %v6653_v8 = vpop.f32.mrf.mxu1 }
 0x193   : > { %v6655_v16 = vpop.f32.mrf.mxu0 }
 0x194   : > { %v6657_v25 = vpop.f32.mrf.mxu1 }
 0x195   : > { %v1622_v31 = vpop.f32.mrf.mxu0 }
 0x196   : > { %v6659_v41 = vpop.f32.mrf.mxu1  ;;  %v6662_v51 = vadd.f32 %v1622_v31, %v6567_v26 }
 0x197   : > { %v6664_v44 = vpop.f32.mrf.mxu0 }
 0x198   : > { %v6666_v13 = vpop.f32.mrf.mxu1 }
 0x199   : > { %v6668_v20 = vpop.f32.mrf.mxu0 }
 0x19a   : > { %v6670_v7 = vpop.f32.mrf.mxu1 }
 0x19b   : > { %v6672_v33 = vpop.f32.mrf.mxu0 }
 0x19c   : > { %7957 = vst [vmem:[#allocation20_spill] sm:$0xff] %v6672_v33  ;;  %v6674_v24 = vpop.f32.mrf.mxu1 }
 0x19d   : > { %v1632_v9 = vpop.f32.mrf.mxu0 }
 0x19e   : > { %v6676_v53 = vpop.f32.mrf.mxu1  ;;  %v6679_v52 = vadd.f32 %v1632_v9, %v6577_v30 }
 0x19f   : > { %v6681_v26 = vpop.f32.mrf.mxu0 }
 0x1a0   : > { %7958 = vst [vmem:[#allocation21_spill] sm:$0xff] %v6679_v52  ;;  %7959 = vst [vmem:[#allocation22_spill] sm:$0xff] %v6681_v26  ;;  %v6683_v31 = vpop.f32.mrf.mxu1  ;;  %v2009_v26 = vlaneseq }
 0x1a1   : > { %v6685_v32 = vpop.f32.mrf.mxu0 }
 0x1a2   : > { %7960 = vst [vmem:[#allocation23_spill] sm:$0xff] %v6685_v32  ;;  %v6687_v34 = vpop.f32.mrf.mxu1 }
 0x1a3   : > { %v6689_v57 = vpop.f32.mrf.mxu0 }
 0x1a4   : > { %7961 = vst [vmem:[#allocation24_spill] sm:$0xff] %v6689_v57  ;;  %v6691_v1 = vpop.f32.mrf.mxu1 }
 0x1a5   : > { %v1642_v12 = vpop.f32.mrf.mxu0 }
 0x1a6   : > { %v6693_v21 = vpop.f32.mrf.mxu1  ;;  %v6696_v17 = vadd.f32 %v1642_v12, %v6587_v11 }
 0x1a7   : > { %7962 = vst [vmem:[#allocation25_spill] sm:$0xff] %v6693_v21  ;;  %v6698_v30 = vpop.f32.mrf.mxu0 }
 0x1a8   : > { %7963 = vst [vmem:[#allocation26_spill] sm:$0xff] %v6696_v17  ;;  %7964 = vst [vmem:[#allocation27_spill] sm:$0xff] %v6698_v30  ;;  %v6700_v9 = vpop.f32.mrf.mxu1 }
 0x1a9   : > { %7965 = vst [vmem:[#allocation28_spill] sm:$0xff] %v6700_v9  ;;  %v6702_v6 = vpop.f32.mrf.mxu0 }
 0x1aa   : > { %7966 = vst [vmem:[#allocation29_spill] sm:$0xff] %v6702_v6  ;;  %v6704_v35 = vpop.f32.mrf.mxu1 }
 0x1ab   : > { %7967 = vst [vmem:[#allocation30_spill] sm:$0xff] %v6704_v35  ;;  %v6706_v32 = vpop.f32.mrf.mxu0 }
 0x1ac   : > { %7968 = vst [vmem:[#allocation31_spill] sm:$0xff] %v6706_v32  ;;  %v6708_v56 = vpop.f32.mrf.mxu1 }
 0x1ad   : > { %7969 = vst [vmem:[#allocation32_spill] sm:$0xff] %v6708_v56  ;;  %v1652_v57 = vpop.f32.mrf.mxu0 }
 0x1ae   : > { %v6710_v55 = vpop.f32.mrf.mxu1  ;;  %v6713_v52 = vadd.f32 %v1652_v57, %v6597_v37 }
 0x1af   : > { %7970 = vst [vmem:[#allocation33_spill] sm:$0xff] %v6710_v55  ;;  %v6719_v17 = vpop.f32.mrf.mxu0  ;;  %v6731_v55 = vshrl.u32 %v2009_v26, 7 }
 0x1b0   : > { %7971 = vst [vmem:[#allocation34_spill] sm:$0xff] %v6713_v52  ;;  %v6715_v11 = vpop.f32.mrf.mxu1  ;;  %7974 = vst [vmem:[#allocation37_spill] sm:$0xff] %v6719_v17 }
 0x1b1   : > { %7972 = vst [vmem:[#allocation35_spill] sm:$0xff] %v6715_v11  ;;  %v6725_v32 = vpop.f32.mrf.mxu0  ;;  %7980 = vst [vmem:[#allocation43_spill] sm:$0xff] %v6731_v55  ;;  %v7897_v17 = vsub.s32 0, %v6731_v55 }
 0x1b2   : > { %v6717_v12 = vpop.f32.mrf.mxu1  ;;  %7977 = vst [vmem:[#allocation40_spill] sm:$0xff] %v6725_v32  ;;  %v2007_v32 = vld [vmem:[%s7983_s2] sm:$0x3]  ;;  %s5508_s2 = smov [#allocation3]  }
 0x1b3   : > { %7973 = vst [vmem:[#allocation36_spill] sm:$0xff] %v6717_v12  ;;  %v6733_v37 = vpop.f32.mrf.mxu0  ;;  %s5447_s3 = sshll.u32 %s5508_s2, 4  ;;  %s5448_s3 = int_to_ptr.vmem [resolvable:$false] %s5447_s3 }
 0x1b4   : > { %v6721_v30 = vpop.f32.mrf.mxu1  ;;  %7981 = vst [vmem:[#allocation44_spill] sm:$0xff] %v6733_v37  ;;  %v6746_v37 = vrot.slane %v2007_v32, %v7897_v17  ;;  %v1597_v17 = vadd.f32 %v6610_v40, %v6533_v27  ;;  %s5449_s23 = scalar_lea.vmem %s5448_s3, 256  ;;  %p5450_p2 = scmp.lt.s32.totalorder %s4415_s20, %s5448_s3 }
 0x1b5   : > { %7975 = vst [vmem:[#allocation38_spill] sm:$0xff] %v6721_v30  ;;  %p5451_p3 = scmp.lt.s32.totalorder %s5449_s23, %s5443_s22 }
 0x1b6   : > { %v6723_v6 = vpop.f32.mrf.mxu1 }
 0x1b7   : > { %7976 = vst [vmem:[#allocation39_spill] sm:$0xff] %v6723_v6  ;;  %p5452_p4 = por %p5451_p3, %p5450_p2 }
 0x1b8   : > { %v6727_v56 = vpop.f32.mrf.mxu1 }
 0x1b9   : > { %7978 = vst [vmem:[#allocation41_spill] sm:$0xff] %v6727_v56  ;;  %p5453_p5 = pnand %p5452_p4, %p5446_p1 }
 0x1ba   : > { %v6729_v3 = vpop.f32.mrf.mxu1 }
 0x1bb   : > { %7979 = vst [vmem:[#allocation42_spill] sm:$0xff] %v6729_v3  ;;  %v1496_v3 = vadd.f32 %v6537_v23, %v6535_v29 }
 0x1bc   : > { %v6735_v57 = vpop.f32.mrf.mxu1 }
 0x1bd   : > { %7982 = vst [vmem:[#allocation45_spill] sm:$0xff] %v6735_v57  ;;  %v1807_v52 = vpop.f32.mrf.mxu0 }
 0x1be   : > { %v1910_v12 = vpop.f32.mrf.mxu1  ;;  %v1808_v30 = vadd.f32 %v1807_v52, %v6625_v19  ;;  %v1595_v52 = vadd.f32 %v6608_v48, %v6525_v10 }
 0x1bf   : > { %v1809_v6 = vpop.f32.mrf.mxu0 }
 0x1c0   : > { %v1912_v56 = vpop.f32.mrf.mxu1  ;;  %v1911_v26 = vadd.f32 %v1910_v12, %v1808_v30  ;;  %v1810_v11 = vadd.f32 %v1809_v6, %v6632_v61  ;;  %v7984_v30 = vsub.s32 1, %v6731_v55  ;;  %v8027_v55 = vld [vmem:[#allocation44_spill] sm:$0xff] }
 0x1c1   : > { %v1811_v57 = vpop.f32.mrf.mxu0 }
 0x1c2   : > { %v1914_v35 = vpop.f32.mrf.mxu1  ;;  %v1979_v19 = vmax.f32 %v6606_v46, %v1911_v26  ;;  %v1913_v9 = vadd.f32 %v1912_v56, %v1810_v11  ;;  %v1812_v33 = vadd.f32 %v1811_v57, %v6636_v60  ;;  %v6756_v6 = vrot.slane %v2007_v32, %v7984_v30 }
 0x1c3   : > { %v1813_v61 = vpop.f32.mrf.mxu0  ;;  %v1599_v60 = vadd.f32 %v6619_v58, %v1496_v3  ;;  %v1605_v58 = vadd.f32 %v6630_v5, %v6549_v14 }
 0x1c4   : > { %v1916_v12 = vpop.f32.mrf.mxu1  ;;  %v1980_v21 = vmax.f32 %v1595_v52, %v1913_v9  ;;  %v1915_v59 = vadd.f32 %v1914_v35, %v1812_v33  ;;  %v1814_v10 = vadd.f32 %v1813_v61, %v6640_v0  ;;  %v2019_v56 = vadd.f32 %v6746_v37, %v1979_v19 }
 0x1c5   : > { %v1817_v46 = vpop.f32.mrf.mxu0 }
 0x1c6   : > { %v1920_v48 = vpop.f32.mrf.mxu1  ;;  %v1981_v29 = vmax.f32 %v1597_v17, %v1915_v59  ;;  %v1917_v23 = vadd.f32 %v1916_v12, %v1814_v10  ;;  %v1818_v32 = vadd.f32 %v1817_v46, %v6642_v49  ;;  %v2020_v26 = vadd.f32 %v6756_v6, %v1980_v21 }
 0x1c7   : > { %v1819_v11 = vpop.f32.mrf.mxu0  ;;  %v2047_v0 = vmax.f32 %v2019_v56, 0.0  ;;  %v1607_v21 = vadd.f32 %v6634_v28, %v6551_v43  ;;  %v1506_v46 = vadd.f32 %v6555_v47, %v6553_v36  ;;  %v6786_v28 = vld [vmem:[%s7879_s4 + $0x170] ss:$8 sps:$4 sm:$0xff]  }
 0x1c8   : > { %v1922_v57 = vpop.f32.mrf.mxu1  ;;  %v2021_v27 = vadd.f32 %v6746_v37, %v1981_v29  ;;  %v1982_v40 = vmax.f32 %v1599_v60, %v1917_v23  ;;  %v1820_v35 = vadd.f32 %v1819_v11, %v6649_v4  ;;  %v1921_v33 = vadd.f32 %v1920_v48, %v1818_v32  ;;  %v6798_v11 = vld [vmem:[%s7879_s4 + $0x164] ss:$8 sps:$4 sm:$0xff]  }
 0x1c9   : > { %v1821_v9 = vpop.f32.mrf.mxu0  ;;  %v2048_v61 = vmax.f32 %v2020_v26, 0.0  ;;  %v1609_v36 = vadd.f32 %v6638_v62, %v1506_v46 }
 0x1ca   : > { %v1924_v52 = vpop.f32.mrf.mxu1  ;;  %v2049_v19 = vmax.f32 %v2021_v27, 0.0  ;;  %v2022_v3 = vadd.f32 %v6756_v6, %v1982_v40  ;;  %v1923_v59 = vadd.f32 %v1922_v57, %v1820_v35  ;;  %v1822_v17 = vadd.f32 %v1821_v9, %v6653_v8 }
 0x1cb   : > { %v1983_v49 = vmax.f32 %v6628_v38, %v1921_v33  ;;  %v1823_v30 = vpop.f32.mrf.mxu0  ;;  %v6781_v38 = vld [vmem:[%s7879_s4 + $0x70] ss:$8 sps:$4 sm:$0xff]   ;;  %v1615_v33 = vadd.f32 %v6647_v63, %v6559_v45  ;;  %v1516_v45 = vadd.f32 %v6565_v42, %v6563_v39  ;;  %v6834_v39 = vld [vmem:[%s7879_s4 + $0x154] ss:$8 sps:$4 sm:$0xff]   ;;  %v1617_v42 = vadd.f32 %v6651_v18, %v6561_v54 }
 0x1cc   : > { %v1926_v4 = vpop.f32.mrf.mxu1  ;;  %v2075_v12 = vpack.c.bf16 %v2049_v19, %v2047_v0  ;;  %v2050_v10 = vmax.f32 %v2022_v3, 0.0  ;;  %v1925_v56 = vadd.f32 %v1924_v52, %v1822_v17  ;;  %v1984_v48 = vmax.f32 %v1605_v58, %v1923_v59  ;;  %v6818_v3 = vld [vmem:[%s7879_s4 + $0x160] ss:$8 sps:$4 sm:$0xff]  }
 0x1cd   : > { %v1824_v8 = vadd.f32 %v1823_v30, %v6657_v25  ;;  %v1827_v60 = vpop.f32.mrf.mxu0  ;;  %v2023_v47 = vadd.f32 %v6746_v37, %v1983_v49  ;;  %v1619_v46 = vadd.f32 %v6655_v16, %v1516_v45  ;;  %v6853_v16 = vld [vmem:[%s7879_s4 + $0x150] ss:$8 sps:$4 sm:$0xff]  }
 0x1ce   : > { %v1930_v29 = vpop.f32.mrf.mxu1  ;;  %v2076_v14 = vpack.c.bf16 %v2050_v10, %v2048_v61  ;;  %v1985_v5 = vmax.f32 %v1607_v21, %v1925_v56  ;;  %v1828_v43 = vadd.f32 %v1827_v60, %v6659_v41  ;;  %v6793_v41 = vld [vmem:[%s7879_s4 + $0x64] ss:$8 sps:$4 sm:$0xff]   ;;  %v2024_v27 = vadd.f32 %v6756_v6, %v1984_v48  ;;  %v6828_v21 = vld [vmem:[%s7879_s4 + $0x54] ss:$8 sps:$4 sm:$0xff]  }
 0x1cf   : > { %v1927_v25 = vadd.f32 %v1926_v4, %v1824_v8  ;;  %v1829_v23 = vpop.f32.mrf.mxu0  ;;  %v2051_v63 = vmax.f32 %v2023_v47, 0.0  ;;  %v6862_v47 = vld [vmem:[%s7879_s4 + $0x44] ss:$8 sps:$4 sm:$0xff]  }
 0x1d0   : > { %v1932_v32 = vpop.f32.mrf.mxu1  ;;  %v2025_v57 = vadd.f32 %v6746_v37, %v1985_v5  ;;  %v1931_v26 = vadd.f32 %v1930_v29, %v1828_v43  ;;  %v1830_v62 = vadd.f32 %v1829_v23, %v6666_v13  ;;  %4639 = vmatprep.mubr.msk.bf16.mxu0 %vm2173_vm1, %v2076_v14  ;;  %4678 = vmatprep.mubr.msk.bf16.mxu1 %vm2173_vm1, %v2076_v14  ;;  %v6812_v13 = vld [vmem:[%s7879_s4 + $0x60] ss:$8 sps:$4 sm:$0xff]   ;;  %v2052_v4 = vmax.f32 %v2024_v27, 0.0  ;;  %v6847_v14 = vld [vmem:[%s7879_s4 + $0x50] ss:$8 sps:$4 sm:$0xff]  }
 0x1d1   : > { %v1986_v40 = vmax.f32 %v1609_v36, %v1927_v25  ;;  %v1831_v35 = vpop.f32.mrf.mxu0  ;;  %2231 = vmatmul.mubr.bf16.vlgmr.msra.gmra.mxu0 %v2075_v12  ;;  %2408 = vmatmul.mubr.bf16.vlgmr.msra.gmra.mxu1 %v2075_v12  ;;  %v6867_v25 = vld [vmem:[%s7879_s4 + $0x144] ss:$8 sps:$4 sm:$0xff]  }
 0x1d2   : > { %v1934_v0 = vpop.f32.mrf.mxu1  ;;  %v2053_v9 = vmax.f32 %v2025_v57, 0.0  ;;  %v1933_v52 = vadd.f32 %v1932_v32, %v1830_v62  ;;  %v1832_v19 = vadd.f32 %v1831_v35, %v6670_v7  ;;  %3009 = vmatpush1.bf16.msra.mxu0 %v6781_v38  ;;  %3070 = vmatpush1.bf16.msra.mxu1 %v6786_v28  ;;  %v1987_v59 = vmax.f32 %v6645_v2, %v1931_v26 }
 0x1d3   : > { %v2026_v7 = vadd.f32 %v6756_v6, %v1986_v40  ;;  %v1833_v17 = vpop.f32.mrf.mxu0  ;;  %3010 = vmatprep.subr.bf16.mxu0 %v6793_v41  ;;  %3071 = vmatprep.subr.bf16.mxu1 %v6798_v11  ;;  %v1625_v40 = vadd.f32 %v6664_v44, %v6569_v22  ;;  %v1627_v35 = vadd.f32 %v6668_v20, %v6571_v15  ;;  %v6888_v22 = vld [vmem:[%s7879_s4 + $0x140] ss:$8 sps:$4 sm:$0xff]  }
 0x1d4   : > { %v1936_v58 = vpop.f32.mrf.mxu1  ;;  %v1988_v2 = vmax.f32 %v1615_v33, %v1933_v52  ;;  %v1935_v49 = vadd.f32 %v1934_v0, %v1832_v19  ;;  %v1834_v30 = vadd.f32 %v1833_v17, %v6674_v24  ;;  %v2077_v56 = vpack.c.bf16 %v2053_v9, %v2051_v63  ;;  %v7985_v19 = vld [vmem:[#allocation6_spill] sm:$0xff] }
 0x1d5   : > { %v2054_v61 = vmax.f32 %v2026_v7, 0.0  ;;  %v1837_v12 = vpop.f32.mrf.mxu0  ;;  %v2027_v54 = vadd.f32 %v6746_v37, %v1987_v59  ;;  %v1526_v45 = vadd.f32 %v7985_v19, %v6573_v50 }
 0x1d6   : > { %v1940_v10 = vpop.f32.mrf.mxu1  ;;  %v1989_v48 = vmax.f32 %v1617_v42, %v1935_v49  ;;  %v1937_v8 = vadd.f32 %v1936_v58, %v1834_v30  ;;  %3011 = vmatpush1.bf16.msra.mxu0 %v6812_v13  ;;  %3072 = vmatpush1.bf16.msra.mxu1 %v6818_v3  ;;  %v1838_v18 = vadd.f32 %v1837_v12, %v6676_v53  ;;  %v6898_v58 = vld [vmem:[%s7879_s4 + $0x34] ss:$8 sps:$4 sm:$0xff]   ;;  %v7986_v49 = vld [vmem:[#allocation25_spill] sm:$0xff] }
 0x1d7   : > { %v2078_v60 = vpack.c.bf16 %v2054_v61, %v2052_v4  ;;  %v1839_v29 = vpop.f32.mrf.mxu0  ;;  %3012 = vmatprep.subr.bf16.mxu0 %v6828_v21  ;;  %3073 = vmatprep.subr.bf16.mxu1 %v6834_v39  ;;  %v2028_v5 = vadd.f32 %v6756_v6, %v1988_v2  ;;  %v2055_v0 = vmax.f32 %v2027_v54, 0.0  ;;  %v7987_v4 = vld [vmem:[#allocation20_spill] sm:$0xff] }
 0x1d8   : > { %v1942_v24 = vpop.f32.mrf.mxu1  ;;  %v2029_v53 = vadd.f32 %v6746_v37, %v1989_v48  ;;  %v1990_v43 = vmax.f32 %v1619_v46, %v1937_v8  ;;  %v1840_v36 = vadd.f32 %v1839_v29, %v6683_v31  ;;  %v1941_v23 = vadd.f32 %v1940_v10, %v1838_v18  ;;  %v6912_v46 = vld [vmem:[%s7879_s4 + $0x30] ss:$8 sps:$4 sm:$0xff]   ;;  %v6927_v29 = vld [vmem:[%s7879_s4 + $0x24] ss:$8 sps:$4 sm:$0xff]  }
 0x1d9   : > { %4640 = vmatprep.mubr.msk.bf16.mxu0 %vm2173_vm1, %v2078_v60  ;;  %4679 = vmatprep.mubr.msk.bf16.mxu1 %vm2173_vm1, %v2078_v60  ;;  %v1841_v32 = vpop.f32.mrf.mxu0  ;;  %v2056_v15 = vmax.f32 %v2028_v5, 0.0  ;;  %v1629_v50 = vadd.f32 %v7987_v4, %v1526_v45  ;;  %v6918_v48 = vld [vmem:[%s7879_s4 + $0x130] ss:$8 sps:$4 sm:$0xff]   ;;  %v7988_v60 = vld [vmem:[#allocation28_spill] sm:$0xff] }
 0x1da   : > { %v1944_v57 = vpop.f32.mrf.mxu1  ;;  %v2057_v26 = vmax.f32 %v2029_v53, 0.0  ;;  %v2030_v31 = vadd.f32 %v6756_v6, %v1990_v43  ;;  %v1842_v62 = vadd.f32 %v1841_v32, %v6687_v34  ;;  %v1943_v27 = vadd.f32 %v1942_v24, %v1840_v36  ;;  %2239 = vmatmul.mubr.bf16.gmra.mxu0 %v2077_v56  ;;  %2416 = vmatmul.mubr.bf16.gmra.mxu1 %v2077_v56  ;;  %v6882_v34 = vld [vmem:[%s7879_s4 + $0x40] ss:$8 sps:$4 sm:$0xff]   ;;  %v6935_v36 = vld [vmem:[%s7879_s4 + $0x124] ss:$8 sps:$4 sm:$0xff]   ;;  %v7989_v32 = vld [vmem:[#allocation30_spill] sm:$0xff] }
 0x1db   : > { %v1991_v33 = vmax.f32 %v6662_v51, %v1941_v23  ;;  %v1843_v9 = vpop.f32.mrf.mxu0  ;;  %3013 = vmatpush1.bf16.msra.mxu0 %v6847_v14  ;;  %3074 = vmatpush1.bf16.msra.mxu1 %v6853_v16  ;;  %v7995_v45 = vld [vmem:[#allocation8_spill] sm:$0xff] }
 0x1dc   : > { %v1946_v52 = vpop.f32.mrf.mxu1  ;;  %v2058_v44 = vmax.f32 %v2030_v31, 0.0  ;;  %v1844_v51 = vadd.f32 %v1843_v9, %v6691_v1  ;;  %v1945_v20 = vadd.f32 %v1944_v57, %v1842_v62  ;;  %3014 = vmatprep.subr.bf16.mxu0 %v6862_v47  ;;  %3075 = vmatprep.subr.bf16.mxu1 %v6867_v25  ;;  %v1992_v63 = vmax.f32 %v1625_v40, %v1943_v27  ;;  %v6903_v1 = vld [vmem:[%s7879_s4 + $0x134] ss:$8 sps:$4 sm:$0xff]  }
 0x1dd   : > { %v1847_v7 = vpop.f32.mrf.mxu0  ;;  %v2079_v17 = vpack.c.bf16 %v2057_v26, %v2055_v0  ;;  %v2031_v61 = vadd.f32 %v6746_v37, %v1991_v33  ;;  %v7990_v31 = vld [vmem:[#allocation7_spill] sm:$0xff]  ;;  %v7991_v62 = vld [vmem:[#allocation22_spill] sm:$0xff]  ;;  %v7992_v0 = vld [vmem:[#allocation21_spill] sm:$0xff] }
 0x1de   : > { %v1950_v59 = vpop.f32.mrf.mxu1  ;;  %v2080_v42 = vpack.c.bf16 %v2058_v44, %v2056_v15  ;;  %v1993_v2 = vmax.f32 %v1627_v35, %v1945_v20  ;;  %v1848_v30 = vadd.f32 %v1847_v7, %v7986_v49  ;;  %v1947_v12 = vadd.f32 %v1946_v52, %v1844_v51  ;;  %v6946_v15 = vld [vmem:[%s7879_s4 + $0x20] ss:$8 sps:$4 sm:$0xff]   ;;  %v7994_v20 = vld [vmem:[#allocation10_spill] sm:$0xff] }
 0x1df   : > { %v1849_v10 = vpop.f32.mrf.mxu0  ;;  %3015 = vmatpush1.bf16.msra.mxu0 %v6882_v34  ;;  %3076 = vmatpush1.bf16.msra.mxu1 %v6888_v22  ;;  %v2032_v24 = vadd.f32 %v6756_v6, %v1992_v63  ;;  %v1635_v27 = vadd.f32 %v7991_v62, %v7990_v31  ;;  %v2059_v40 = vmax.f32 %v2031_v61, 0.0  ;;  %v6952_v44 = vld [vmem:[%s7879_s4 + $0x120] ss:$8 sps:$4 sm:$0xff]   ;;  %v7996_v63 = vld [vmem:[#allocation23_spill] sm:$0xff] }
 0x1e0   : > { %v1952_v56 = vpop.f32.mrf.mxu1  ;;  %v2033_v8 = vadd.f32 %v6746_v37, %v1993_v2  ;;  %v1850_v54 = vadd.f32 %v1849_v10, %v7988_v60  ;;  %v1951_v18 = vadd.f32 %v1950_v59, %v1848_v30  ;;  %4641 = vmatprep.mubr.msk.bf16.mxu0 %vm2173_vm1, %v2080_v42  ;;  %4680 = vmatprep.mubr.msk.bf16.mxu1 %vm2173_vm1, %v2080_v42  ;;  %v7993_v51 = vld [vmem:[#allocation9_spill] sm:$0xff]  ;;  %v7997_v59 = vld [vmem:[#allocation32_spill] sm:$0xff]  ;;  %v6963_v2 = vld [vmem:[%s7879_s4 + $0x14] ss:$8 sps:$4 sm:$0xff]  }
 0x1e1   : > { %v1994_v5 = vmax.f32 %v1629_v50, %v1947_v12  ;;  %v1851_v53 = vpop.f32.mrf.mxu0  ;;  %3016 = vmatprep.subr.bf16.mxu0 %v6898_v58  ;;  %3077 = vmatprep.subr.bf16.mxu1 %v6903_v1  ;;  %v1536_v19 = vadd.f32 %v7994_v20, %v7993_v51  ;;  %v1637_v7 = vadd.f32 %v7996_v63, %v7995_v45  ;;  %v6968_v49 = vld [vmem:[%s7879_s4 + $0x114] ss:$8 sps:$4 sm:$0xff]   ;;  %v2060_v30 = vmax.f32 %v2032_v24, 0.0  ;;  %v6978_v24 = vld [vmem:[%s7879_s4 + $0x10] ss:$8 sps:$4 sm:$0xff]   ;;  %v8001_v20 = vld [vmem:[#allocation36_spill] sm:$0xff] }
 0x1e2   : > { %v1954_v43 = vpop.f32.mrf.mxu1  ;;  %v2061_v23 = vmax.f32 %v2033_v8, 0.0  ;;  %v1852_v57 = vadd.f32 %v1851_v53, %v7989_v32  ;;  %v1953_v26 = vadd.f32 %v1952_v56, %v1850_v54  ;;  %2247 = vmatmul.mubr.bf16.gmra.mxu0 %v2079_v17  ;;  %2424 = vmatmul.mubr.bf16.gmra.mxu1 %v2079_v17  ;;  %v1995_v33 = vmax.f32 %v7992_v0, %v1951_v18  ;;  %v7998_v56 = vld [vmem:[#allocation24_spill] sm:$0xff]  ;;  %v7999_v54 = vld [vmem:[#allocation33_spill] sm:$0xff]  ;;  %v8000_v31 = vld [vmem:[#allocation35_spill] sm:$0xff] }
 0x1e3   : > { %v2034_v35 = vadd.f32 %v6756_v6, %v1994_v5  ;;  %v1853_v9 = vpop.f32.mrf.mxu0  ;;  %3017 = vmatpush1.bf16.msra.mxu0 %v6912_v46  ;;  %3078 = vmatpush1.bf16.msra.mxu1 %v6918_v48  ;;  %v1639_v8 = vadd.f32 %v7998_v56, %v1536_v19  ;;  %v8002_v63 = vld [vmem:[#allocation11_spill] sm:$0xff]  ;;  %v8006_v56 = vld [vmem:[#allocation13_spill] sm:$0xff] }
 0x1e4   : > { %v1956_v52 = vpop.f32.mrf.mxu1  ;;  %v1854_v17 = vadd.f32 %v1853_v9, %v7997_v59  ;;  %v1955_v42 = vadd.f32 %v1954_v43, %v1852_v57  ;;  %3018 = vmatprep.subr.bf16.mxu0 %v6927_v29  ;;  %v1996_v50 = vmax.f32 %v1635_v27, %v1953_v26  ;;  %v2081_v10 = vpack.c.bf16 %v2061_v23, %v2059_v40  ;;  %v6984_v23 = vld [vmem:[%s7879_s4 + $0x110] ss:$8 sps:$4 sm:$0xff]   ;;  %v6992_v40 = vld [vmem:[%s7879_s4 + $0x4] ss:$8 sps:$4 sm:$0xff]  }
 0x1e5   : > { %v2062_v4 = vmax.f32 %v2034_v35, 0.0  ;;  %v1857_v61 = vpop.f32.mrf.mxu0  ;;  %3079 = vmatprep.subr.bf16.mxu1 %v6935_v36  ;;  %v2035_v53 = vadd.f32 %v6746_v37, %v1995_v33 }
 0x1e6   : > { %v1960_v12 = vpop.f32.mrf.mxu1  ;;  %v1997_v60 = vmax.f32 %v1637_v7, %v1955_v42  ;;  %v1858_v18 = vadd.f32 %v1857_v61, %v7999_v54  ;;  %v1957_v43 = vadd.f32 %v1956_v52, %v1854_v17  ;;  %v2036_v35 = vadd.f32 %v6756_v6, %v1996_v50  ;;  %v7001_v52 = vld [vmem:[%s7879_s4 + $0x104] ss:$8 sps:$4 sm:$0xff]   ;;  %v8003_v7 = vld [vmem:[#allocation27_spill] sm:$0xff] }
 0x1e7   : > { %v2082_v5 = vpack.c.bf16 %v2062_v4, %v2060_v30  ;;  %v1859_v32 = vpop.f32.mrf.mxu0  ;;  %3019 = vmatpush1.bf16.msra.mxu0 %v6946_v15  ;;  %3080 = vmatpush1.bf16.msra.mxu1 %v6952_v44  ;;  %v1645_v59 = vadd.f32 %v8003_v7, %v8002_v63  ;;  %v2063_v17 = vmax.f32 %v2035_v53, 0.0  ;;  %v8004_v30 = vld [vmem:[#allocation26_spill] sm:$0xff]  ;;  %v8008_v54 = vld [vmem:[#allocation12_spill] sm:$0xff]  ;;  %v8013_v7 = vld [vmem:[#allocation39_spill] sm:$0xff] }
 0x1e8   : > { %v1962_v57 = vpop.f32.mrf.mxu1  ;;  %v2037_v26 = vadd.f32 %v6746_v37, %v1997_v60  ;;  %v1860_v62 = vadd.f32 %v1859_v32, %v8000_v31  ;;  %v1961_v27 = vadd.f32 %v1960_v12, %v1858_v18  ;;  %3020 = vmatprep.subr.bf16.mxu0 %v6963_v2  ;;  %3081 = vmatprep.subr.bf16.mxu1 %v6968_v49  ;;  %v7012_v12 = vld [vmem:[%s7879_s4] ss:$8 sps:$4 sm:$0xff]   ;;  %v8010_v53 = vld [vmem:[#allocation38_spill] sm:$0xff]  ;;  %v2064_v31 = vmax.f32 %v2036_v35, 0.0 }
 0x1e9   : > { %v1998_v0 = vmax.f32 %v1639_v8, %v1957_v43  ;;  %4642 = vmatprep.mubr.msk.bf16.mxu0 %vm2173_vm1, %v2082_v5  ;;  %4681 = vmatprep.mubr.msk.bf16.mxu1 %vm2173_vm1, %v2082_v5  ;;  %v1861_v33 = vpop.f32.mrf.mxu0  ;;  %v8007_v8 = vld [vmem:[#allocation14_spill] sm:$0xff]  ;;  %v8009_v18 = vld [vmem:[#allocation29_spill] sm:$0xff] }
 0x1ea   : > { %v1964_v9 = vpop.f32.mrf.mxu1  ;;  %v2065_v51 = vmax.f32 %v2037_v26, 0.0  ;;  %v1862_v19 = vadd.f32 %v1861_v33, %v8001_v20  ;;  %v1963_v45 = vadd.f32 %v1962_v57, %v1860_v62  ;;  %2255 = vmatmul.mubr.bf16.gmra.mxu0 %v2081_v10  ;;  %2432 = vmatmul.mubr.bf16.gmra.mxu1 %v2081_v10  ;;  %v1999_v4 = vmax.f32 %v8004_v30, %v1961_v27  ;;  %v7018_v10 = vld [vmem:[%s7879_s4 + $0x100] ss:$8 sps:$4 sm:$0xff]   ;;  %v7029_v57 = vld [vmem:[%s7879_s4 + $0xf4] ss:$8 sps:$4 sm:$0xff]  }
 0x1eb   : > { %v2038_v42 = vadd.f32 %v6756_v6, %v1998_v0  ;;  %v1863_v50 = vpop.f32.mrf.mxu0  ;;  %3021 = vmatpush1.bf16.msra.mxu0 %v6978_v24  ;;  %3082 = vmatpush1.bf16.msra.mxu1 %v6984_v23  ;;  %8005 = vst [vmem:[#allocation6_spill] sm:$0xff] %v7018_v10  ;;  %v1546_v60 = vadd.f32 %v8007_v8, %v8006_v56  ;;  %v7034_v26 = vld [vmem:[%s7879_s4 + $0x1f4] ss:$8 sps:$4 sm:$0xff]   ;;  %v7044_v35 = vld [vmem:[%s7879_s4 + $0xf0] ss:$8 sps:$4 sm:$0xff]  }
 0x1ec   : > { %v1966_v61 = vpop.f32.mrf.mxu1  ;;  %v1647_v5 = vadd.f32 %v8009_v18, %v8008_v54  ;;  %v1864_v43 = vadd.f32 %v1863_v50, %v8010_v53  ;;  %v1965_v32 = vadd.f32 %v1964_v9, %v1862_v19  ;;  %3022 = vmatprep.subr.bf16.mxu0 %v6992_v40  ;;  %8011 = vst [vmem:[#allocation25_spill] sm:$0xff] %v7034_v26  ;;  %v8012_v9 = vld [vmem:[#allocation31_spill] sm:$0xff] }
 0x1ed   : > { %v2066_v62 = vmax.f32 %v2038_v42, 0.0  ;;  %v2000_v27 = vmax.f32 %v1645_v59, %v1963_v45  ;;  %v1867_v0 = vpop.f32.mrf.mxu0  ;;  %v2083_v20 = vpack.c.bf16 %v2065_v51, %v2063_v17  ;;  %3083 = vmatprep.subr.bf16.mxu1 %v7001_v52  ;;  %v1649_v19 = vadd.f32 %v8012_v9, %v1546_v60  ;;  %v7050_v51 = vld [vmem:[%s7879_s4 + $0x1f0] ss:$8 sps:$4 sm:$0xff]   ;;  %v8015_v59 = vld [vmem:[#allocation41_spill] sm:$0xff] }
 0x1ee   : > { %v1970_v33 = vpop.f32.mrf.mxu1  ;;  %v2001_v63 = vmax.f32 %v1647_v5, %v1965_v32  ;;  %v1868_v30 = vadd.f32 %v1867_v0, %v8013_v7  ;;  %v2039_v56 = vadd.f32 %v6746_v37, %v1999_v4  ;;  %v1967_v8 = vadd.f32 %v1966_v61, %v1864_v43  ;;  %8014 = vst [vmem:[#allocation20_spill] sm:$0xff] %v7050_v51  ;;  %v7058_v4 = vld [vmem:[%s7879_s4 + $0xe4] ss:$8 sps:$4 sm:$0xff]   ;;  %v8016_v61 = vld [vmem:[#allocation15_spill] sm:$0xff] }
 0x1ef   : > { %v2084_v50 = vpack.c.bf16 %v2066_v62, %v2064_v31  ;;  %v1869_v54 = vpop.f32.mrf.mxu0  ;;  %3023 = vmatpush1.bf16.msra.mxu0 %v7012_v12  ;;  %3084 = vmatpush1.bf16.msra.mxu1 %v7018_v10  ;;  %v8017_v60 = vld [vmem:[#allocation37_spill] sm:$0xff]  ;;  %v2040_v53 = vadd.f32 %v6756_v6, %v2000_v27 }
 0x1f0   : > { %v1972_v18 = vpop.f32.mrf.mxu1  ;;  %v2041_v45 = vadd.f32 %v6746_v37, %v2001_v63  ;;  %v1870_v17 = vadd.f32 %v1869_v54, %v8015_v59  ;;  %v1971_v42 = vadd.f32 %v1970_v33, %v1868_v30  ;;  %3024 = vmatprep.subr.bf16.mxu0 %v7029_v57  ;;  %3085 = vmatprep.subr.bf16.mxu1 %v7034_v26  ;;  %v7069_v62 = vld [vmem:[%s7879_s4 + $0x1e4] ss:$8 sps:$4 sm:$0xff]   ;;  %v8019_v33 = vld [vmem:[#allocation34_spill] sm:$0xff]  ;;  %v2067_v54 = vmax.f32 %v2039_v56, 0.0 }
 0x1f1   : > { %v1655_v5 = vadd.f32 %v8017_v60, %v8016_v61  ;;  %v2002_v43 = vmax.f32 %v1649_v19, %v1967_v8  ;;  %4643 = vmatprep.mubr.msk.bf16.mxu0 %vm2173_vm1, %v2084_v50  ;;  %4682 = vmatprep.mubr.msk.bf16.mxu1 %vm2173_vm1, %v2084_v50  ;;  %v1871_v32 = vpop.f32.mrf.mxu0  ;;  %8018 = vst [vmem:[#allocation28_spill] sm:$0xff] %v7069_v62  ;;  %v8020_v63 = vld [vmem:[#allocation42_spill] sm:$0xff]  ;;  %v8021_v27 = vld [vmem:[#allocation17_spill] sm:$0xff]  ;;  %v8022_v19 = vld [vmem:[#allocation19_spill] sm:$0xff] }
 0x1f2   : > { %v1974_v31 = vpop.f32.mrf.mxu1  ;;  %v2069_v0 = vmax.f32 %v2041_v45, 0.0  ;;  %v2003_v9 = vmax.f32 %v8019_v33, %v1971_v42  ;;  %v1872_v7 = vadd.f32 %v1871_v32, %v8020_v63  ;;  %v1973_v30 = vadd.f32 %v1972_v18, %v1870_v17  ;;  %2263 = vmatmul.mubr.bf16.gmra.mxu0 %v2083_v20  ;;  %2440 = vmatmul.mubr.bf16.gmra.mxu1 %v2083_v20  ;;  %v7080_v45 = vld [vmem:[%s7879_s4 + $0xe0] ss:$8 sps:$4 sm:$0xff]   ;;  %v7095_v33 = vld [vmem:[%s7879_s4 + $0xd4] ss:$8 sps:$4 sm:$0xff]  }
 0x1f3   : > { %v1556_v8 = vadd.f32 %v8022_v19, %v8021_v27  ;;  %v2042_v50 = vadd.f32 %v6756_v6, %v2002_v43  ;;  %v1873_v59 = vpop.f32.mrf.mxu0  ;;  %3025 = vmatpush2.bf16.msra.mxu0 %v7044_v35  ;;  %3086 = vmatpush2.bf16.msra.mxu1 %v7050_v51  ;;  %v7086_v20 = vld [vmem:[%s7879_s4 + $0x1e0] ss:$8 sps:$4 sm:$0xff]   ;;  %v2068_v63 = vmax.f32 %v2040_v53, 0.0 }
 0x1f4   : > { %v1976_v61 = vpop.f32.mrf.mxu1  ;;  %8023 = vst [vmem:[#allocation30_spill] sm:$0xff] %v7086_v20  ;;  %v8024_v18 = vld [vmem:[#allocation16_spill] sm:$0xff]  ;;  %v2004_v42 = vmax.f32 %v1655_v5, %v1973_v30  ;;  %v8026_v60 = vld [vmem:[#allocation45_spill] sm:$0xff]  ;;  %v1975_v32 = vadd.f32 %v1974_v31, %v1872_v7  ;;  %3026 = vmatprep.subr.bf16.mxu0 %v7058_v4  ;;  %v2085_v19 = vpack.c.bf16 %v2069_v0, %v2067_v54  ;;  %v7104_v31 = vld [vmem:[%s7879_s4 + $0xd0] ss:$8 sps:$4 sm:$0xff]  }
 0x1f5   : > { %v8025_v56 = vld [vmem:[#allocation40_spill] sm:$0xff]  ;;  %v1874_v43 = vadd.f32 %v1873_v59, %v8026_v60  ;;  %v2070_v27 = vmax.f32 %v2042_v50, 0.0  ;;  %3087 = vmatprep.subr.bf16.mxu1 %v7069_v62  ;;  %v1659_v51 = vadd.f32 %v8027_v55, %v1556_v8  ;;  %v7146_v60 = vld [vmem:[%s7879_s4 + $0x1d4] ss:$8 sps:$4 sm:$0xff]  }
 0x1f6   : > { %v1657_v17 = vadd.f32 %v8025_v56, %v8024_v18  ;;  %v2043_v18 = vadd.f32 %v6746_v37, %v2003_v9  ;;  %v2044_v53 = vadd.f32 %v6756_v6, %v2004_v42  ;;  %v7113_v55 = vld [vmem:[%s7879_s4 + $0xc4] ss:$8 sps:$4 sm:$0xff]   ;;  %v7141_v42 = vld [vmem:[%s7879_s4 + $0x1d0] ss:$8 sps:$4 sm:$0xff]   ;;  %8029 = vst [vmem:[#allocation22_spill] sm:$0xff] %v7146_v60 }
 0x1f7   : > { %v1977_v30 = vadd.f32 %v1976_v61, %v1874_v43  ;;  %v2086_v59 = vpack.c.bf16 %v2070_v27, %v2068_v63  ;;  %3027 = vmatpush2.bf16.msra.mxu0 %v7080_v45  ;;  %3088 = vmatpush2.bf16.msra.mxu1 %v7086_v20  ;;  %8028 = vst [vmem:[#allocation7_spill] sm:$0xff] %v7141_v42  ;;  %v7155_v43 = vld [vmem:[%s7879_s4 + $0xa4] ss:$8 sps:$4 sm:$0xff]   ;;  %v7165_v63 = vld [vmem:[%s7879_s4 + $0xa0] ss:$8 sps:$4 sm:$0xff]  }
 0x1f8   : > { %v2005_v5 = vmax.f32 %v1657_v17, %v1975_v32  ;;  %3028 = vmatprep.subr.bf16.mxu0 %v7095_v33  ;;  %v2071_v9 = vmax.f32 %v2043_v18, 0.0  ;;  %v7136_v17 = vld [vmem:[%s7879_s4 + $0xb4] ss:$8 sps:$4 sm:$0xff]   ;;  %3089 = vmatprep.subr.bf16.mxu1 %v7146_v60  ;;  %v7160_v32 = vld [vmem:[%s7879_s4 + $0x1c4] ss:$8 sps:$4 sm:$0xff]   ;;  %8031 = vst [vmem:[#allocation9_spill] sm:$0xff] %v7165_v63 }
 0x1f9   : > { %v2006_v7 = vmax.f32 %v1659_v51, %v1977_v30  ;;  %4644 = vmatprep.mubr.msk.bf16.mxu0 %vm2173_vm1, %v2086_v59  ;;  %4683 = vmatprep.mubr.msk.bf16.mxu1 %vm2173_vm1, %v2086_v59  ;;  %v2072_v51 = vmax.f32 %v2044_v53, 0.0  ;;  %8030 = vst [vmem:[#allocation21_spill] sm:$0xff] %v7160_v32  ;;  %v7170_v27 = vld [vmem:[%s7879_s4 + $0x1c0] ss:$8 sps:$4 sm:$0xff]   ;;  %v7184_v18 = vld [vmem:[%s7879_s4 + $0x1b4] ss:$8 sps:$4 sm:$0xff]  }
 0x1fa   : > { %v2045_v0 = vadd.f32 %v6746_v37, %v2005_v5  ;;  %2271 = vmatmul.mubr.bf16.gmra.mxu0 %v2085_v19  ;;  %2448 = vmatmul.mubr.bf16.gmra.mxu1 %v2085_v19  ;;  %v7122_v37 = vld [vmem:[%s7879_s4 + $0xc0] ss:$8 sps:$4 sm:$0xff]   ;;  %8032 = vst [vmem:[#allocation10_spill] sm:$0xff] %v7170_v27  ;;  %v7179_v19 = vld [vmem:[%s7879_s4 + $0x94] ss:$8 sps:$4 sm:$0xff]   ;;  %8034 = vst [vmem:[#allocation23_spill] sm:$0xff] %v7184_v18 }
 0x1fb   : > { %v2046_v54 = vadd.f32 %v6756_v6, %v2006_v7  ;;  %3029 = vmatpush2.bf16.msra.mxu0 %v7104_v31  ;;  %v7131_v6 = vld [vmem:[%s7879_s4 + $0xb0] ss:$8 sps:$4 sm:$0xff]   ;;  %3090 = vmatpush2.bf16.msra.mxu1 %v7141_v42  ;;  %8033 = vst [vmem:[#allocation8_spill] sm:$0xff] %v7179_v19  ;;  %v7203_v59 = vld [vmem:[%s7879_s4 + $0x84] ss:$8 sps:$4 sm:$0xff]  }
 0x1fc   : > { %v2073_v8 = vmax.f32 %v2045_v0, 0.0  ;;  %3030 = vmatprep.subr.bf16.mxu0 %v7113_v55  ;;  %3091 = vmatprep.subr.bf16.mxu1 %v7160_v32  ;;  %v7189_v5 = vld [vmem:[%s7879_s4 + $0x90] ss:$8 sps:$4 sm:$0xff]   ;;  %8037 = vst [vmem:[#allocation33_spill] sm:$0xff] %v7203_v59  ;;  %v7208_v53 = vld [vmem:[%s7879_s4 + $0x1a4] ss:$8 sps:$4 sm:$0xff]  }
 0x1fd   : > { %v2074_v50 = vmax.f32 %v2046_v54, 0.0  ;;  %8035 = vst [vmem:[#allocation32_spill] sm:$0xff] %v7189_v5  ;;  %v7194_v30 = vld [vmem:[%s7879_s4 + $0x1b0] ss:$8 sps:$4 sm:$0xff]   ;;  %8038 = vst [vmem:[#allocation35_spill] sm:$0xff] %v7208_v53 }
 0x1fe   : > { %v2087_v61 = vpack.c.bf16 %v2073_v8, %v2071_v9  ;;  %8036 = vst [vmem:[#allocation24_spill] sm:$0xff] %v7194_v30  ;;  %v7213_v0 = vld [vmem:[%s7879_s4 + $0x80] ss:$8 sps:$4 sm:$0xff]   ;;  %v7227_v9 = vld [vmem:[%s7879_s4 + $0x194] ss:$8 sps:$4 sm:$0xff]  }
 0x1ff   : > { %v2088_v56 = vpack.c.bf16 %v2074_v50, %v2072_v51  ;;  %3031 = vmatpush2.bf16.msra.mxu0 %v7122_v37  ;;  %3092 = vmatpush2.bf16.msra.mxu1 %v7170_v27  ;;  %8039 = vst [vmem:[#allocation36_spill] sm:$0xff] %v7213_v0  ;;  %v7218_v7 = vld [vmem:[%s7879_s4 + $0x1a0] ss:$8 sps:$4 sm:$0xff]   ;;  %8041 = vst [vmem:[#allocation27_spill] sm:$0xff] %v7227_v9  ;;  %v7232_v8 = vld [vmem:[%s7879_s4 + $0x274] ss:$8 sps:$4 sm:$0xff]  }
 0x200   : > { %3032 = vmatprep.subr.bf16.mxu0 %v7136_v17  ;;  %3093 = vmatprep.subr.bf16.mxu1 %v7184_v18  ;;  %8040 = vst [vmem:[#allocation11_spill] sm:$0xff] %v7218_v7  ;;  %8042 = vst [vmem:[#allocation26_spill] sm:$0xff] %v7232_v8  ;;  %v7237_v54 = vld [vmem:[%s7879_s4 + $0x190] ss:$8 sps:$4 sm:$0xff]   ;;  %v7245_v51 = vld [vmem:[%s7879_s4 + $0x184] ss:$8 sps:$4 sm:$0xff]  }
 0x201   : > { %4645 = vmatprep.mubr.msk.bf16.mxu0 %vm2173_vm1, %v2088_v56  ;;  %4684 = vmatprep.mubr.msk.bf16.mxu1 %vm2173_vm1, %v2088_v56  ;;  %8043 = vst [vmem:[#allocation13_spill] sm:$0xff] %v7237_v54  ;;  %8044 = vst [vmem:[#allocation14_spill] sm:$0xff] %v7245_v51  ;;  %v7250_v50 = vld [vmem:[%s7879_s4 + $0x180] ss:$8 sps:$4 sm:$0xff]  }
 0x202   : > { %2279 = vmatmul.mubr.bf16.gmra.mxu0 %v2087_v61  ;;  %2456 = vmatmul.mubr.bf16.gmra.mxu1 %v2087_v61  ;;  %8045 = vst [vmem:[#allocation12_spill] sm:$0xff] %v7250_v50  ;;  %v8046_v61 = vld [vmem:[#allocation18_spill] sm:$0xff] }
 0x203   : > { %3033 = vmatpush2.bf16.msra.mxu0 %v7131_v6  ;;  %3094 = vmatpush2.bf16.msra.mxu1 %v7194_v30 }
 0x204   : > { %3034 = vmatprep.subr.bf16.mxu0 %v7155_v43  ;;  %3095 = vmatprep.subr.bf16.mxu1 %v7208_v53 }
 0x207   : > { %3035 = vmatpush2.bf16.msra.mxu0 %v7165_v63  ;;  %3096 = vmatpush2.bf16.msra.mxu1 %v7218_v7 }
 0x208   : > { %3036 = vmatprep.subr.bf16.mxu0 %v7179_v19  ;;  %3097 = vmatprep.subr.bf16.mxu1 %v7227_v9 }
 0x20b   : > { %3037 = vmatpush2.bf16.msra.mxu0 %v7189_v5  ;;  %3098 = vmatpush2.bf16.msra.mxu1 %v7237_v54 }
 0x20c   : > { %3038 = vmatprep.subr.bf16.mxu0 %v7203_v59  ;;  %3099 = vmatprep.subr.bf16.mxu1 %v7245_v51 }
 0x20f   : > { %3039 = vmatpush2.bf16.msra.mxu0 %v7213_v0  ;;  %3100 = vmatpush2.bf16.msra.mxu1 %v7250_v50 }
 0x210   : > { %3130 = vmatprep.subr.bf16.mxu0 %v7232_v8  ;;  %3197 = vmatprep.subr.bf16.mxu1 %v8046_v61 }
 0x291   : > { %v2232_v56 = vpop.f32.mrf.mxu0  ;;  %v2409_v9 = vpop.f32.mrf.mxu1 }
 0x292   : > { %v2464_v60 = vmax.f32 %v2232_v56, %v2409_v9  ;;  %v7289_v56 = vld [vmem:[%s7879_s4 + $0x250] ss:$8 sps:$4 sm:$0xff]  }
 0x293   : > { %v2234_v7 = vpop.f32.mrf.mxu0  ;;  %v2411_v54 = vpop.f32.mrf.mxu1 }
 0x295   : > { %v2235_v53 = vpop.f32.mrf.mxu0  ;;  %v2412_v30 = vpop.f32.mrf.mxu1 }
 0x296   : > { %v2465_v32 = vmax.f32 %v2235_v53, %v2412_v30 }
 0x297   : > { %v2237_v18 = vpop.f32.mrf.mxu0  ;;  %v2414_v27 = vpop.f32.mrf.mxu1 }
 0x298   : > { %v2478_v62 = vpack.c.bf16 %v2465_v32, %v2464_v60 }
 0x29a   : > { %v2240_v42 = vpop.f32.mrf.mxu0  ;;  %v2417_v8 = vpop.f32.mrf.mxu1  ;;  %v2498_v19 = vrot.slane %v2478_v62, 4 }
 0x29b   : > { %v2466_v50 = vmax.f32 %v2240_v42, %v2417_v8 }
 0x29c   : > { %v2242_v20 = vpop.f32.mrf.mxu0  ;;  %v2419_v0 = vpop.f32.mrf.mxu1 }
 0x29d   : > { %v7261_v20 = vld [vmem:[%s7879_s4 + $0x270] ss:$8 sps:$4 sm:$0xff]  }
 0x29e   : > { %v2243_v51 = vpop.f32.mrf.mxu0  ;;  %v2420_v59 = vpop.f32.mrf.mxu1 }
 0x29f   : > { %v2467_v5 = vmax.f32 %v2243_v51, %v2420_v59  ;;  %v7274_v59 = vld [vmem:[%s7879_s4 + $0x260] ss:$8 sps:$4 sm:$0xff]  }
 0x2a0   : > { %v2245_v61 = vpop.f32.mrf.mxu0  ;;  %v2422_v26 = vpop.f32.mrf.mxu1 }
 0x2a1   : > { %v2479_v7 = vpack.c.bf16 %v2467_v5, %v2466_v50  ;;  %v7267_v26 = vld [vmem:[%s7879_s4 + $0x264] ss:$8 sps:$4 sm:$0xff]  }
 0x2a2   : > { %v2248_v54 = vpop.f32.mrf.mxu0  ;;  %v2425_v10 = vpop.f32.mrf.mxu1 }
 0x2a3   : > { %v2486_v63 = vrot.slane %v2479_v7, 4  ;;  %v7256_v27 = vsel %vm655_vm0, %v2498_v19, %v2479_v7  ;;  %v2468_v19 = vmax.f32 %v2248_v54, %v2425_v10 }
 0x2a4   : > { %v2250_v60 = vpop.f32.mrf.mxu0  ;;  %v2427_v32 = vpop.f32.mrf.mxu1  ;;  %3040 = vmatprep.mubr.bf16.mxu0 %v7256_v27 }
 0x2a5   : > { %v2491_v42 = vsel %vm655_vm0, %v2478_v62, %v2486_v63  ;;  %v7280_v62 = vld [vmem:[%s7879_s4 + $0x254] ss:$8 sps:$4 sm:$0xff]   ;;  %v7296_v60 = vld [vmem:[%s7879_s4 + $0x244] ss:$8 sps:$4 sm:$0xff]  }
 0x2a6   : > { %v2251_v18 = vpop.f32.mrf.mxu0  ;;  %v2428_v5 = vpop.f32.mrf.mxu1  ;;  %3041 = vmatmul.mubr.bf16.vlgmr.msra.gmra.mxu0 %v2491_v42 }
 0x2a7   : > { %v2469_v30 = vmax.f32 %v2251_v18, %v2428_v5  ;;  %3131 = vmatpush1.bf16.msra.mxu0 %v7261_v20 }
 0x2a8   : > { %v2253_v53 = vpop.f32.mrf.mxu0  ;;  %v2430_v0 = vpop.f32.mrf.mxu1  ;;  %3132 = vmatprep.subr.bf16.mxu0 %v7267_v26 }
 0x2a9   : > { %v2480_v9 = vpack.c.bf16 %v2469_v30, %v2468_v19  ;;  %v7307_v19 = vld [vmem:[%s7879_s4 + $0x240] ss:$8 sps:$4 sm:$0xff]  }
 0x2aa   : > { %v2256_v8 = vpop.f32.mrf.mxu0  ;;  %v2433_v10 = vpop.f32.mrf.mxu1 }
 0x2ab   : > { %v2500_v51 = vrot.slane %v2480_v9, 4  ;;  %3133 = vmatpush1.bf16.msra.mxu0 %v7274_v59  ;;  %v7284_v50 = vsel %vm655_vm0, %v2486_v63, %v2480_v9  ;;  %v2470_v18 = vmax.f32 %v2256_v8, %v2433_v10 }
 0x2ac   : > { %8047 = vst [vmem:[#allocation29_spill] sm:$0xff] %v7284_v50  ;;  %v2258_v61 = vpop.f32.mrf.mxu0  ;;  %v2435_v54 = vpop.f32.mrf.mxu1  ;;  %3101 = vmatprep.mubr.bf16.mxu1 %v7284_v50  ;;  %3134 = vmatprep.subr.bf16.mxu0 %v7280_v62  ;;  %v8049_v50 = vmov 0  }
 0x2ad   : > { %v7299_v32 = vsel %vm655_vm0, %v2479_v7, %v2500_v51  ;;  %v7314_v7 = vld [vmem:[%s7879_s4 + $0x234] ss:$8 sps:$4 sm:$0xff]  }
 0x2ae   : > { %v2259_v63 = vpop.f32.mrf.mxu0  ;;  %v2436_v42 = vpop.f32.mrf.mxu1  ;;  %3102 = vmatmul.mubr.bf16.vlgmr.msra.gmra.mxu1 %v7299_v32 }
 0x2af   : > { %v2471_v5 = vmax.f32 %v2259_v63, %v2436_v42  ;;  %3135 = vmatpush1.bf16.msra.mxu0 %v7289_v56  ;;  %3198 = vmatpush1.bf16.msra.mxu1 %v6781_v38  ;;  %v7331_v42 = vld [vmem:[%s7879_s4 + $0x224] ss:$8 sps:$4 sm:$0xff]  }
 0x2b0   : > { %v2261_v30 = vpop.f32.mrf.mxu0  ;;  %v2438_v53 = vpop.f32.mrf.mxu1  ;;  %3136 = vmatprep.subr.bf16.mxu0 %v7296_v60  ;;  %3199 = vmatprep.subr.bf16.mxu1 %v6793_v41  ;;  %v7324_v41 = vld [vmem:[%s7879_s4 + $0x230] ss:$8 sps:$4 sm:$0xff]  }
 0x2b1   : > { %v2481_v0 = vpack.c.bf16 %v2471_v5, %v2470_v18  ;;  %v7343_v53 = vld [vmem:[%s7879_s4 + $0x220] ss:$8 sps:$4 sm:$0xff]  }
 0x2b2   : > { %v2264_v8 = vpop.f32.mrf.mxu0  ;;  %v2441_v10 = vpop.f32.mrf.mxu1 }
 0x2b3   : > { %v2488_v38 = vrot.slane %v2481_v0, 4  ;;  %3137 = vmatpush1.bf16.msra.mxu0 %v7307_v19  ;;  %3200 = vmatpush1.bf16.msra.mxu1 %v6812_v13  ;;  %v7319_v61 = vsel %vm655_vm0, %v2500_v51, %v2481_v0  ;;  %v2472_v5 = vmax.f32 %v2264_v8, %v2441_v10 }
 0x2b4   : > { %v2266_v54 = vpop.f32.mrf.mxu0  ;;  %v2443_v63 = vpop.f32.mrf.mxu1  ;;  %3050 = vmatprep.mubr.bf16.mxu0 %v7319_v61  ;;  %3138 = vmatprep.subr.bf16.mxu0 %v7314_v7 }
 0x2b5   : > { %3201 = vmatprep.subr.bf16.mxu1 %v6828_v21  ;;  %v7335_v13 = vsel %vm655_vm0, %v2480_v9, %v2488_v38  ;;  %v7350_v9 = vld [vmem:[%s7879_s4 + $0x214] ss:$8 sps:$4 sm:$0xff]  }
 0x2b6   : > { %v2267_v51 = vpop.f32.mrf.mxu0  ;;  %v2444_v18 = vpop.f32.mrf.mxu1  ;;  %3051 = vmatmul.mubr.bf16.gmra.mxu0 %v7335_v13 }
 0x2b7   : > { %v2473_v30 = vmax.f32 %v2267_v51, %v2444_v18  ;;  %3139 = vmatpush1.bf16.msra.mxu0 %v7324_v41  ;;  %3202 = vmatpush1.bf16.msra.mxu1 %v6847_v14 }
 0x2b8   : > { %v2269_v54 = vpop.f32.mrf.mxu0  ;;  %v2446_v21 = vpop.f32.mrf.mxu1  ;;  %3140 = vmatprep.subr.bf16.mxu0 %v7331_v42  ;;  %3203 = vmatprep.subr.bf16.mxu1 %v6862_v47  ;;  %v7362_v47 = vld [vmem:[%s7879_s4 + $0x210] ss:$8 sps:$4 sm:$0xff]  }
 0x2b9   : > { %v2482_v8 = vpack.c.bf16 %v2473_v30, %v2472_v5 }
 0x2ba   : > { %v2272_v10 = vpop.f32.mrf.mxu0  ;;  %v2449_v63 = vpop.f32.mrf.mxu1 }
 0x2bb   : > { %3141 = vmatpush1.bf16.msra.mxu0 %v7343_v53  ;;  %3204 = vmatpush1.bf16.msra.mxu1 %v6882_v34  ;;  %v7355_v14 = vsel %vm655_vm0, %v2488_v38, %v2482_v8  ;;  %v7357_v51 = vrot.slane %v2482_v8, 4  ;;  %v7369_v34 = vld [vmem:[%s7879_s4 + $0x204] ss:$8 sps:$4 sm:$0xff]   ;;  %v2474_v21 = vmax.f32 %v2272_v10, %v2449_v63 }
 0x2bc   : > { %8048 = vst [vmem:[#allocation38_spill] sm:$0xff] %v7355_v14  ;;  %v2274_v18 = vpop.f32.mrf.mxu0  ;;  %v2451_v54 = vpop.f32.mrf.mxu1  ;;  %3111 = vmatprep.mubr.bf16.mxu1 %v7355_v14  ;;  %3142 = vmatprep.subr.bf16.mxu0 %v7350_v9 }
 0x2bd   : > { %3060 = vmatprep.mubr.bf16.mxu0 %v7357_v51  ;;  %3205 = vmatprep.subr.bf16.mxu1 %v6898_v58  ;;  %v7375_v38 = vsel %vm655_vm0, %v2481_v0, %v7357_v51  ;;  %v7383_v54 = vld [vmem:[%s7879_s4 + $0x200] ss:$8 sps:$4 sm:$0xff]  }
 0x2be   : > { %v2275_v5 = vpop.f32.mrf.mxu0  ;;  %v2452_v30 = vpop.f32.mrf.mxu1  ;;  %3061 = vmatmul.mubr.bf16.gmra.mxu0 %v2482_v8  ;;  %3112 = vmatmul.mubr.bf16.gmra.mxu1 %v7375_v38 }
 0x2bf   : > { %v2475_v18 = vmax.f32 %v2275_v5, %v2452_v30  ;;  %3143 = vmatpush1.bf16.msra.mxu0 %v7362_v47  ;;  %3206 = vmatpush1.bf16.msra.mxu1 %v6912_v46 }
 0x2c0   : > { %v2277_v58 = vpop.f32.mrf.mxu0  ;;  %v2454_v14 = vpop.f32.mrf.mxu1  ;;  %3144 = vmatprep.subr.bf16.mxu0 %v7369_v34  ;;  %3207 = vmatprep.subr.bf16.mxu1 %v6927_v29  ;;  %v5442_v29 = vld [vmem:[%s7879_s4 + $0x174] ss:$8 sps:$4 sm:$0xff]  }
 0x2c1   : > { %v7387_v0 = vpack.c.bf16 %v2475_v18, %v2474_v21  ;;  %3162 = vmatprep.mubr.bf16.mxu0 %v8049_v50  ;;  %v5351_v18 = vld [vmem:[%s7881_s6 + $0x40] sm:$0xff]  }
 0x2c2   : > { %v2280_v10 = vpop.f32.mrf.mxu0  ;;  %v2457_v63 = vpop.f32.mrf.mxu1 }
 0x2c3   : > { %3145 = vmatpush1.bf16.msra.mxu0 %v7383_v54  ;;  %3208 = vmatpush1.bf16.msra.mxu1 %v6946_v15  ;;  %v7393_v46 = vrot.slane %v7387_v0, 4 }
 0x2c4   : > { %v2282_v5 = vpop.f32.mrf.mxu0  ;;  %v2459_v30 = vpop.f32.mrf.mxu1  ;;  %3209 = vmatprep.subr.bf16.mxu1 %v6963_v2  ;;  %3258 = vmatprep.subr.bf16.mxu0 %v5442_v29 }
 0x2c5   : > { %3121 = vmatprep.mubr.bf16.mxu1 %v7393_v46 }
 0x2c6   : > { %v2283_v14 = vpop.f32.mrf.mxu0  ;;  %v2460_v21 = vpop.f32.mrf.mxu1  ;;  %3122 = vmatmul.mubr.bf16.gmra.mxu1 %v7387_v0  ;;  %3163 = vmatmul.mubr.bf16.vlgmr.msra.gmra.mxu0 %v7335_v13 }
 0x2c7   : > { %3210 = vmatpush1.bf16.msra.mxu1 %v6978_v24  ;;  %3259 = vmatpush1.bf16.msra.mxu0 %v6786_v28  ;;  %v7414_v28 = vsel %vm655_vm0, %v2482_v8, %v7393_v46  ;;  %v8058_v24 = vld [vmem:[#allocation36_spill] sm:$0xff]  ;;  %v5346_v8 = vld [vmem:[%s7881_s6 + $0x58] sm:$0xff]  }
 0x2c8   : > { %3229 = vmatprep.mubr.bf16.mxu1 %v7299_v32  ;;  %v2285_v15 = vpop.f32.mrf.mxu0  ;;  %v2462_v2 = vpop.f32.mrf.mxu1  ;;  %3211 = vmatprep.subr.bf16.mxu1 %v6992_v40  ;;  %v8060_v40 = vld [vmem:[#allocation22_spill] sm:$0xff]  ;;  %v5337_v32 = vld [vmem:[%s7881_s6 + $0x28] sm:$0xff]  }
 0x2c9   : > { %3260 = vmatprep.subr.bf16.mxu0 %v6798_v11  ;;  %3172 = vmatprep.mubr.bf16.mxu0 %v8049_v50  ;;  %v2477_v11 = vmax.f32 %v2283_v14, %v2460_v21  ;;  %v5359_v21 = vld [vmem:[%s7882_s7 + $0xf8] sm:$0xff]  }
 0x2cb   : > { %3212 = vmatpush1.bf16.msra.mxu1 %v7012_v12  ;;  %3261 = vmatpush1.bf16.msra.mxu0 %v6818_v3  ;;  %v2476_v3 = vmax.f32 %v2280_v10, %v2457_v63  ;;  %v8062_v12 = vld [vmem:[#allocation7_spill] sm:$0xff] }
 0x2cc   : > { %3213 = vmatprep.subr.bf16.mxu1 %v7029_v57  ;;  %3262 = vmatprep.subr.bf16.mxu0 %v6834_v39  ;;  %v8063_v57 = vld [vmem:[#allocation21_spill] sm:$0xff] }
 0x2cd   : > { %v7424_v39 = vpack.c.bf16 %v2477_v11, %v2476_v3 }
 0x2ce   : > { %3173 = vmatmul.mubr.bf16.gmra.mxu0 %v7414_v28 }
 0x2cf   : > { %3214 = vmatpush2.bf16.msra.mxu1 %v7044_v35  ;;  %3263 = vmatpush1.bf16.msra.mxu0 %v6853_v16  ;;  %v8050_v16 = vld [vmem:[#allocation9_spill] sm:$0xff]  ;;  %v8064_v35 = vld [vmem:[#allocation10_spill] sm:$0xff] }
 0x2d0   : > { %3215 = vmatprep.subr.bf16.mxu1 %v7058_v4  ;;  %3264 = vmatprep.subr.bf16.mxu0 %v6867_v25  ;;  %v8051_v25 = vld [vmem:[#allocation6_spill] sm:$0xff]  ;;  %v8065_v4 = vld [vmem:[#allocation23_spill] sm:$0xff] }
 0x2d1   : > { %3182 = vmatprep.mubr.bf16.mxu0 %v8049_v50 }
 0x2d3   : > { %3216 = vmatpush2.bf16.msra.mxu1 %v7080_v45  ;;  %3265 = vmatpush1.bf16.msra.mxu0 %v6888_v22  ;;  %v8052_v22 = vld [vmem:[#allocation8_spill] sm:$0xff] }
 0x2d4   : > { %3217 = vmatprep.subr.bf16.mxu1 %v7095_v33  ;;  %3266 = vmatprep.subr.bf16.mxu0 %v6903_v1  ;;  %v8053_v1 = vld [vmem:[#allocation25_spill] sm:$0xff]  ;;  %v8066_v45 = vld [vmem:[#allocation24_spill] sm:$0xff]  ;;  %v8067_v33 = vld [vmem:[#allocation35_spill] sm:$0xff] }
 0x2d6   : > { %3183 = vmatmul.mubr.bf16.gmra.mxu0 %v7424_v39 }
 0x2d7   : > { %3218 = vmatpush2.bf16.msra.mxu1 %v7104_v31  ;;  %3267 = vmatpush1.bf16.msra.mxu0 %v6918_v48  ;;  %v8054_v48 = vld [vmem:[#allocation32_spill] sm:$0xff]  ;;  %v8068_v31 = vld [vmem:[#allocation11_spill] sm:$0xff] }
 0x2d8   : > { %3290 = vmatprep.mubr.bf16.mxu0 %v7335_v13  ;;  %3219 = vmatprep.subr.bf16.mxu1 %v7113_v55  ;;  %v8069_v55 = vld [vmem:[#allocation27_spill] sm:$0xff]  ;;  %v5343_v13 = vld [vmem:[%s7881_s6 + $0x10] sm:$0xff]  }
 0x2d9   : > { %3268 = vmatprep.subr.bf16.mxu0 %v6935_v36  ;;  %v8055_v36 = vld [vmem:[#allocation20_spill] sm:$0xff] }
 0x2db   : > { %3220 = vmatpush2.bf16.msra.mxu1 %v7122_v37  ;;  %3269 = vmatpush1.bf16.msra.mxu0 %v6952_v44  ;;  %v8056_v44 = vld [vmem:[#allocation33_spill] sm:$0xff] }
 0x2dc   : > { %3221 = vmatprep.subr.bf16.mxu1 %v7136_v17  ;;  %3270 = vmatprep.subr.bf16.mxu0 %v6968_v49  ;;  %v8057_v49 = vld [vmem:[#allocation28_spill] sm:$0xff]  ;;  %v8070_v37 = vld [vmem:[#allocation13_spill] sm:$0xff] }
 0x2dd   : > { %v8072_v17 = vld [vmem:[#allocation12_spill] sm:$0xff] }
 0x2df   : > { %3222 = vmatpush2.bf16.msra.mxu1 %v7131_v6  ;;  %3271 = vmatpush1.bf16.msra.mxu0 %v6984_v23  ;;  %v8059_v23 = vld [vmem:[#allocation30_spill] sm:$0xff] }
 0x2e0   : > { %3223 = vmatprep.subr.bf16.mxu1 %v7155_v43  ;;  %3272 = vmatprep.subr.bf16.mxu0 %v7001_v52  ;;  %v8061_v52 = vld [vmem:[#allocation26_spill] sm:$0xff]  ;;  %v8073_v43 = vld [vmem:[#allocation29_spill] sm:$0xff] }
 0x2e1   : > { %v8071_v6 = vld [vmem:[#allocation14_spill] sm:$0xff] }
 0x2e3   : > { %3224 = vmatpush2.bf16.msra.mxu1 %v8050_v16  ;;  %3273 = vmatpush1.bf16.msra.mxu0 %v8051_v25 }
 0x2e4   : > { %3225 = vmatprep.subr.bf16.mxu1 %v8052_v22  ;;  %3274 = vmatprep.subr.bf16.mxu0 %v8053_v1 }
 0x2e7   : > { %3226 = vmatpush2.bf16.msra.mxu1 %v8054_v48  ;;  %3275 = vmatpush2.bf16.msra.mxu0 %v8055_v36 }
 0x2e8   : > { %3227 = vmatprep.subr.bf16.mxu1 %v8056_v44  ;;  %3276 = vmatprep.subr.bf16.mxu0 %v8057_v49 }
 0x2eb   : > { %3228 = vmatpush2.bf16.msra.mxu1 %v8058_v24  ;;  %3277 = vmatpush2.bf16.msra.mxu0 %v8059_v23 }
 0x2ec   : > { %3278 = vmatprep.subr.bf16.mxu0 %v8060_v40  ;;  %3319 = vmatprep.subr.bf16.mxu1 %v8061_v52 }
 0x2ee   : > { %3230 = vmatmul.mubr.bf16.vlgmr.msra.gmra.mxu1 %v7256_v27  ;;  %v8074_v27 = vld [vmem:[#allocation38_spill] sm:$0xff] }
 0x2ef   : > { %3239 = vmatprep.mubr.bf16.mxu1 %v7375_v38  ;;  %3279 = vmatpush2.bf16.msra.mxu0 %v8062_v12  ;;  %v5350_v38 = vld [vmem:[%s7881_s6 + $0x98] sm:$0xff]  }
 0x2f0   : > { %3320 = vmatpush1.bf16.msra.mxu1 %v7261_v20  ;;  %3280 = vmatprep.subr.bf16.mxu0 %v8063_v57  ;;  %v3195_v20 = vsel %vm655_vm0, %v7357_v51, %v7387_v0 }
 0x2f1   : > { %3321 = vmatprep.subr.bf16.mxu1 %v7267_v26  ;;  %v3192_v26 = vrot.slane %v7424_v39, 4 }
 0x2f3   : > { %3281 = vmatpush2.bf16.msra.mxu0 %v8064_v35 }
 0x2f4   : > { %3322 = vmatpush1.bf16.msra.mxu1 %v7274_v59  ;;  %3282 = vmatprep.subr.bf16.mxu0 %v8065_v4  ;;  %v5333_v59 = vld [vmem:[%s7881_s6 + $0x38] sm:$0xff]  }
 0x2f5   : > { %3323 = vmatprep.subr.bf16.mxu1 %v7280_v62  ;;  %v5334_v62 = vld [vmem:[%s7881_s6 + $0x88] sm:$0xff]  }
 0x2f6   : > { %3240 = vmatmul.mubr.bf16.gmra.mxu1 %v7319_v61 }
 0x2f7   : > { %3249 = vmatprep.mubr.bf16.mxu1 %v7387_v0  ;;  %3283 = vmatpush2.bf16.msra.mxu0 %v8066_v45 }
 0x2f8   : > { %3324 = vmatpush1.bf16.msra.mxu1 %v7289_v56  ;;  %3284 = vmatprep.subr.bf16.mxu0 %v8067_v33  ;;  %v5335_v56 = vld [vmem:[%s7881_s6 + $0x30] sm:$0xff]  }
 0x2f9   : > { %3325 = vmatprep.subr.bf16.mxu1 %v7296_v60  ;;  %v5336_v60 = vld [vmem:[%s7881_s6 + $0x80] sm:$0xff]  }
 0x2fb   : > { %3285 = vmatpush2.bf16.msra.mxu0 %v8068_v31 }
 0x2fc   : > { %3326 = vmatpush1.bf16.msra.mxu1 %v7307_v19  ;;  %3286 = vmatprep.subr.bf16.mxu0 %v8069_v55  ;;  %v5338_v19 = vld [vmem:[%s7881_s6 + $0x78] sm:$0xff]  }
 0x2fd   : > { %3327 = vmatprep.subr.bf16.mxu1 %v7314_v7  ;;  %v5339_v7 = vld [vmem:[%s7881_s6 + $0x20] sm:$0xff]  }
 0x2fe   : > { %3250 = vmatmul.mubr.bf16.gmra.mxu1 %v7357_v51  ;;  %v5347_v51 = vld [vmem:[%s7881_s6] sm:$0xff]  }
 0x2ff   : > { %3287 = vmatpush2.bf16.msra.mxu0 %v8070_v37  ;;  %3351 = vmatprep.mubr.bf16.mxu1 %v8049_v50 }
 0x300   : > { %3328 = vmatpush1.bf16.msra.mxu1 %v7324_v41  ;;  %3288 = vmatprep.subr.bf16.mxu0 %v8071_v6  ;;  %v5341_v41 = vld [vmem:[%s7881_s6 + $0x18] sm:$0xff]  }
 0x301   : > { %3329 = vmatprep.subr.bf16.mxu1 %v7331_v42  ;;  %v5342_v42 = vld [vmem:[%s7881_s6 + $0x68] sm:$0xff]  }
 0x303   : > { %3289 = vmatpush2.bf16.msra.mxu0 %v8072_v17 }
 0x304   : > { %3330 = vmatpush1.bf16.msra.mxu1 %v7343_v53  ;;  %3518 = vmatprep.subr.bf16.mxu0 %v8049_v50  ;;  %v5344_v53 = vld [vmem:[%s7881_s6 + $0x60] sm:$0xff]  }
 0x305   : > { %3331 = vmatprep.subr.bf16.mxu1 %v7350_v9  ;;  %v5345_v9 = vld [vmem:[%s7881_s6 + $0x8] sm:$0xff]  }
 0x306   : > { %3291 = vmatmul.mubr.bf16.vlgmr.msra.gmra.mxu0 %v8073_v43 }
 0x307   : > { %3300 = vmatprep.mubr.bf16.mxu0 %v7414_v28  ;;  %3519 = vmatpush1.bf16.msra.mxu0 %v5333_v59 }
 0x308   : > { %3332 = vmatpush1.bf16.msra.mxu1 %v7362_v47  ;;  %3520 = vmatprep.subr.bf16.mxu0 %v8049_v50  ;;  %v5348_v47 = vld [vmem:[%s7881_s6 + $0x50] sm:$0xff]  }
 0x309   : > { %3333 = vmatprep.subr.bf16.mxu1 %v7369_v34  ;;  %v5349_v34 = vld [vmem:[%s7881_s6 + $0x48] sm:$0xff]  }
 0x30b   : > { %3521 = vmatpush1.bf16.msra.mxu0 %v5335_v56 }
 0x30c   : > { %3334 = vmatpush1.bf16.msra.mxu1 %v7383_v54  ;;  %3522 = vmatprep.subr.bf16.mxu0 %v8049_v50  ;;  %v5352_v54 = vld [vmem:[%s7881_s6 + $0x90] sm:$0xff]  }
 0x30d   : > { %3655 = vmatprep.subr.bf16.mxu1 %v8049_v50 }
 0x30e   : > { %3301 = vmatmul.mubr.bf16.gmra.mxu0 %v8074_v27 }
 0x30f   : > { %3352 = vmatmul.mubr.bf16.vlgmr.msra.gmra.mxu1 %v7319_v61  ;;  %3310 = vmatprep.mubr.bf16.mxu0 %v7424_v39  ;;  %v5340_v61 = vld [vmem:[%s7881_s6 + $0x70] sm:$0xff]  }
 0x310   : > { %3361 = vmatprep.mubr.bf16.mxu1 %v8049_v50  ;;  %3656 = vmatpush1.bf16.msra.mxu1 %v5334_v62 }
 0x311   : > { %3657 = vmatprep.subr.bf16.mxu1 %v8049_v50  ;;  %3523 = vmatpush1.bf16.msra.mxu0 %v5337_v32 }
 0x312   : > { %3524 = vmatprep.subr.bf16.mxu0 %v8049_v50 }
 0x314   : > { %3658 = vmatpush1.bf16.msra.mxu1 %v5336_v60 }
 0x315   : > { %3659 = vmatprep.subr.bf16.mxu1 %v8049_v50  ;;  %3525 = vmatpush1.bf16.msra.mxu0 %v5339_v7 }
 0x316   : > { %3311 = vmatmul.mubr.bf16.gmra.mxu0 %v7393_v46  ;;  %3526 = vmatprep.subr.bf16.mxu0 %v8049_v50 }
 0x317   : > { %3362 = vmatmul.mubr.bf16.gmra.mxu1 %v3195_v20 }
 0x318   : > { %3371 = vmatprep.mubr.bf16.mxu1 %v8049_v50  ;;  %3660 = vmatpush1.bf16.msra.mxu1 %v5338_v19 }
 0x319   : > { %3661 = vmatprep.subr.bf16.mxu1 %v8049_v50  ;;  %3527 = vmatpush1.bf16.msra.mxu0 %v5341_v41 }
 0x31a   : > { %3528 = vmatprep.subr.bf16.mxu0 %v8049_v50 }
 0x31c   : > { %3662 = vmatpush1.bf16.msra.mxu1 %v5340_v61 }
 0x31d   : > { %3663 = vmatprep.subr.bf16.mxu1 %v8049_v50  ;;  %3529 = vmatpush1.bf16.msra.mxu0 %v5343_v13 }
 0x31e   : > { %3530 = vmatprep.subr.bf16.mxu0 %v8049_v50 }
 0x31f   : > { %3372 = vmatmul.mubr.bf16.gmra.mxu1 %v3192_v26 }
 0x320   : > { %3664 = vmatpush1.bf16.msra.mxu1 %v5342_v42 }
 0x321   : > { %3665 = vmatprep.subr.bf16.mxu1 %v8049_v50  ;;  %3531 = vmatpush1.bf16.msra.mxu0 %v5345_v9 }
 0x322   : > { %3532 = vmatprep.subr.bf16.mxu0 %v8049_v50 }
 0x324   : > { %3666 = vmatpush1.bf16.msra.mxu1 %v5344_v53 }
 0x325   : > { %3667 = vmatprep.subr.bf16.mxu1 %v8049_v50  ;;  %3533 = vmatpush1.bf16.msra.mxu0 %v5347_v51 }
 0x326   : > { %3546 = vmatprep.subr.bf16.mxu0 %v8049_v50 }
 0x328   : > { %3668 = vmatpush1.bf16.msra.mxu1 %v5346_v8 }
 0x329   : > { %3669 = vmatprep.subr.bf16.mxu1 %v8049_v50  ;;  %3547 = vmatpush2.bf16.msra.mxu0 %v5349_v34 }
 0x32a   : > { %3548 = vmatprep.subr.bf16.mxu0 %v8049_v50 }
 0x32c   : > { %3670 = vmatpush1.bf16.msra.mxu1 %v5348_v47 }
 0x32d   : > { %3683 = vmatprep.subr.bf16.mxu1 %v8049_v50  ;;  %3549 = vmatpush2.bf16.msra.mxu0 %v5351_v18 }
 0x330   : > { %3684 = vmatpush2.bf16.msra.mxu1 %v5350_v38 }
 0x331   : > { %3685 = vmatprep.subr.bf16.mxu1 %v8049_v50  ;;  %v5353_v50 = vld [vmem:[%s7882_s7 + $0x78] sm:$0xff]  }
 0x332   : > { %4874 = vmatprep.subr.bf16.mxu0 %v5353_v50 }
 0x334   : > { %3686 = vmatpush2.bf16.msra.mxu1 %v5352_v54 }
 0x335   : > { %4896 = vmatprep.subr.bf16.mxu1 %v5359_v21 }
 0x366   : > { %v3042_v58 = vpop.f32.mrf.mxu0 }
 0x368   : > { %v3044_v0 = vpop.f32.mrf.mxu0 }
 0x36a   : > { %v3046_v46 = vpop.f32.mrf.mxu0 }
 0x36c   : > { %v3048_v15 = vpop.f32.mrf.mxu0 }
 0x36e   : > { %v3103_v10 = vpop.f32.mrf.mxu1 }
 0x36f   : > { %v3104_v63 = vadd.f32 %v3103_v10, %v3042_v58 }
 0x370   : > { %v3105_v5 = vpop.f32.mrf.mxu1 }
 0x371   : > { %v3106_v30 = vadd.f32 %v3105_v5, %v3044_v0 }
 0x372   : > { %v3107_v29 = vpop.f32.mrf.mxu1 }
 0x373   : > { %v3108_v14 = vadd.f32 %v3107_v29, %v3046_v46 }
 0x374   : > { %v3109_v2 = vpop.f32.mrf.mxu1 }
 0x375   : > { %v3110_v28 = vadd.f32 %v3109_v2, %v3048_v15 }
 0x376   : > { %v3052_v11 = vpop.f32.mrf.mxu0 }
 0x378   : > { %v3054_v3 = vpop.f32.mrf.mxu0 }
 0x37a   : > { %v3056_v39 = vpop.f32.mrf.mxu0 }
 0x37c   : > { %v3058_v16 = vpop.f32.mrf.mxu0 }
 0x37e   : > { %v3062_v25 = vpop.f32.mrf.mxu0  ;;  %v3113_v22 = vpop.f32.mrf.mxu1 }
 0x37f   : > { %v3114_v1 = vadd.f32 %v3113_v22, %v3052_v11 }
 0x380   : > { %v3064_v48 = vpop.f32.mrf.mxu0  ;;  %v3115_v36 = vpop.f32.mrf.mxu1 }
 0x381   : > { %v3116_v44 = vadd.f32 %v3115_v36, %v3054_v3 }
 0x382   : > { %v3066_v49 = vpop.f32.mrf.mxu0  ;;  %v3117_v24 = vpop.f32.mrf.mxu1 }
 0x383   : > { %v3118_v23 = vadd.f32 %v3117_v24, %v3056_v39 }
 0x384   : > { %v3067_v40 = vpop.f32.mrf.mxu0  ;;  %v3119_v52 = vpop.f32.mrf.mxu1 }
 0x385   : > { %v3120_v12 = vadd.f32 %v3119_v52, %v3058_v16 }
 0x386   : > { %v3123_v57 = vpop.f32.mrf.mxu1  ;;  %v3164_v35 = vpop.f32.mrf.mxu0 }
 0x387   : > { %v3124_v4 = vadd.f32 %v3123_v57, %v3062_v25  ;;  %v7584_v45 = vadd.f32 %v3164_v35, %v3104_v63 }
 0x388   : > { %v3125_v33 = vpop.f32.mrf.mxu1  ;;  %v3166_v31 = vpop.f32.mrf.mxu0 }
 0x389   : > { %v3126_v55 = vadd.f32 %v3125_v33, %v3064_v48  ;;  %v7586_v37 = vadd.f32 %v3166_v31, %v3106_v30 }
 0x38a   : > { %v3127_v6 = vpop.f32.mrf.mxu1  ;;  %v3168_v17 = vpop.f32.mrf.mxu0 }
 0x38b   : > { %v7588_v43 = vadd.f32 %v3168_v17, %v3108_v14 }
 0x38c   : > { %v3128_v27 = vpop.f32.mrf.mxu1  ;;  %v3170_v20 = vpop.f32.mrf.mxu0 }
 0x38d   : > { %v7590_v26 = vadd.f32 %v3170_v20, %v3110_v28  ;;  %v3390_v28 = vld [vmem:[%s7880_s5] sm:$0x3] }
 0x38e   : > { %v3174_v59 = vpop.f32.mrf.mxu0 }
 0x38f   : > { %v7592_v62 = vadd.f32 %v3174_v59, %v3114_v1  ;;  %v8075_v1 = vld [vmem:[#allocation43_spill] sm:$0xff] }
 0x390   : > { %v3176_v56 = vpop.f32.mrf.mxu0  ;;  %v8076_v48 = vsub.s32 0, %v8075_v1  ;;  %v8077_v52 = vsub.s32 1, %v8075_v1 }
 0x391   : > { %v7594_v60 = vadd.f32 %v3176_v56, %v3116_v44 }
 0x392   : > { %v3178_v32 = vpop.f32.mrf.mxu0  ;;  %v7612_v36 = vrot.slane %v3390_v28, %v8076_v48 }
 0x393   : > { %v7596_v19 = vadd.f32 %v3178_v32, %v3118_v23 }
 0x394   : > { %v3180_v7 = vpop.f32.mrf.mxu0 }
 0x395   : > { %v7598_v61 = vadd.f32 %v3180_v7, %v3120_v12  ;;  %v7617_v12 = vrot.slane %v3390_v28, %v8077_v52  ;;  %v5363_v28 = vld [vmem:[%s7882_s7 + $0xf0] sm:$0xff]  }
 0x396   : > { %v3184_v41 = vpop.f32.mrf.mxu0 }
 0x397   : > { %v7600_v42 = vadd.f32 %v3184_v41, %v3124_v4 }
 0x398   : > { %v3186_v13 = vpop.f32.mrf.mxu0 }
 0x399   : > { %v7602_v53 = vadd.f32 %v3186_v13, %v3126_v55 }
 0x39a   : > { %v3188_v9 = vpop.f32.mrf.mxu0 }
 0x39c   : > { %v3189_v8 = vpop.f32.mrf.mxu0 }
 0x3ae   : > { %v3231_v51 = vpop.f32.mrf.mxu1 }
 0x3b0   : > { %v3233_v47 = vpop.f32.mrf.mxu1 }
 0x3b2   : > { %v3235_v34 = vpop.f32.mrf.mxu1 }
 0x3b4   : > { %v3237_v38 = vpop.f32.mrf.mxu1 }
 0x3b6   : > { %v3241_v18 = vpop.f32.mrf.mxu1 }
 0x3b8   : > { %v3243_v54 = vpop.f32.mrf.mxu1 }
 0x3ba   : > { %v3245_v58 = vpop.f32.mrf.mxu1 }
 0x3bc   : > { %v3247_v0 = vpop.f32.mrf.mxu1 }
 0x3be   : > { %v3251_v10 = vpop.f32.mrf.mxu1 }
 0x3c0   : > { %v7604_v63 = vpop.f32.mrf.mxu1 }
 0x3c2   : > { %v3255_v46 = vpop.f32.mrf.mxu1 }
 0x3c4   : > { %v3256_v5 = vpop.f32.mrf.mxu1 }
 0x3c6   : > { %v3292_v30 = vpop.f32.mrf.mxu0 }
 0x3c7   : > { %v3293_v21 = vadd.f32 %v3292_v30, %v3231_v51 }
 0x3c8   : > { %v3294_v50 = vpop.f32.mrf.mxu0 }
 0x3c9   : > { %v3295_v11 = vadd.f32 %v3294_v50, %v3233_v47 }
 0x3ca   : > { %v3296_v29 = vpop.f32.mrf.mxu0 }
 0x3cb   : > { %v3297_v25 = vadd.f32 %v3296_v29, %v3235_v34 }
 0x3cc   : > { %v3298_v14 = vpop.f32.mrf.mxu0 }
 0x3cd   : > { %v3299_v23 = vadd.f32 %v3298_v14, %v3237_v38 }
 0x3ce   : > { %v3302_v15 = vpop.f32.mrf.mxu0 }
 0x3cf   : > { %v3353_v2 = vpop.f32.mrf.mxu1  ;;  %v3303_v33 = vadd.f32 %v3302_v15, %v3241_v18 }
 0x3d0   : > { %v3354_v3 = vadd.f32 %v3353_v2, %v3293_v21  ;;  %v3304_v39 = vpop.f32.mrf.mxu0 }
 0x3d1   : > { %v3355_v16 = vpop.f32.mrf.mxu1  ;;  %v3305_v17 = vadd.f32 %v3304_v39, %v3243_v54 }
 0x3d2   : > { %v3380_v22 = vmax.f32 %v7584_v45, %v3354_v3  ;;  %v3356_v44 = vadd.f32 %v3355_v16, %v3295_v11  ;;  %v3306_v49 = vpop.f32.mrf.mxu0 }
 0x3d3   : > { %v3357_v24 = vpop.f32.mrf.mxu1 }
 0x3d4   : > { %v3381_v40 = vmax.f32 %v7586_v37, %v3356_v44  ;;  %v3358_v57 = vadd.f32 %v3357_v24, %v3297_v25  ;;  %v3308_v35 = vpop.f32.mrf.mxu0  ;;  %v3402_v45 = vadd.f32 %v7612_v36, %v3380_v22  ;;  %v5356_v22 = vld [vmem:[%s7882_s7 + $0x30] sm:$0xff]   ;;  %v5357_v24 = vld [vmem:[%s7882_s7 + $0x68] sm:$0xff]  }
 0x3d5   : > { %v3359_v4 = vpop.f32.mrf.mxu1  ;;  %v3309_v47 = vadd.f32 %v3308_v35, %v3247_v0 }
 0x3d6   : > { %v3382_v31 = vmax.f32 %v7588_v43, %v3358_v57  ;;  %v3360_v55 = vadd.f32 %v3359_v4, %v3299_v23  ;;  %v3312_v6 = vpop.f32.mrf.mxu0  ;;  %v3403_v20 = vadd.f32 %v7617_v12, %v3381_v40  ;;  %v3412_v41 = vmax.f32 %v3402_v45, 0.0  ;;  %v5367_v23 = vld [vmem:[%s7882_s7 + $0xe8] sm:$0xff]  }
 0x3d7   : > { %v3363_v27 = vpop.f32.mrf.mxu1  ;;  %v3307_v43 = vadd.f32 %v3306_v49, %v3245_v58  ;;  %v3313_v14 = vadd.f32 %v3312_v6, %v3251_v10  ;;  %v5354_v58 = vld [vmem:[%s7882_s7 + $0x38] sm:$0xff]   ;;  %v5355_v10 = vld [vmem:[%s7882_s7 + $0x70] sm:$0xff]   ;;  %v5358_v45 = vld [vmem:[%s7882_s7 + $0x28] sm:$0xff]  }
 0x3d8   : > { %v3404_v37 = vadd.f32 %v7612_v36, %v3382_v31  ;;  %v3383_v59 = vmax.f32 %v7590_v26, %v3360_v55  ;;  %v3364_v56 = vadd.f32 %v3363_v27, %v3303_v33  ;;  %v3314_v32 = vpop.f32.mrf.mxu0  ;;  %v3413_v18 = vmax.f32 %v3403_v20, 0.0  ;;  %v5368_v31 = vld [vmem:[%s7882_s7 + $0xa8] sm:$0xff]   ;;  %v5365_v27 = vld [vmem:[%s7882_s7 + $0x58] sm:$0xff]  }
 0x3d9   : > { %v3365_v7 = vpop.f32.mrf.mxu1  ;;  %v3315_v15 = vadd.f32 %v3314_v32, %v7604_v63  ;;  %v5366_v20 = vld [vmem:[%s7882_s7 + $0x18] sm:$0xff]   ;;  %v5371_v32 = vld [vmem:[%s7882_s7 + $0xe0] sm:$0xff]  }
 0x3da   : > { %v3414_v13 = vmax.f32 %v3404_v37, 0.0  ;;  %v3405_v9 = vadd.f32 %v7617_v12, %v3383_v59  ;;  %v3366_v8 = vadd.f32 %v3365_v7, %v3305_v17  ;;  %v3316_v51 = vpop.f32.mrf.mxu0  ;;  %v3384_v34 = vmax.f32 %v7592_v62, %v3364_v56  ;;  %v5360_v62 = vld [vmem:[%s7882_s7 + $0xb8] sm:$0xff]   ;;  %v5362_v17 = vld [vmem:[%s7882_s7 + $0x20] sm:$0xff]   ;;  %v5369_v59 = vld [vmem:[%s7882_s7 + $0x50] sm:$0xff]  }
 0x3db   : > { %v3367_v38 = vpop.f32.mrf.mxu1  ;;  %v5370_v56 = vld [vmem:[%s7882_s7 + $0x10] sm:$0xff]   ;;  %v5372_v7 = vld [vmem:[%s7882_s7 + $0xa0] sm:$0xff]  }
 0x3dc   : > { %v3422_v54 = vpack.c.bf16 %v3414_v13, %v3412_v41  ;;  %v3415_v46 = vmax.f32 %v3405_v9, 0.0  ;;  %v3385_v5 = vmax.f32 %v7594_v60, %v3366_v8  ;;  %v3317_v26 = vpop.f32.mrf.mxu0  ;;  %v3368_v30 = vadd.f32 %v3367_v38, %v3307_v43  ;;  %v5373_v41 = vld [vmem:[%s7882_s7 + $0x48] sm:$0xff]   ;;  %v5375_v9 = vld [vmem:[%s7882_s7 + $0xd8] sm:$0xff]   ;;  %v5377_v51 = vld [vmem:[%s7882_s7 + $0x40] sm:$0xff]  }
 0x3dd   : > { %v3369_v50 = vpop.f32.mrf.mxu1  ;;  %v3406_v0 = vadd.f32 %v7612_v36, %v3384_v34  ;;  %v5374_v13 = vld [vmem:[%s7882_s7 + $0x8] sm:$0xff]   ;;  %v5376_v8 = vld [vmem:[%s7882_s7 + $0x98] sm:$0xff]   ;;  %v5378_v43 = vld [vmem:[%s7882_s7] sm:$0xff]  }
 0x3de   : > { %v3423_v29 = vpack.c.bf16 %v3415_v46, %v3413_v18  ;;  %v3370_v21 = vadd.f32 %v3369_v50, %v3309_v47  ;;  %v3386_v60 = vmax.f32 %v7596_v19, %v3368_v30  ;;  %v3407_v11 = vadd.f32 %v7617_v12, %v3385_v5  ;;  %v5379_v47 = vld [vmem:[%s7882_s7 + $0xd0] sm:$0xff]   ;;  %v5381_v38 = vld [vmem:[%s7882_s7 + $0xc8] sm:$0xff]   ;;  %v5384_v46 = vld [vmem:[%s7882_s7 + $0xc0] sm:$0xff]  }
 0x3df   : > { %v3373_v2 = vpop.f32.mrf.mxu1  ;;  %v3416_v1 = vmax.f32 %v3406_v0, 0.0  ;;  %v5380_v34 = vld [vmem:[%s7882_s7 + $0x90] sm:$0xff]   ;;  %v5506_v18 = vmov 0.0   ;;  %v5386_v5 = vld [vmem:[%s7882_s7 + $0x80] sm:$0xff]  }
 0x3e0   : > { %v3387_v3 = vmax.f32 %v7598_v61, %v3370_v21  ;;  %v3374_v39 = vadd.f32 %v3373_v2, %v3313_v14  ;;  %4775 = vmatprep.mubr.msk.bf16.mxu0 %vm3508_vm2, %v3423_v29  ;;  %4808 = vmatprep.mubr.msk.bf16.mxu1 %vm3508_vm2, %v3423_v29  ;;  %v3408_v19 = vadd.f32 %v7612_v36, %v3386_v60  ;;  %v5364_v61 = vld [vmem:[%s7882_s7 + $0xb0] sm:$0xff]   ;;  %v3417_v40 = vmax.f32 %v3407_v11, 0.0  ;;  %v5382_v11 = vld [vmem:[%s7882_s7 + $0x138] sm:$0xff]  }
 0x3e1   : > { %v3375_v63 = vpop.f32.mrf.mxu1  ;;  %3551 = vmatmul.mubr.bf16.vlgmr.msra.gmra.mxu0 %v3422_v54  ;;  %3688 = vmatmul.mubr.bf16.vlgmr.msra.gmra.mxu1 %v3422_v54  ;;  %v5383_v54 = vld [vmem:[%s7882_s7 + $0x88] sm:$0xff]  }
 0x3e2   : > { %v3409_v16 = vadd.f32 %v7617_v12, %v3387_v3  ;;  %v3376_v25 = vadd.f32 %v3375_v63, %v3315_v15  ;;  %4875 = vmatpush3.bf16.msra.mxu0 %v5354_v58  ;;  %4897 = vmatpush3.bf16.msra.mxu1 %v5360_v62  ;;  %v3418_v48 = vmax.f32 %v3408_v19, 0.0  ;;  %v3388_v44 = vmax.f32 %v7600_v42, %v3374_v39 }
 0x3e3   : > { %v3377_v49 = vpop.f32.mrf.mxu1  ;;  %4876 = vmatprep.subr.bf16.mxu0 %v5355_v10  ;;  %4898 = vmatprep.subr.bf16.mxu1 %v5363_v28 }
 0x3e4   : > { %v3419_v52 = vmax.f32 %v3409_v16, 0.0  ;;  %v3389_v57 = vmax.f32 %v7602_v53, %v3376_v25  ;;  %v3424_v35 = vpack.c.bf16 %v3418_v48, %v3416_v1  ;;  %v3410_v55 = vadd.f32 %v7612_v36, %v3388_v44  ;;  %v5361_v53 = vld [vmem:[%s7882_s7 + $0x60] sm:$0xff]  }
 0x3e5   : > { %v3378_v4 = vpop.f32.mrf.mxu1 }
 0x3e6   : > { %v3425_v33 = vpack.c.bf16 %v3419_v52, %v3417_v40  ;;  %v3411_v42 = vadd.f32 %v7617_v12, %v3389_v57  ;;  %4877 = vmatpush3.bf16.msra.mxu0 %v5356_v22  ;;  %4899 = vmatpush3.bf16.msra.mxu1 %v5364_v61  ;;  %v3420_v36 = vmax.f32 %v3410_v55, 0.0  ;;  %v5385_v22 = vld [vmem:[%s7882_s7 + $0x130] sm:$0xff]   ;;  %v5388_v4 = vld [vmem:[%s7882_s7 + $0x120] sm:$0xff]   ;;  %v5391_v55 = vld [vmem:[%s7882_s7 + $0x108] sm:$0xff]  }
 0x3e7   : > { %4878 = vmatprep.subr.bf16.mxu0 %v5357_v24  ;;  %4900 = vmatprep.subr.bf16.mxu1 %v5367_v23  ;;  %v5387_v23 = vld [vmem:[%s7882_s7 + $0x128] sm:$0xff]  }
 0x3e8   : > { %v3421_v6 = vmax.f32 %v3411_v42, 0.0  ;;  %4776 = vmatprep.mubr.msk.bf16.mxu0 %vm3508_vm2, %v3425_v33  ;;  %4809 = vmatprep.mubr.msk.bf16.mxu1 %vm3508_vm2, %v3425_v33  ;;  %v3426_v37 = vpack.c.bf16 %v3420_v36, %v3420_v36 }
 0x3e9   : > { %3559 = vmatmul.mubr.bf16.gmra.mxu0 %v3424_v35  ;;  %3696 = vmatmul.mubr.bf16.gmra.mxu1 %v3424_v35 }
 0x3ea   : > { %v3427_v12 = vpack.c.bf16 %v3421_v6, %v3421_v6  ;;  %4879 = vmatpush3.bf16.msra.mxu0 %v5358_v45  ;;  %4901 = vmatpush3.bf16.msra.mxu1 %v5368_v31  ;;  %v5389_v45 = vld [vmem:[%s7882_s7 + $0x118] sm:$0xff]   ;;  %v5390_v31 = vld [vmem:[%s7882_s7 + $0x110] sm:$0xff]  }
 0x3eb   : > { %4880 = vmatprep.subr.bf16.mxu0 %v5361_v53  ;;  %4902 = vmatprep.subr.bf16.mxu1 %v5371_v32  ;;  %v5392_v53 = vld [vmem:[%s7882_s7 + $0x100] sm:$0xff]   ;;  %v5399_v32 = vld [vmem:[%s7884_s9 + $0x8] sm:$0xff]  }
 0x3ec   : > { %4777 = vmatprep.mubr.msk.bf16.mxu0 %vm3508_vm2, %v3427_v12  ;;  %4810 = vmatprep.mubr.msk.bf16.mxu1 %vm3508_vm2, %v3427_v12 }
 0x3ee   : > { %4881 = vmatpush3.bf16.msra.mxu0 %v5362_v17  ;;  %4903 = vmatpush3.bf16.msra.mxu1 %v5372_v7  ;;  %v5393_v17 = vld [vmem:[%s7884_s9 + $0x38] ss:$0 sps:$4 sm:$0xff]   ;;  %v5400_v7 = vld [vmem:[%s7884_s9] sm:$0xff]  }
 0x3ef   : > { %4882 = vmatprep.subr.bf16.mxu0 %v5365_v27  ;;  %4904 = vmatprep.subr.bf16.mxu1 %v5375_v9  ;;  %v4246_v36 = vsel %vm655_vm0, %v5393_v17, 0  ;;  %v5394_v27 = vld [vmem:[%s7884_s9 + $0x30] sm:$0xff]   ;;  %v5402_v9 = vld [vmem:[%s7886_s11 + $0x20] sm:$0xff]  }
 0x3f1   : > { %3567 = vmatmul.mubr.bf16.gmra.mxu0 %v3426_v37  ;;  %3704 = vmatmul.mubr.bf16.gmra.mxu1 %v3426_v37  ;;  %v5396_v37 = vld [vmem:[%s7884_s9 + $0x20] sm:$0xff]  }
 0x3f2   : > { %4883 = vmatpush3.bf16.msra.mxu0 %v5366_v20  ;;  %4905 = vmatpush3.bf16.msra.mxu1 %v5376_v8  ;;  %v5395_v20 = vld [vmem:[%s7884_s9 + $0x28] sm:$0xff]   ;;  %v5403_v8 = vld [vmem:[%s7886_s11 + $0x18] sm:$0xff]  }
 0x3f3   : > { %4884 = vmatprep.subr.bf16.mxu0 %v5369_v59  ;;  %4906 = vmatprep.subr.bf16.mxu1 %v5379_v47  ;;  %v5397_v59 = vld [vmem:[%s7884_s9 + $0x18] sm:$0xff]  }
 0x3f6   : > { %4885 = vmatpush3.bf16.msra.mxu0 %v5370_v56  ;;  %4907 = vmatpush3.bf16.msra.mxu1 %v5380_v34  ;;  %v5398_v56 = vld [vmem:[%s7884_s9 + $0x10] sm:$0xff]  }
 0x3f7   : > { %4886 = vmatprep.subr.bf16.mxu0 %v5373_v41  ;;  %4908 = vmatprep.subr.bf16.mxu1 %v5381_v38  ;;  %v5401_v41 = vld [vmem:[%s7886_s11 + $0x28] ss:$0 sps:$4 sm:$0x33]  }
 0x3fa   : > { %4887 = vmatpush3.bf16.msra.mxu0 %v5374_v13  ;;  %4909 = vmatpush3.bf16.msra.mxu1 %v5383_v54  ;;  %v4347_v13 = vsel %vm4345_vm4, %v5401_v41, 0 }
 0x3fb   : > { %4888 = vmatprep.subr.bf16.mxu0 %v5377_v51  ;;  %4910 = vmatprep.subr.bf16.mxu1 %v5384_v46  ;;  %v5404_v51 = vld [vmem:[%s7886_s11 + $0x10] sm:$0xff]  }
 0x3fe   : > { %4889 = vmatpush3.bf16.msra.mxu0 %v5378_v43  ;;  %4911 = vmatpush3.bf16.msra.mxu1 %v5386_v5 }
 0x3ff   : > { %4943 = vmatprep.subr.bf16.mxu0 %v5506_v18  ;;  %4963 = vmatprep.subr.bf16.mxu1 %v5506_v18 }
 0x4a1   : > { %v3552_v26 = vpop.f32.mrf.mxu0  ;;  %v3689_v30 = vpop.f32.mrf.mxu1 }
 0x4a2   : > { %v3711_v58 = vmax.f32 %v3552_v26, %v3689_v30 }
 0x4a3   : > { %v3554_v50 = vpop.f32.mrf.mxu0  ;;  %v3691_v29 = vpop.f32.mrf.mxu1 }
 0x4a4   : > { %v4811_v50 = vld [vmem:[%s7883_s8] ss:$0 sm:$0xff] }
 0x4a5   : > { %v3555_v14 = vpop.f32.mrf.mxu0  ;;  %v3692_v21 = vpop.f32.mrf.mxu1 }
 0x4a6   : > { %v3712_v62 = vmax.f32 %v3555_v14, %v3692_v21 }
 0x4a7   : > { %v3557_v0 = vpop.f32.mrf.mxu0  ;;  %v3694_v15 = vpop.f32.mrf.mxu1 }
 0x4a8   : > { %v3716_v60 = vpack.c.bf16 %v3712_v62, %v3711_v58 }
 0x4a9   : > { %v3560_v2 = vpop.f32.mrf.mxu0  ;;  %v3697_v10 = vpop.f32.mrf.mxu1 }
 0x4aa   : > { %v3720_v28 = vrot.slane %v3716_v60, 4  ;;  %v3713_v16 = vmax.f32 %v3560_v2, %v3697_v10 }
 0x4ab   : > { %v3562_v3 = vpop.f32.mrf.mxu0  ;;  %v3699_v39 = vpop.f32.mrf.mxu1 }
 0x4ac   : > { %4084 = vmatprep.mubr.bf16.mxu0 %v3720_v28  ;;  %v5405_v28 = vld [vmem:[%s7886_s11 + $0x8] sm:$0xff]   ;;  %v4852_v3 = vld [vmem:[%s7885_s10] ss:$0 sm:$0xff] }
 0x4ad   : > { %v3563_v19 = vpop.f32.mrf.mxu0  ;;  %v3700_v63 = vpop.f32.mrf.mxu1  ;;  %4085 = vmatmul.mubr.bf16.vlgmr.msra.gmra.mxu0 %v3716_v60 }
 0x4ae   : > { %v3714_v25 = vmax.f32 %v3563_v19, %v3700_v63  ;;  %4944 = vmatpush3.bf16.msra.mxu0 %v5382_v11  ;;  %4959 = vmatprep.mubr.msk.bf16.mxu0 %vm5507_vm3, %v5506_v18  ;;  %v5406_v11 = vld [vmem:[%s7886_s11] sm:$0xff]  }
 0x4af   : > { %v3565_v61 = vpop.f32.mrf.mxu0  ;;  %v3702_v1 = vpop.f32.mrf.mxu1  ;;  %4945 = vmatprep.subr.bf16.mxu0 %v5506_v18 }
 0x4b0   : > { %v3717_v48 = vpack.c.bf16 %v3714_v25, %v3713_v16 }
 0x4b1   : > { %v3568_v44 = vpop.f32.mrf.mxu0  ;;  %v3705_v49 = vpop.f32.mrf.mxu1 }
 0x4b2   : > { %4946 = vmatpush3.bf16.msra.mxu0 %v5385_v22  ;;  %v3723_v24 = vrot.slane %v3717_v48, 4  ;;  %v3715_v6 = vmax.f32 %v3568_v44, %v3705_v49 }
 0x4b3   : > { %v3570_v40 = vpop.f32.mrf.mxu0  ;;  %v3707_v52 = vpop.f32.mrf.mxu1  ;;  %4947 = vmatprep.subr.bf16.mxu0 %v5506_v18 }
 0x4b4   : > { %4124 = vmatprep.mubr.bf16.mxu1 %v3723_v24  ;;  %v3718_v12 = vpack.c.bf16 %v3715_v6, %v3715_v6 }
 0x4b5   : > { %v3571_v57 = vpop.f32.mrf.mxu0  ;;  %v3708_v35 = vpop.f32.mrf.mxu1  ;;  %4125 = vmatmul.mubr.bf16.vlgmr.msra.gmra.mxu1 %v3717_v48 }
 0x4b6   : > { %4948 = vmatpush3.bf16.msra.mxu0 %v5387_v23  ;;  %4979 = vmatprep.mubr.msk.bf16.mxu1 %vm5507_vm3, %v5506_v18 }
 0x4b7   : > { %v3572_v33 = vpop.f32.mrf.mxu0  ;;  %v3709_v42 = vpop.f32.mrf.mxu1  ;;  %4949 = vmatprep.subr.bf16.mxu0 %v5506_v18  ;;  %4964 = vmatpush3.bf16.msra.mxu1 %v4246_v36 }
 0x4b8   : > { %4965 = vmatprep.subr.bf16.mxu1 %v5506_v18 }
 0x4ba   : > { %4950 = vmatpush3.bf16.msra.mxu0 %v5388_v4 }
 0x4bb   : > { %4951 = vmatprep.subr.bf16.mxu0 %v5506_v18  ;;  %4966 = vmatpush3.bf16.msra.mxu1 %v5394_v27 }
 0x4bc   : > { %4967 = vmatprep.subr.bf16.mxu1 %v5506_v18 }
 0x4be   : > { %4952 = vmatpush3.bf16.msra.mxu0 %v5389_v45 }
 0x4bf   : > { %4953 = vmatprep.subr.bf16.mxu0 %v5506_v18  ;;  %4968 = vmatpush3.bf16.msra.mxu1 %v5395_v20 }
 0x4c0   : > { %4969 = vmatprep.subr.bf16.mxu1 %v5506_v18 }
 0x4c2   : > { %4954 = vmatpush3.bf16.msra.mxu0 %v5390_v31 }
 0x4c3   : > { %4955 = vmatprep.subr.bf16.mxu0 %v5506_v18  ;;  %4970 = vmatpush3.bf16.msra.mxu1 %v5396_v37 }
 0x4c4   : > { %4971 = vmatprep.subr.bf16.mxu1 %v5506_v18 }
 0x4c6   : > { %4956 = vmatpush3.bf16.msra.mxu0 %v5391_v55 }
 0x4c7   : > { %4957 = vmatprep.subr.bf16.mxu0 %v5506_v18  ;;  %4972 = vmatpush3.bf16.msra.mxu1 %v5397_v59 }
 0x4c8   : > { %4973 = vmatprep.subr.bf16.mxu1 %v5506_v18 }
 0x4ca   : > { %4958 = vmatpush3.bf16.msra.mxu0 %v5392_v53 }
 0x4cb   : > { %4983 = vmatprep.subr.bf16.mxu0 %v5506_v18  ;;  %4974 = vmatpush3.bf16.msra.mxu1 %v5398_v56 }
 0x4cc   : > { %4975 = vmatprep.subr.bf16.mxu1 %v5506_v18 }
 0x4cd   : > { %4960 = vmatmul.mubr.bf16.vlgmr.msra.gmra.mxu0 %v3718_v12 }
 0x4ce   : > { %4995 = vmatprep.mubr.msk.bf16.mxu0 %vm5507_vm3, %v5506_v18  ;;  %4984 = vmatpush3.bf16.msra.mxu0 %v4347_v13 }
 0x4cf   : > { %4976 = vmatpush3.bf16.msra.mxu1 %v5399_v32  ;;  %4985 = vmatprep.subr.bf16.mxu0 %v5506_v18 }
 0x4d0   : > { %4977 = vmatprep.subr.bf16.mxu1 %v5506_v18 }
 0x4d2   : > { %4986 = vmatpush3.bf16.msra.mxu0 %v5402_v9 }
 0x4d3   : > { %4978 = vmatpush3.bf16.msra.mxu1 %v5400_v7  ;;  %4987 = vmatprep.subr.bf16.mxu0 %v5506_v18 }
 0x4d6   : > { %4988 = vmatpush3.bf16.msra.mxu0 %v5403_v8 }
 0x4d7   : > { %4989 = vmatprep.subr.bf16.mxu0 %v5506_v18 }
 0x4da   : > { %4990 = vmatpush3.bf16.msra.mxu0 %v5404_v51 }
 0x4db   : > { %4991 = vmatprep.subr.bf16.mxu0 %v5506_v18 }
 0x4de   : > { %4992 = vmatpush3.bf16.msra.mxu0 %v5405_v28 }
 0x4df   : > { %4993 = vmatprep.subr.bf16.mxu0 %v5506_v18  ;;  %v4862_v18 = vld [vmem:[%s7887_s12] ss:$0 sm:$0xff] }
 0x4e2   : > { %4994 = vmatpush3.bf16.msra.mxu0 %v5406_v11 }
 0x56d   : > { %v4890_v43 = vpop.f32.mrf.mxu0 }
 0x56f   : > { %v4891_v47 = vpop.f32.mrf.mxu0 }
 0x570   : > { %v4892_v30 = vadd.f32 %v4891_v47, %v4890_v43 }
 0x571   : > { %v4893_v34 = vpop.f32.mrf.mxu0 }
 0x572   : > { %v4087_v14 = vadd.f32 %v4892_v30, %v4811_v50 }
 0x573   : > { %v4894_v38 = vpop.f32.mrf.mxu0 }
 0x575   : > { %v4912_v54 = vpop.f32.mrf.mxu1 }
 0x577   : > { %v4913_v46 = vpop.f32.mrf.mxu1 }
 0x578   : > { %v4914_v29 = vadd.f32 %v4913_v46, %v4912_v54 }
 0x579   : > { %v4915_v5 = vpop.f32.mrf.mxu1 }
 0x57a   : > { %v4127_v21 = vadd.f32 %v4914_v29, %v4087_v14 }
 0x57b   : > { %v4916_v26 = vpop.f32.mrf.mxu1 }
 0x58d   : > { %v4166_v58 = vpop.f32.mrf.mxu0 }
 0x58e   : > { %v4167_v62 = vadd.f32 %v4166_v58, %v4127_v21 }
 0x58f   : > { %v4961_v0 = vpop.f32.mrf.mxu0 }
 0x590   : > { %v4172_v15 = vmax.f32 %v4167_v62, 0.0 }
 0x591   : > { %v4169_v60 = vpop.f32.mrf.mxu0 }
 0x592   : > { %v4173_v2 = vpack.c.bf16 %v4172_v15, %v4172_v15 }
 0x593   : > { %v4962_v10 = vpop.f32.mrf.mxu0 }
 0x594   : > { %4980 = vmatmul.mubr.msk.bf16.vlgmr.msra.gmra.mxu1 %vm4241_vm5, %v4173_v2 }
 0x654   : > { %v4282_v39 = vpop.f32.mrf.mxu1 }
 0x655   : > { %v4283_v19 = vadd.f32 %v4852_v3, %v4282_v39 }
 0x656   : > { %v4981_v63 = vpop.f32.mrf.mxu1 }
 0x657   : > { %v4288_v16 = vmax.f32 %v4283_v19, 0.0 }
 0x658   : > { %v4285_v25 = vpop.f32.mrf.mxu1 }
 0x659   : > { %v4289_v22 = vpack.c.bf16 %v4288_v16, %v4288_v16 }
 0x65a   : > { %v4982_v61 = vpop.f32.mrf.mxu1 }
 0x65b   : > { %4996 = vmatmul.mubr.msk.bf16.vlgmr.msra.gmra.mxu0 %vm4341_vm6, %v4289_v22 }
 0x71b   : > { %v4383_v1 = vpop.f32.mrf.mxu0 }
 0x71c   : > { %v4384_v48 = vadd.f32 %v4862_v18, %v4383_v1 }
 0x71d   : > { %v4997_v44 = vpop.f32.mrf.mxu0 }
 0x71e   : > { %4389 = vmax.xlane.f32.xlu0 %v4384_v48 }
 0x71f   : > { %v4386_v49 = vpop.f32.mrf.mxu0 }
 0x721   : > { %v4998_v24 = vpop.f32.mrf.mxu0 }
 0x7a7   : > { %v4390_v23 = vpop.xlane.xlu0 %4389 }
 0x7a8   : > { %v4391_v40 = vsub.f32 %v4384_v48, %v4390_v23 }
 0x7aa   : > { %v4392_v52 = vmul.f32 1.442695, %v4391_v40 }
 0x7ac   : > { %5407 = vpow2.f32 %v4392_v52 }
 0x7b9   : > { %v5408_v57 = vpop.eup %5407 }
 0x7ba   : > { %4394 = vadd.xlane.f32.xlu0 %v5408_v57 }
 0x843   : > { %v4395_v35 = vpop.xlane.xlu0 %4394 }
 0x844   : > { %5409 = vlog2.f32 %v4395_v35 }
 0x851   : > { %v5410_v4 = vpop.eup %5409 }
 0x852   : > { %v4397_v33 = vmul.f32 0.6931472, %v5410_v4 }
 0x854   : > { %v4398_v42 = vsub.f32 %v4391_v40, %v4397_v33 }
 0x856   : > { %4399 = vst [vmem:[%s605_s15] sm:$0xff] %v4398_v42 }
 0x857   : > { %5456 = shalt.err (!%p5453_p5)
}
 0x858   : > { %s5457_s30 = scalar_lea.hbm %s4412_s0, 128  ;;  %s5461_s15 = scalar_lea.hbm %s7888_s13, 256 }
 0x859   : > { %p5458_p7 = scmp.ne.s32.totalorder %s4412_s0, %s5457_s30  ;;  %p5462_p12 = scmp.lt.s32.totalorder %s4412_s0, %s7888_s13 }
 0x85a   : > { %p5463_p13 = scmp.lt.s32.totalorder %s5461_s15, %s5457_s30 }
 0x85b   : > { %p5459_p10 = pnand %p5458_p7, %p5617_p6 }
 0x85c   : > { %p5464_p0 = por %p5463_p13, %p5462_p12 }
 0x85d   : > { %p5460_p11 = pneg %p5459_p10 }
 0x85f   : > { %p5465_p9 = pnand %p5464_p0, %p5460_p11 }
 0x861   : > { %5468 = shalt.err (!%p5465_p9)
}
 0x862   : > { %4999 = dma.vmem_to_hbm [thread:$0]  (%p5617_p6), %s4415_s20, 128, %s4412_s0, %s4401_s1  }
 0x863 PF: > { %s4426_s2 = sand.u32 1, %s5491_s25   ;;  %p8079_p1 = scmp.ge.s32.totalorder %s5503_s28, 2 }
 0x864   : > { %s4427_s3 = scalar_lea.sflag [#allocation4], %s4426_s2 }
 0x865   : > { %p5002_p2 = pnand %p8079_p1, %p5621_p8 }
 0x867   : > { %p5003_p3 = pneg %p5002_p2 }
 0x869   : > { %5486 = dma.done.wait (%p5003_p3), %s4427_s3, 128  }
 0x86a   : > { %5488 = vsyncadd (%p5003_p3), %s4427_s3, 4294967168  ;;  %p23_p9 = scmp.ge.s32.totalorder %s5602_s14, 4   ;;  %s8080_s25 = smov %s5495_s26 }
 0x86b   : > { %s8081_s26 = smov %s5499_s27  ;;  %s8082_s27 = smov %s5615_s17 }
 0x86c   : > { %s8083_s28 = smov %s5602_s14  ;;  %25 = sbr.rel (!%p23_p9) target bundleno = 8 (0x8), region = 186 }
 0x871   :  { %4432 = vsyncpa [#allocation4], 1 }
 0x872   :  { %4434 = vsyncpa [#allocation4 + $0x1], 1 }

</bundles_post_ra>
